<compile_context>
chip_gen: v6e
topology: v6e:2x2x1
jax: 0.10.0
libtpu: 0.0.40
codegen_flags: <defaults>
</compile_context>

<pallas_src>
import jax
import jax.numpy as jnp
from jax.experimental import pallas as pl
from jax.experimental.pallas import tpu as pltpu

_LANE = 128              # vreg lane width; batch (lane) axis padded to this.
_MAX_SINGLE_STEP = 4096  # up to this many batch lanes -> one grid step.
_MAX_TILE = 8192         # cap on batch-tile width for very large batches.

# Mirrors the PyTorch af_list = {0: Tanh, 1: Sigmoid, 2: ReLU, 3: Sin}.
# (ReLU is the cheapest on TPU: it runs on the 4 VALU slots instead of the
#  single EUP slot used by tanh/sigmoid/sin.)
_ACTIVATIONS = {
    0: jnp.tanh,
    1: jax.nn.sigmoid,
    2: lambda x: jnp.maximum(x, 0.0),
    3: jnp.sin,
}

# Module-level constant index map (avoids Python late-binding hazards).
_CONST_MAP = lambda i: (0, 0)

_HIGHEST = jax.lax.Precision.HIGHEST


def _make_mlp_kernel(num_linear, act_fn):
    """Fused (Linear -> act)*(L-1) -> Linear on one batch tile.

    x_ref is the native-layout (batch_tile, d_in) block; every intermediate
    h is (out_i, batch_tile) so the batch stays on the lane axis.
    """

    def kernel(x_ref, *refs):
        out_ref = refs[-1]
        params = refs[:-1]  # [w0, b0, w1, b1, ...]; w_i: (out_i, in_i), b_i: (out_i, tile)
        h = None
        for i in range(num_linear):
            w = params[2 * i][...]
            b = params[2 * i + 1][...]
            if i == 0:
                # Contract the shared `in` axis of w (out0, d_in) against the
                # native-layout x block (tile, d_in) -> (out0, tile).  No
                # wrapper-side or in-kernel transpose of x is needed.
                h = jax.lax.dot_general(
                    w, x_ref[...], (((1,), (1,)), ((), ())),
                    preferred_element_type=jnp.float32,
                    precision=_HIGHEST)
            else:
                h = jnp.dot(w, h, preferred_element_type=jnp.float32,
                            precision=_HIGHEST)
            h = h + b                       # same-shape add (bias pre-broadcast)
            if i < num_linear - 1:
                h = act_fn(h)
        out_ref[...] = h.astype(out_ref.dtype)

    return kernel


def _pick_tiling(batch):
    """Return (batch_tile, b_pad); b_pad = n_tiles * batch_tile, lane aligned.

    * b_pad <= 4096 lanes  -> one grid step (no pipeline overhead on the
      single-TC v5e/v6e; a single step is also optimal for small batches on
      v7x since the kernel is overhead-bound there).
    * larger batches       -> fat tiles (<= _MAX_TILE) with an EVEN tile count
      so v7x's two TensorCores split the "parallel" batch axis evenly.
    """
    b_pad = pl.cdiv(batch, _LANE) * _LANE
    if b_pad <= _MAX_SINGLE_STEP:
        return b_pad, b_pad
    n_tiles = 2 * pl.cdiv(b_pad, 2 * _MAX_TILE)        # minimal even count
    tile = pl.cdiv(b_pad, n_tiles * _LANE) * _LANE     # lane-aligned tile
    return tile, n_tiles * tile


def mlp_forward(x, weights, biases, act_id, *, batch_tile=None):
    """Fused Net forward pass as one pallas_call.

    x:       (B, d_in)  float32 (native layout, not transposed)
    weights: list of (in_i, out_i) float32   (== PyTorch W.T)
    biases:  list of (out_i,)      float32
    Returns (B, d_out) float32.
    """
    act_fn = _ACTIVATIONS[act_id]
    num_linear = len(weights)
    B, d_in = x.shape
    d_out = int(weights[-1].shape[1])

    if batch_tile is None:
        batch_tile, b_pad = _pick_tiling(B)
    else:
        assert batch_tile % _LANE == 0, "batch_tile must be lane aligned"
        b_pad = pl.cdiv(B, batch_tile) * batch_tile
    grid = (b_pad // batch_tile,)

    x = x.astype(jnp.float32)
    if b_pad != B:
        # Cheap native-layout zero pad (no transpose / relayout of x).
        x = jnp.pad(x, ((0, b_pad - B), (0, 0)))

    in_specs = [pl.BlockSpec((batch_tile, d_in), lambda i: (i, 0))]
    args = [x]
    for w, b in zip(weights, biases):
        wT = w.T.astype(jnp.float32)                    # (out_i, in_i), PyTorch layout
        out_i = int(wT.shape[0])
        # Lane-replicated bias slab -> plain full-width add in the kernel
        # (no per-layer 1-lane broadcast).  DMA'd once per call (const map).
        bb = jnp.broadcast_to(b.astype(jnp.float32).reshape(out_i, 1),
                              (out_i, batch_tile))
        in_specs.append(pl.BlockSpec(wT.shape, _CONST_MAP))
        in_specs.append(pl.BlockSpec(bb.shape, _CONST_MAP))
        args.append(wT)
        args.append(bb)

    out_spec = pl.BlockSpec((d_out, batch_tile), lambda i: (0, i))

    # Advisory cost hint so XLA overlaps this tiny call with surrounding ops.
    flops = 2 * b_pad * sum(int(w.shape[0]) * int(w.shape[1]) for w in weights)
    transcendentals = 0
    if act_id in (0, 1, 3):  # tanh / sigmoid / sin hit the single EUP slot
        transcendentals = b_pad * sum(int(w.shape[1]) for w in weights[:-1])
    bytes_accessed = 4 * (b_pad * d_in + d_out * b_pad
                          + sum(int(w.size) for w in weights)
                          + sum(int(b.shape[0]) * batch_tile for b in biases))
    cost = pl.CostEstimate(flops=flops, transcendentals=transcendentals,
                           bytes_accessed=bytes_accessed)

    kernel = _make_mlp_kernel(num_linear, act_fn)

    outT = pl.pallas_call(
        kernel,
        out_shape=jax.ShapeDtypeStruct((d_out, b_pad), jnp.float32),
        grid_spec=pltpu.PrefetchScalarGridSpec(
            num_scalar_prefetch=0,
            grid=grid,
            in_specs=in_specs,
            out_specs=out_spec,
        ),
        compiler_params=pltpu.CompilerParams(
            # Batch tiles are independent; on v7x this lets the two TCs split
            # them (if a trace shows no split, switch this axis to
            # pltpu.CORE_PARALLEL).  On 1-TC v5e/v6e it is a no-op.
            dimension_semantics=("parallel",),
        ),
        cost_estimate=cost,
    )(*args)

    return outT.T[:B]                                   # back to (B, d_out)


# ---------------------------------------------------------------------------
# Deterministic parameter init (PyTorch nn.Linear default: U(-k, k), k=1/sqrt(fan_in))
# ---------------------------------------------------------------------------
def init_params(key, nn_layers):
    weights, biases = [], []
    for i in range(len(nn_layers) - 1):
        fan_in, fan_out = nn_layers[i], nn_layers[i + 1]
        key, kw, kb = jax.random.split(key, 3)
        bound = 1.0 / jnp.sqrt(fan_in)
        # Stored as (in, out) == PyTorch W.T; wrapper re-transposes for the kernel.
        w = jax.random.uniform(kw, (fan_in, fan_out), jnp.float32, -bound, bound)
        b = jax.random.uniform(kb, (fan_out,), jnp.float32, -bound, bound)
        weights.append(w)
        biases.append(b)
    return weights, biases


def reference_forward(x, weights, biases, act_id):
    act_fn = _ACTIVATIONS[act_id]
    h = x.astype(jnp.float32)
    n = len(weights)
    for i, (w, b) in enumerate(zip(weights, biases)):
        h = jnp.dot(h, w, precision=_HIGHEST) + b
        if i < n - 1:
            h = act_fn(h)
    return h


if __name__ == "__main__":
    # Net(parameters=[nn_layers, act_fun]) for the 10-D Volterra IDE auxiliary
    # PINN: 10 inputs -> 3 hidden layers of 32 -> 1 output, Sin activation.
    nn_layers = [10, 32, 32, 32, 1]
    act_fun = 3  # Sin

    key = jax.random.PRNGKey(0)
    key, kx = jax.random.split(key)
    weights, biases = init_params(key, nn_layers)

    # --- main check: small batch -> single grid step (no pipeline overhead) ---
    batch = 256
    x = jax.random.uniform(kx, (batch, nn_layers[0]), jnp.float32)
    out = jax.block_until_ready(mlp_forward(x, weights, biases, act_fun))
    ref = reference_forward(x, weights, biases, act_fun)
    assert out.shape == (batch, nn_layers[-1])
    assert jnp.allclose(out, ref, atol=2e-5, rtol=1e-5), \
        float(jnp.max(jnp.abs(out - ref)))

    # --- secondary check: multi-tile grid + ragged batch (exercises padding,
    #     per-tile output writeback and the "parallel" batch axis) ---
    batch2 = 300
    key, kx2 = jax.random.split(key)
    x2 = jax.random.uniform(kx2, (batch2, nn_layers[0]), jnp.float32)
    out2 = jax.block_until_ready(
        mlp_forward(x2, weights, biases, act_fun, batch_tile=128))
    ref2 = reference_forward(x2, weights, biases, act_fun)
    assert out2.shape == (batch2, nn_layers[-1])
    assert jnp.allclose(out2, ref2, atol=2e-5, rtol=1e-5), \
        float(jnp.max(jnp.abs(out2 - ref2)))

    print("KERNEL_OK")
</pallas_src>

<mosaic_0001>
module attributes {stable_mosaic.version = 11 : i64} {
  func.func @kernel(%arg0: i32, %arg1: memref<256x10xf32, #tpu.memory_space<vmem>>, %arg2: memref<32x10xf32, #tpu.memory_space<vmem>>, %arg3: memref<32x256xf32, #tpu.memory_space<vmem>>, %arg4: memref<32x32xf32, #tpu.memory_space<vmem>>, %arg5: memref<32x256xf32, #tpu.memory_space<vmem>>, %arg6: memref<32x32xf32, #tpu.memory_space<vmem>>, %arg7: memref<32x256xf32, #tpu.memory_space<vmem>>, %arg8: memref<1x32xf32, #tpu.memory_space<vmem>>, %arg9: memref<1x256xf32, #tpu.memory_space<vmem>>, %arg10: memref<1x256xf32, #tpu.memory_space<vmem>>) attributes {dimension_semantics = [#tpu.dimension_semantics<parallel>], iteration_bounds = array<i64: 1>, scalar_prefetch = 0 : i64, scratch_operands = 0 : i64, tpu.core_type = #tpu.core_type<tc>, window_params = [{transform_indices = @transform_0, window_bounds = array<i64: 256, 10>}, {pipeline_mode = #tpu.pipeline_mode<synchronous>, transform_indices = @transform_1, window_bounds = array<i64: 32, 10>}, {pipeline_mode = #tpu.pipeline_mode<synchronous>, transform_indices = @transform_2, window_bounds = array<i64: 32, 256>}, {pipeline_mode = #tpu.pipeline_mode<synchronous>, transform_indices = @transform_3, window_bounds = array<i64: 32, 32>}, {pipeline_mode = #tpu.pipeline_mode<synchronous>, transform_indices = @transform_4, window_bounds = array<i64: 32, 256>}, {pipeline_mode = #tpu.pipeline_mode<synchronous>, transform_indices = @transform_5, window_bounds = array<i64: 32, 32>}, {pipeline_mode = #tpu.pipeline_mode<synchronous>, transform_indices = @transform_6, window_bounds = array<i64: 32, 256>}, {pipeline_mode = #tpu.pipeline_mode<synchronous>, transform_indices = @transform_7, window_bounds = array<i64: 1, 32>}, {pipeline_mode = #tpu.pipeline_mode<synchronous>, transform_indices = @transform_8, window_bounds = array<i64: 1, 256>}, {transform_indices = @transform_9, window_bounds = array<i64: 1, 256>}]} {
    %c0 = arith.constant 0 : index
    %c0_0 = arith.constant 0 : index
    %0 = vector.load %arg2[%c0, %c0_0] : memref<32x10xf32, #tpu.memory_space<vmem>>, vector<32x10xf32>
    %c0_1 = arith.constant 0 : index
    %c0_2 = arith.constant 0 : index
    %1 = vector.load %arg3[%c0_1, %c0_2] : memref<32x256xf32, #tpu.memory_space<vmem>>, vector<32x256xf32>
    %c0_3 = arith.constant 0 : index
    %c0_4 = arith.constant 0 : index
    %2 = vector.load %arg1[%c0_3, %c0_4] : memref<256x10xf32, #tpu.memory_space<vmem>>, vector<256x10xf32>
    %cst = arith.constant dense<0.000000e+00> : vector<32x256xf32>
    %3 = tpu.matmul %0, %2, %cst {dimension_numbers = #tpu.dot_dimension_numbers<[1], [1], [0], [0], [0, 0, 1, 0], [], []>, precision = #tpu.contract_precision<fp32>} : vector<32x10xf32>, vector<256x10xf32>, vector<32x256xf32> -> vector<32x256xf32>
    %4 = arith.addf %3, %1 : vector<32x256xf32>
    %5 = math.sin %4 : vector<32x256xf32>
    %c0_5 = arith.constant 0 : index
    %c0_6 = arith.constant 0 : index
    %6 = vector.load %arg4[%c0_5, %c0_6] : memref<32x32xf32, #tpu.memory_space<vmem>>, vector<32x32xf32>
    %c0_7 = arith.constant 0 : index
    %c0_8 = arith.constant 0 : index
    %7 = vector.load %arg5[%c0_7, %c0_8] : memref<32x256xf32, #tpu.memory_space<vmem>>, vector<32x256xf32>
    %cst_9 = arith.constant dense<0.000000e+00> : vector<32x256xf32>
    %8 = tpu.matmul %6, %5, %cst_9 {dimension_numbers = #tpu.dot_dimension_numbers<[1], [0], [0], [1], [0, 0, 1, 1], [], []>, precision = #tpu.contract_precision<fp32>} : vector<32x32xf32>, vector<32x256xf32>, vector<32x256xf32> -> vector<32x256xf32>
    %9 = arith.addf %8, %7 : vector<32x256xf32>
    %10 = math.sin %9 : vector<32x256xf32>
    %c0_10 = arith.constant 0 : index
    %c0_11 = arith.constant 0 : index
    %11 = vector.load %arg6[%c0_10, %c0_11] : memref<32x32xf32, #tpu.memory_space<vmem>>, vector<32x32xf32>
    %c0_12 = arith.constant 0 : index
    %c0_13 = arith.constant 0 : index
    %12 = vector.load %arg7[%c0_12, %c0_13] : memref<32x256xf32, #tpu.memory_space<vmem>>, vector<32x256xf32>
    %cst_14 = arith.constant dense<0.000000e+00> : vector<32x256xf32>
    %13 = tpu.matmul %11, %10, %cst_14 {dimension_numbers = #tpu.dot_dimension_numbers<[1], [0], [0], [1], [0, 0, 1, 1], [], []>, precision = #tpu.contract_precision<fp32>} : vector<32x32xf32>, vector<32x256xf32>, vector<32x256xf32> -> vector<32x256xf32>
    %14 = arith.addf %13, %12 : vector<32x256xf32>
    %15 = math.sin %14 : vector<32x256xf32>
    %c0_15 = arith.constant 0 : index
    %c0_16 = arith.constant 0 : index
    %16 = vector.load %arg8[%c0_15, %c0_16] : memref<1x32xf32, #tpu.memory_space<vmem>>, vector<1x32xf32>
    %c0_17 = arith.constant 0 : index
    %c0_18 = arith.constant 0 : index
    %17 = vector.load %arg9[%c0_17, %c0_18] : memref<1x256xf32, #tpu.memory_space<vmem>>, vector<1x256xf32>
    %cst_19 = arith.constant dense<0.000000e+00> : vector<1x256xf32>
    %18 = tpu.matmul %16, %15, %cst_19 {dimension_numbers = #tpu.dot_dimension_numbers<[1], [0], [0], [1], [0, 0, 1, 1], [], []>, precision = #tpu.contract_precision<fp32>} : vector<1x32xf32>, vector<32x256xf32>, vector<1x256xf32> -> vector<1x256xf32>
    %19 = arith.addf %18, %17 : vector<1x256xf32>
    %c0_20 = arith.constant 0 : index
    %c0_21 = arith.constant 0 : index
    %20 = vector.load %arg10[%c0_20, %c0_21] : memref<1x256xf32, #tpu.memory_space<vmem>>, vector<1x256xf32>
    tpu.vector_store %arg10[%c0_20, %c0_21], %19 {strides = array<i32>} : memref<1x256xf32, #tpu.memory_space<vmem>>, vector<1x256xf32>,
    return
  }
  func.func @transform_0(%arg0: i32) -> (i32, i32) {
    %c0_i32 = arith.constant 0 : i32
    %c0_i32_0 = arith.constant 0 : i32
    return %arg0, %c0_i32 : i32, i32
  }
  func.func @transform_1(%arg0: i32) -> (i32, i32) {
    %c0_i32 = arith.constant 0 : i32
    %c0_i32_0 = arith.constant 0 : i32
    %c0_i32_1 = arith.constant 0 : i32
    return %c0_i32, %c0_i32_0 : i32, i32
  }
  func.func @transform_2(%arg0: i32) -> (i32, i32) {
    %c0_i32 = arith.constant 0 : i32
    %c0_i32_0 = arith.constant 0 : i32
    %c0_i32_1 = arith.constant 0 : i32
    return %c0_i32, %c0_i32_0 : i32, i32
  }
  func.func @transform_3(%arg0: i32) -> (i32, i32) {
    %c0_i32 = arith.constant 0 : i32
    %c0_i32_0 = arith.constant 0 : i32
    %c0_i32_1 = arith.constant 0 : i32
    return %c0_i32, %c0_i32_0 : i32, i32
  }
  func.func @transform_4(%arg0: i32) -> (i32, i32) {
    %c0_i32 = arith.constant 0 : i32
    %c0_i32_0 = arith.constant 0 : i32
    %c0_i32_1 = arith.constant 0 : i32
    return %c0_i32, %c0_i32_0 : i32, i32
  }
  func.func @transform_5(%arg0: i32) -> (i32, i32) {
    %c0_i32 = arith.constant 0 : i32
    %c0_i32_0 = arith.constant 0 : i32
    %c0_i32_1 = arith.constant 0 : i32
    return %c0_i32, %c0_i32_0 : i32, i32
  }
  func.func @transform_6(%arg0: i32) -> (i32, i32) {
    %c0_i32 = arith.constant 0 : i32
    %c0_i32_0 = arith.constant 0 : i32
    %c0_i32_1 = arith.constant 0 : i32
    return %c0_i32, %c0_i32_0 : i32, i32
  }
  func.func @transform_7(%arg0: i32) -> (i32, i32) {
    %c0_i32 = arith.constant 0 : i32
    %c0_i32_0 = arith.constant 0 : i32
    %c0_i32_1 = arith.constant 0 : i32
    return %c0_i32, %c0_i32_0 : i32, i32
  }
  func.func @transform_8(%arg0: i32) -> (i32, i32) {
    %c0_i32 = arith.constant 0 : i32
    %c0_i32_0 = arith.constant 0 : i32
    %c0_i32_1 = arith.constant 0 : i32
    return %c0_i32, %c0_i32_0 : i32, i32
  }
  func.func @transform_9(%arg0: i32) -> (i32, i32) {
    %c0_i32 = arith.constant 0 : i32
    %c0_i32_0 = arith.constant 0 : i32
    return %c0_i32, %arg0 : i32, i32
  }
}

</mosaic_0001>

<bundles_post_ra>
// kernel: tpu_custom_call.1
= control target key start
LH: loop header
LB: loop body
LE: loop exit
PB: predicated region body
PF: predicated region fallthrough
CT: control target
= control target key end

     0   :  { %vm77_vm0 = vcmask 80896   ;;  %s10087_s0 = inlined_call_operand.vmem [shape: f32[256,10], index: 0, kind: input, shape index: {}]   ;;  %s10088_s1 = inlined_call_operand.vmem [shape: f32[32,10], index: 1, kind: input, shape index: {}]   ;;  %s10089_s2 = inlined_call_operand.vmem [shape: f32[32,256], index: 2, kind: input, shape index: {}]   ;;  %s10090_s3 = inlined_call_operand.vmem [shape: f32[32,32], index: 3, kind: input, shape index: {}]   ;;  %s10091_s4 = inlined_call_operand.vmem [shape: f32[32,256], index: 4, kind: input, shape index: {}]   ;;  %s10092_s5 = inlined_call_operand.vmem [shape: f32[32,32], index: 5, kind: input, shape index: {}]   ;;  %s10093_s6 = inlined_call_operand.vmem [shape: f32[32,256], index: 6, kind: input, shape index: {}]   ;;  %s10094_s7 = inlined_call_operand.vmem [shape: f32[1,32], index: 7, kind: input, shape index: {}]   ;;  %s10095_s8 = inlined_call_operand.vmem [shape: f32[1,256], index: 8, kind: input, shape index: {}]   ;;  %s10096_s9 = inlined_call_operand.hbm [shape: f32[1,256], index: 9, kind: output, shape index: {}]  }
   0x1   :  { %v76_v0 = vld [vmem:[%s10087_s0 + $0xf8] sm:$0xff]  ;;  %v75_v2 = vld [vmem:[%s10087_s0 + $0xf0] sm:$0xff]  ;;  %v74_v7 = vld [vmem:[%s10087_s0 + $0xe8] sm:$0xff] }
   0x2   :  { %v60_v1 = vld [vmem:[%s10087_s0 + $0x78] sm:$0xff]  ;;  %v184_v3 = vsel %vm77_vm0, %v76_v0, 0  ;;  %v181_v5 = vsel %vm77_vm0, %v75_v2, 0  ;;  %v59_v6 = vld [vmem:[%s10087_s0 + $0x70] sm:$0xff]  ;;  %v58_v8 = vld [vmem:[%s10087_s0 + $0x68] sm:$0xff]  ;;  %v178_v16 = vsel %vm77_vm0, %v74_v7, 0 }
   0x3   :  { %v136_v4 = vsel %vm77_vm0, %v60_v1, 0  ;;  %v6348_v9 = vand.u32 4294901760, %v184_v3  ;;  %v6352_v11 = vand.u32 4294901760, %v181_v5  ;;  %v133_v12 = vsel %vm77_vm0, %v59_v6, 0  ;;  %v73_v13 = vld [vmem:[%s10087_s0 + $0xe0] sm:$0xff]  ;;  %v72_v19 = vld [vmem:[%s10087_s0 + $0xd8] sm:$0xff] }
   0x4   :  { %v6350_v10 = vand.u32 4294901760, %v136_v4  ;;  %v57_v14 = vld [vmem:[%s10087_s0 + $0x60] sm:$0xff]  ;;  %v6361_v15 = vand.u32 4294901760, %v133_v12  ;;  %v130_v17 = vsel %vm77_vm0, %v58_v8, 0  ;;  %v175_v18 = vsel %vm77_vm0, %v73_v13, 0  ;;  %v56_v27 = vld [vmem:[%s10087_s0 + $0x58] sm:$0xff] }
   0x5   :  { %5805 = vmatprep.subr.mxu0 %v6348_v9  ;;  %v6370_v20 = vand.u32 4294901760, %v178_v16  ;;  %v6373_v21 = vsub.f32 %v184_v3, %v6348_v9  ;;  %v6375_v22 = vand.u32 4294901760, %v130_v17  ;;  %v6382_v24 = vsub.f32 %v181_v5, %v6352_v11  ;;  %v71_v36 = vld [vmem:[%s10087_s0 + $0xd0] sm:$0xff]  ;;  %v70_v50 = vld [vmem:[%s10087_s0 + $0xc8] sm:$0xff]  ;;  %v69_v60 = vld [vmem:[%s10087_s0 + $0xc0] sm:$0xff] }
   0x6   :  { %v6378_v23 = vsub.f32 %v136_v4, %v6350_v10  ;;  %5806 = vmatpush3.xpose.msra.mxu0 %v6350_v10  ;;  %v127_v25 = vsel %vm77_vm0, %v57_v14, 0  ;;  %v6386_v26 = vsub.f32 %v133_v12, %v6361_v15  ;;  %v6394_v30 = vand.u32 4294901760, %v175_v18  ;;  %v55_v45 = vld [vmem:[%s10087_s0 + $0x50] sm:$0xff]  ;;  %v54_v59 = vld [vmem:[%s10087_s0 + $0x48] sm:$0xff] }
   0x7   :  { %5807 = vmatprep.subr.mxu0 %v6352_v11  ;;  %v10113_v28 = vand.u32 4294901760, %v6373_v21  ;;  %v172_v31 = vsel %vm77_vm0, %v72_v19, 0  ;;  %v10110_v32 = vand.u32 4294901760, %v6382_v24  ;;  %v6398_v33 = vand.u32 4294901760, %v127_v25 }
   0x8   :  { %v10112_v29 = vand.u32 4294901760, %v6378_v23  ;;  %v10109_v34 = vand.u32 4294901760, %v6386_v26  ;;  %v6402_v35 = vsub.f32 %v178_v16, %v6370_v20  ;;  %v124_v39 = vsel %vm77_vm0, %v56_v27, 0 }
   0x9   :  { %v443_v37 = vsub.f32 %v6373_v21, %v10113_v28  ;;  %v6415_v40 = vsub.f32 %v130_v17, %v6375_v22  ;;  %v450_v41 = vsub.f32 %v6382_v24, %v10110_v32  ;;  %v6424_v43 = vand.u32 4294901760, %v172_v31 }
   0xa   :  { %v331_v38 = vsub.f32 %v6378_v23, %v10112_v29  ;;  %5808 = vmatpush3.xpose.msra.mxu0 %v6361_v15  ;;  %v338_v42 = vsub.f32 %v6386_v26, %v10109_v34  ;;  %v10108_v44 = vand.u32 4294901760, %v6402_v35  ;;  %v169_v49 = vsel %vm77_vm0, %v71_v36, 0 }
   0xb   :  { %5809 = vmatprep.subr.mxu0 %v6370_v20  ;;  %v444_v46 = vand.u32 4294901760, %v443_v37  ;;  %v10106_v48 = vand.u32 4294901760, %v6415_v40  ;;  %v451_v51 = vand.u32 4294901760, %v450_v41  ;;  %v6439_v54 = vand.u32 4294901760, %v124_v39 }
   0xc   :  { %v332_v47 = vand.u32 4294901760, %v331_v38  ;;  %v339_v52 = vand.u32 4294901760, %v338_v42  ;;  %v457_v53 = vsub.f32 %v6402_v35, %v10108_v44  ;;  %v6445_v56 = vsub.f32 %v175_v18, %v6394_v30 }
   0xd   :  { %5845 = vmatprep.subr.mxu1 %v444_v46  ;;  %v345_v55 = vsub.f32 %v6415_v40, %v10106_v48  ;;  %v121_v57 = vsel %vm77_vm0, %v55_v45, 0  ;;  %v6449_v58 = vsub.f32 %v127_v25, %v6398_v33  ;;  %v6458_v62 = vand.u32 4294901760, %v169_v49 }
   0xe   :  { %5810 = vmatpush3.xpose.msra.mxu0 %v6375_v22  ;;  %5846 = vmatpush3.xpose.msra.mxu1 %v332_v47  ;;  %v458_v61 = vand.u32 4294901760, %v457_v53  ;;  %v166_v63 = vsel %vm77_vm0, %v70_v50, 0  ;;  %v6462_v0 = vsub.f32 %v172_v31, %v6424_v43 }
   0xf   :  { %14 = vsyncpa [#allocation3], 0  ;;  %5811 = vmatprep.subr.mxu0 %v6394_v30  ;;  %5847 = vmatprep.subr.mxu1 %v451_v51  ;;  %v346_v1 = vand.u32 4294901760, %v345_v55  ;;  %v10105_v2 = vand.u32 4294901760, %v6445_v56  ;;  %v6466_v3 = vand.u32 4294901760, %v121_v57  ;;  %v10103_v4 = vand.u32 4294901760, %v6449_v58 }
  0x10   :  { %v53_v5 = vld [vmem:[%s10087_s0 + $0x40] sm:$0xff]  ;;  %v10101_v6 = vand.u32 4294901760, %v6462_v0  ;;  %v118_v7 = vsel %vm77_vm0, %v54_v59, 0  ;;  %v6475_v8 = vsub.f32 %v124_v39, %v6439_v54  ;;  %v163_v12 = vsel %vm77_vm0, %v69_v60, 0  ;;  %v68_v18 = vld [vmem:[%s10087_s0 + $0xb8] sm:$0xff]  ;;  %v67_v46 = vld [vmem:[%s10087_s0 + $0xb0] sm:$0xff] }
  0x11   :  { %v464_v13 = vsub.f32 %v6445_v56, %v10105_v2  ;;  %v352_v14 = vsub.f32 %v6449_v58, %v10103_v4  ;;  %v6484_v16 = vand.u32 4294901760, %v166_v63  ;;  %v6486_v17 = vand.u32 4294901760, %v118_v7  ;;  %v52_v45 = vld [vmem:[%s10087_s0 + $0x38] sm:$0xff]  ;;  %v51_v59 = vld [vmem:[%s10087_s0 + $0x30] sm:$0xff] }
  0x12   :  { %5812 = vmatpush3.xpose.msra.mxu0 %v6398_v33  ;;  %5848 = vmatpush3.xpose.msra.mxu1 %v339_v52  ;;  %v471_v19 = vsub.f32 %v6462_v0, %v10101_v6  ;;  %v10100_v25 = vand.u32 4294901760, %v6475_v8  ;;  %v6497_v27 = vsub.f32 %v169_v49, %v6458_v62  ;;  %v115_v31 = vsel %vm77_vm0, %v53_v5, 0  ;;  %v66_v5 = vld [vmem:[%s10087_s0 + $0xa8] sm:$0xff]  ;;  %v48_v32 = vld [vmem:[%s10087_s0 + $0x18] sm:$0xff] }
  0x13   :  { %10248 = vst [vmem:[#allocation5_spill] sm:$0xff] %v6486_v17  ;;  %5813 = vmatprep.subr.mxu0 %v6424_v43  ;;  %5849 = vmatprep.subr.mxu1 %v458_v61  ;;  %v465_v36 = vand.u32 4294901760, %v464_v13  ;;  %v6501_v37 = vand.u32 4294901760, %v163_v12  ;;  %v6504_v38 = vsub.f32 %v121_v57, %v6466_v3  ;;  %v353_v39 = vand.u32 4294901760, %v352_v14 }
  0x14   :  { %v10098_v41 = vand.u32 4294901760, %v6497_v27  ;;  %v160_v42 = vsel %vm77_vm0, %v68_v18, 0  ;;  %v359_v47 = vsub.f32 %v6475_v8, %v10100_v25  ;;  %v6517_v49 = vand.u32 4294901760, %v115_v31 }
  0x15   :  { %10249 = vst [vmem:[#allocation6_spill] sm:$0xff] %v6501_v37  ;;  %v10097_v50 = vand.u32 4294901760, %v6504_v38  ;;  %v6521_v51 = vsub.f32 %v166_v63, %v6484_v16  ;;  %v472_v52 = vand.u32 4294901760, %v471_v19  ;;  %v6527_v55 = vand.u32 4294901760, %v160_v42 }
  0x16   :  { %10250 = vst [vmem:[#allocation7_spill] sm:$0xff] %v6517_v49  ;;  %5814 = vmatpush3.xpose.msra.mxu0 %v6439_v54  ;;  %5850 = vmatpush3.xpose.msra.mxu1 %v346_v1  ;;  %v478_v53 = vsub.f32 %v6497_v27, %v10098_v41  ;;  %v6530_v57 = vsub.f32 %v118_v7, %v6486_v17  ;;  %v112_v61 = vsel %vm77_vm0, %v52_v45, 0  ;;  %v157_v63 = vsel %vm77_vm0, %v67_v46, 0  ;;  %v50_v46 = vld [vmem:[%s10087_s0 + $0x28] sm:$0xff] }
  0x17   :  { %10251 = vst [vmem:[#allocation8_spill] sm:$0xff] %v6527_v55  ;;  %5815 = vmatprep.subr.mxu0 %v6458_v62  ;;  %5851 = vmatprep.subr.mxu1 %v465_v36  ;;  %v10099_v60 = vand.u32 4294901760, %v6521_v51  ;;  %v6540_v1 = vsub.f32 %v163_v12, %v6501_v37  ;;  %v360_v7 = vand.u32 4294901760, %v359_v47  ;;  %v366_v13 = vsub.f32 %v6504_v38, %v10097_v50 }
  0x18   :  { %v10102_v14 = vand.u32 4294901760, %v6530_v57  ;;  %v109_v18 = vsel %vm77_vm0, %v51_v59, 0  ;;  %v479_v19 = vand.u32 4294901760, %v478_v53  ;;  %v6551_v36 = vand.u32 4294901760, %v112_v61 }
  0x19   :  { %v6553_v12 = vand.u32 4294901760, %v157_v63  ;;  %v6556_v45 = vsub.f32 %v115_v31, %v6517_v49  ;;  %v485_v47 = vsub.f32 %v6521_v51, %v10099_v60  ;;  %v154_v53 = vsel %vm77_vm0, %v66_v5, 0  ;;  %v65_v31 = vld [vmem:[%s10087_s0 + $0xa0] sm:$0xff] }
  0x1a   :  { %5816 = vmatpush3.xpose.msra.mxu0 %v6466_v3  ;;  %5852 = vmatpush3.xpose.msra.mxu1 %v353_v39  ;;  %10252 = vst [vmem:[#allocation9_spill] sm:$0xff] %v6551_v36  ;;  %v10104_v39 = vand.u32 4294901760, %v6540_v1  ;;  %v6568_v59 = vsub.f32 %v160_v42, %v6527_v55  ;;  %v6573_v50 = vand.u32 4294901760, %v109_v18  ;;  %v367_v41 = vand.u32 4294901760, %v366_v13 }
  0x1b   :  { %10253 = vst [vmem:[#allocation10_spill] sm:$0xff] %v6553_v12  ;;  %5817 = vmatprep.subr.mxu0 %v6484_v16  ;;  %5853 = vmatprep.subr.mxu1 %v472_v52  ;;  %v373_v52 = vsub.f32 %v6530_v57, %v10102_v14  ;;  %v10107_v60 = vand.u32 4294901760, %v6556_v45  ;;  %v106_v25 = vsel %vm77_vm0, %v50_v46, 0  ;;  %v6581_v42 = vand.u32 4294901760, %v154_v53 }
  0x1c   :  { %10254 = vst [vmem:[#allocation11_spill] sm:$0xff] %v6573_v50  ;;  %v6584_v5 = vsub.f32 %v112_v61, %v6551_v36  ;;  %v151_v6 = vsel %vm77_vm0, %v65_v31, 0  ;;  %v6588_v13 = vsub.f32 %v157_v63, %v6553_v12  ;;  %v486_v14 = vand.u32 4294901760, %v485_v47  ;;  %v49_v61 = vld [vmem:[%s10087_s0 + $0x20] sm:$0xff] }
  0x1d   :  { %10255 = vst [vmem:[#allocation12_spill] sm:$0xff] %v6581_v42  ;;  %v492_v46 = vsub.f32 %v6540_v1, %v10104_v39  ;;  %v6598_v4 = vand.u32 4294901760, %v106_v25  ;;  %v6601_v31 = vsub.f32 %v109_v18, %v6573_v50  ;;  %v374_v63 = vand.u32 4294901760, %v373_v52  ;;  %v64_v39 = vld [vmem:[%s10087_s0 + $0x98] sm:$0xff] }
  0x1e   :  { %5818 = vmatpush3.xpose.msra.mxu0 %v6486_v17  ;;  %5854 = vmatpush3.xpose.msra.mxu1 %v360_v7  ;;  %10256 = vst [vmem:[#allocation13_spill] sm:$0xff] %v6588_v13  ;;  %v10111_v7 = vand.u32 4294901760, %v6568_v59  ;;  %v6606_v47 = vand.u32 4294901760, %v151_v6  ;;  %v10114_v2 = vand.u32 4294901760, %v6584_v5  ;;  %v10117_v48 = vand.u32 4294901760, %v6588_v13 }
  0x1f   :  { %5819 = vmatprep.subr.mxu0 %v6501_v37  ;;  %5855 = vmatprep.subr.mxu1 %v479_v19  ;;  %10257 = vst [vmem:[#allocation14_spill] sm:$0xff] %v6598_v4  ;;  %10258 = vst [vmem:[#allocation15_spill] sm:$0xff] %v6601_v31  ;;  %v380_v19 = vsub.f32 %v6556_v45, %v10107_v60  ;;  %v103_v18 = vsel %vm77_vm0, %v49_v61, 0  ;;  %v6616_v52 = vsub.f32 %v154_v53, %v6581_v42 }
  0x20   :  { %10259 = vst [vmem:[#allocation16_spill] sm:$0xff] %v6606_v47  ;;  %v493_v60 = vand.u32 4294901760, %v492_v46  ;;  %v499_v44 = vsub.f32 %v6568_v59, %v10111_v7  ;;  %v6628_v61 = vsub.f32 %v106_v25, %v6598_v4  ;;  %v6630_v53 = vand.u32 4294901760, %v103_v18 }
  0x21   :  { %10260 = vst [vmem:[#allocation17_spill] sm:$0xff] %v6616_v52  ;;  %v6636_v46 = vsub.f32 %v151_v6, %v6606_v47  ;;  %v387_v7 = vsub.f32 %v6584_v5, %v10114_v2  ;;  %v506_v25 = vsub.f32 %v6588_v13, %v10117_v48  ;;  %v10124_v29 = vand.u32 4294901760, %v6616_v52  ;;  %v47_v48 = vld [vmem:[%s10087_s0 + $0x10] sm:$0xff] }
  0x22   :  { %5820 = vmatpush3.xpose.msra.mxu0 %v6517_v49  ;;  %5856 = vmatpush3.xpose.msra.mxu1 %v367_v41  ;;  %v148_v41 = vsel %vm77_vm0, %v64_v39, 0  ;;  %10261 = vst [vmem:[#allocation18_spill] sm:$0xff] %v6628_v61  ;;  %10262 = vst [vmem:[#allocation19_spill] sm:$0xff] %v6630_v53  ;;  %v381_v39 = vand.u32 4294901760, %v380_v19  ;;  %v500_v28 = vand.u32 4294901760, %v499_v44  ;;  %v100_v34 = vsel %vm77_vm0, %v48_v32, 0 }
  0x23   :  { %5821 = vmatprep.subr.mxu0 %v6527_v55  ;;  %5857 = vmatprep.subr.mxu1 %v486_v14  ;;  %v63_v14 = vld [vmem:[%s10087_s0 + $0x90] sm:$0xff]  ;;  %10263 = vst [vmem:[#allocation20_spill] sm:$0xff] %v6636_v46  ;;  %v6647_v6 = vand.u32 4294901760, %v148_v41  ;;  %v62_v44 = vld [vmem:[%s10087_s0 + $0x88] sm:$0xff]  ;;  %v6663_v32 = vsub.f32 %v103_v18, %v6630_v53  ;;  %v507_v2 = vand.u32 4294901760, %v506_v25  ;;  %v6672_v55 = vand.u32 4294901760, %v100_v34 }
  0x24   :  { %v46_v18 = vld [vmem:[%s10087_s0 + $0x8] sm:$0xff]  ;;  %v61_v49 = vld [vmem:[%s10087_s0 + $0x80] sm:$0xff] }
  0x25   :  { %10264 = vst [vmem:[#allocation21_spill] sm:$0xff] %v6647_v6  ;;  %10266 = vst [vmem:[#allocation22_spill] sm:$0xff] %v6663_v32 }
  0x26   :  { %5822 = vmatpush3.xpose.msra.mxu0 %v6551_v36  ;;  %5858 = vmatpush3.xpose.msra.mxu1 %v374_v63  ;;  %v10265_v63 = vand.u32 4294901760, %v6601_v31  ;;  %v145_v36 = vsel %vm77_vm0, %v63_v14, 0  ;;  %v388_v14 = vand.u32 4294901760, %v387_v7  ;;  %10267 = vst [vmem:[#allocation23_spill] sm:$0xff] %v6672_v55  ;;  %v142_v7 = vsel %vm77_vm0, %v62_v44, 0 }
  0x27   :  { %5823 = vmatprep.subr.mxu0 %v6553_v12  ;;  %5859 = vmatprep.subr.mxu1 %v493_v60  ;;  %v513_v12 = vsub.f32 %v6616_v52, %v10124_v29  ;;  %v6678_v60 = vand.u32 4294901760, %v145_v36  ;;  %v10270_v29 = vand.u32 4294901760, %v6628_v61  ;;  %v139_v44 = vsel %vm77_vm0, %v61_v49, 0 }
  0x28   :  { %v394_v19 = vsub.f32 %v6601_v31, %v10265_v63  ;;  %v33_v63 = vld [vmem:[%s10088_s1] sm:$0xff] }
  0x29   :  { %10268 = vst [vmem:[#allocation24_spill] sm:$0xff] %v6678_v60  ;;  %v401_v52 = vsub.f32 %v6628_v61, %v10270_v29  ;;  %v514_v29 = vand.u32 4294901760, %v513_v12  ;;  %v6702_v61 = vand.u32 4294901760, %v142_v7  ;;  %v6714_v12 = vsub.f32 %v145_v36, %v6678_v60 }
  0x2a   :  { %5824 = vmatpush3.xpose.msra.mxu0 %v6573_v50  ;;  %5860 = vmatpush3.xpose.msra.mxu1 %v381_v39  ;;  %v97_v50 = vsel %vm77_vm0, %v47_v48, 0  ;;  %v6683_v39 = vsub.f32 %v148_v41, %v6647_v6  ;;  %v395_v25 = vand.u32 4294901760, %v394_v19  ;;  %v94_v41 = vsel %vm77_vm0, %v46_v18, 0 }
  0x2b   :  { %5825 = vmatprep.subr.mxu0 %v6581_v42  ;;  %5861 = vmatprep.subr.mxu1 %v500_v28  ;;  %v79_v28 = vsel %vm77_vm0, %v33_v63, 0  ;;  %v10271_v42 = vand.u32 4294901760, %v6636_v46  ;;  %v6700_v19 = vand.u32 4294901760, %v97_v50  ;;  %10273 = vst [vmem:[#allocation27_spill] sm:$0xff] %v6702_v61  ;;  %v6705_v63 = vsub.f32 %v100_v34, %v6672_v55  ;;  %10275 = vst [vmem:[#allocation29_spill] sm:$0xff] %v6714_v12 }
  0x2c   :  { %10269 = vst [vmem:[#allocation25_spill] sm:$0xff] %v6683_v39  ;;  %v6697_v31 = vand.u32 4294901760, %v79_v28  ;;  %v10276_v18 = vand.u32 4294901760, %v6663_v32 }
  0x2d   :  { %v520_v48 = vsub.f32 %v6636_v46, %v10271_v42  ;;  %10272 = vst [vmem:[#allocation26_spill] sm:$0xff] %v6700_v19  ;;  %10274 = vst [vmem:[#allocation28_spill] sm:$0xff] %v6705_v63  ;;  %v34_v42 = vld [vmem:[%s10088_s1 + $0x8] sm:$0xff]  ;;  %v6722_v46 = vand.u32 4294901760, %v94_v41 }
  0x2e   :  { %5826 = vmatpush3.xpose.msra.mxu0 %v6598_v4  ;;  %5862 = vmatpush3.xpose.msra.mxu1 %v388_v14  ;;  %v45_v14 = vld [vmem:[%s10087_s0] sm:$0xff]  ;;  %v6720_v34 = vsub.f32 %v79_v28, %v6697_v31  ;;  %v402_v4 = vand.u32 4294901760, %v401_v52  ;;  %v408_v49 = vsub.f32 %v6663_v32, %v10276_v18  ;;  %v6734_v52 = vand.u32 4294901760, %v139_v44  ;;  %v35_v18 = vld [vmem:[%s10088_s1 + $0x10] sm:$0xff] }
  0x2f   :  { %5827 = vmatprep.subr.mxu0 %v6606_v47  ;;  %5863 = vmatprep.subr.mxu1 %v507_v2  ;;  %v521_v2 = vand.u32 4294901760, %v520_v48  ;;  %v82_v47 = vsel %vm77_vm0, %v34_v42, 0  ;;  %v91_v37 = vsel %vm77_vm0, %v45_v14, 0  ;;  %v6738_v48 = vsub.f32 %v97_v50, %v6700_v19 }
  0x30   :  { %5877 = vmatprep.mubr.f32.mxu1 %v6697_v31  ;;  %v6729_v36 = vand.u32 4294901760, %v6720_v34  ;;  %10277 = vst [vmem:[#allocation30_spill] sm:$0xff] %v6734_v52  ;;  %v10278_v42 = vand.u32 4294901760, %v6683_v39  ;;  %v6751_v14 = vsub.f32 %v142_v7, %v6702_v61  ;;  %v6753_v50 = vand.u32 4294901760, %v82_v47 }
  0x31   :  { %v409_v32 = vand.u32 4294901760, %v408_v49  ;;  %v85_v17 = vsel %vm77_vm0, %v35_v18, 0  ;;  %v6760_v28 = vand.u32 4294901760, %v91_v37  ;;  %v6764_v7 = vsub.f32 %v94_v41, %v6722_v46 }
  0x32   :  { %5828 = vmatpush3.xpose.msra.mxu0 %v6630_v53  ;;  %5864 = vmatpush3.xpose.msra.mxu1 %v395_v25  ;;  %v527_v25 = vsub.f32 %v6683_v39, %v10278_v42  ;;  %v286_v53 = vsub.f32 %v6720_v34, %v6729_v36  ;;  %10279 = vst [vmem:[#allocation31_spill] sm:$0xff] %v6753_v50 }
  0x33   :  { %5829 = vmatprep.subr.mxu0 %v6647_v6  ;;  %5865 = vmatprep.subr.mxu1 %v514_v29  ;;  %v10280_v29 = vand.u32 4294901760, %v6705_v63  ;;  %10281 = vst [vmem:[#allocation32_spill] sm:$0xff] %v6764_v7  ;;  %v6778_v41 = vsub.f32 %v82_v47, %v6753_v50  ;;  %v6780_v6 = vand.u32 4294901760, %v85_v17 }
  0x34   :  { %v287_v13 = vand.u32 4294901760, %v286_v53  ;;  %v36_v53 = vld [vmem:[%s10088_s1 + $0x18] sm:$0xff]  ;;  %v528_v49 = vand.u32 4294901760, %v527_v25  ;;  %v10285_v25 = vand.u32 4294901760, %v6738_v48 }
  0x35   :  { %v415_v42 = vsub.f32 %v6705_v63, %v10280_v29  ;;  %10284 = vst [vmem:[#allocation34_spill] sm:$0xff] %v6780_v6  ;;  %v88_v63 = vsel %vm77_vm0, %v36_v53, 0 }
  0x36   :  { %5830 = vmatpush3.xpose.msra.mxu0 %v6672_v55  ;;  %5866 = vmatpush3.xpose.msra.mxu1 %v402_v4  ;;  %v10282_v4 = vand.u32 4294901760, %v6714_v12  ;;  %v6775_v55 = vsub.f32 %v139_v44, %v6734_v52  ;;  %v6789_v44 = vsub.f32 %v91_v37, %v6760_v28  ;;  %v6802_v29 = vand.u32 4294901760, %v88_v63 }
  0x37   :  { %5831 = vmatprep.subr.mxu0 %v6678_v60  ;;  %5867 = vmatprep.subr.mxu1 %v521_v2  ;;  %v416_v2 = vand.u32 4294901760, %v415_v42  ;;  %v10287_v60 = vand.u32 4294901760, %v6751_v14  ;;  %v6797_v42 = vand.u32 4294901760, %v6778_v41 }
  0x38   :  { %v534_v18 = vsub.f32 %v6714_v12, %v10282_v4  ;;  %10283 = vst [vmem:[#allocation33_spill] sm:$0xff] %v6775_v55  ;;  %5837 = vmatprep.mubr.f32.mxu0 %v287_v13  ;;  %v422_v4 = vsub.f32 %v6738_v48, %v10285_v25  ;;  %10286 = vst [vmem:[#allocation35_spill] sm:$0xff] %v6789_v44  ;;  %v6800_v25 = vsub.f32 %v85_v17, %v6780_v6 }
  0x39   :  { %v541_v53 = vsub.f32 %v6751_v14, %v10287_v60  ;;  %10288 = vst [vmem:[#allocation36_spill] sm:$0xff] %v6797_v42  ;;  %10289 = vst [vmem:[#allocation37_spill] sm:$0xff] %v6802_v29  ;;  %v10167_v60 = vand.u32 4294901760, %v6789_v44 }
  0x3a   :  { %5832 = vmatpush3.xpose.msra.mxu0 %v6700_v19  ;;  %5868 = vmatpush3.xpose.msra.mxu1 %v409_v32  ;;  %v535_v47 = vand.u32 4294901760, %v534_v18  ;;  %v423_v37 = vand.u32 4294901760, %v422_v4  ;;  %v297_v19 = vsub.f32 %v6778_v41, %v6797_v42  ;;  %v6819_v4 = vsub.f32 %v88_v63, %v6802_v29 }
  0x3b   :  { %5833 = vmatprep.subr.mxu0 %v6702_v61  ;;  %5869 = vmatprep.subr.mxu1 %v528_v49  ;;  %v10290_v49 = vand.u32 4294901760, %v6764_v7  ;;  %v542_v32 = vand.u32 4294901760, %v541_v53  ;;  %v10291_v61 = vand.u32 4294901760, %v6775_v55 }
  0x3c   :  { %v298_v53 = vand.u32 4294901760, %v297_v19  ;;  %v10292_v19 = vld [vmem:[#allocation5_spill] sm:$0xff] }
  0x3d   :  { %v429_v18 = vsub.f32 %v6764_v7, %v10290_v49  ;;  %v548_v17 = vsub.f32 %v6775_v55, %v10291_v61 }
  0x3e   :  { %5834 = vmatpush3.xpose.msra.mxu0 %v6722_v46  ;;  %5870 = vmatpush3.xpose.msra.mxu1 %v416_v2  ;;  %v6816_v2 = vand.u32 4294901760, %v6800_v25 }
  0x3f   :  { %5835 = vmatprep.subr.mxu0 %v6734_v52  ;;  %5871 = vmatprep.subr.mxu1 %v535_v47  ;;  %v430_v49 = vand.u32 4294901760, %v429_v18  ;;  %v436_v47 = vsub.f32 %v6789_v44, %v10167_v60  ;;  %v549_v61 = vand.u32 4294901760, %v548_v17  ;;  %v6829_v52 = vand.u32 4294901760, %v6819_v4  ;;  %v10294_v18 = vld [vmem:[#allocation6_spill] sm:$0xff]  ;;  %v10295_v17 = vld [vmem:[#allocation15_spill] sm:$0xff] }
  0x40   :  { %v308_v42 = vsub.f32 %v6800_v25, %v6816_v2  ;;  %v10304_v60 = vld [vmem:[#allocation11_spill] sm:$0xff] }
  0x41   :  { %v437_v63 = vand.u32 4294901760, %v436_v47  ;;  %v10297_v47 = vld [vmem:[#allocation17_spill] sm:$0xff] }
  0x42   :  { %5836 = vmatpush3.xpose.msra.mxu0 %v6760_v28  ;;  %5872 = vmatpush3.xpose.msra.mxu1 %v423_v37  ;;  %v319_v37 = vsub.f32 %v6819_v4, %v6829_v52 }
  0x43   :  { %5873 = vmatprep.subr.mxu1 %v542_v32  ;;  %5885 = vmatprep.subr.mxu0 %v6373_v21  ;;  %v309_v32 = vand.u32 4294901760, %v308_v42  ;;  %v10293_v42 = vld [vmem:[#allocation13_spill] sm:$0xff] }
  0x45   :  { %5838 = vmatmul.mubr.f32.vlgmr.msra.gmra.mxu0 %v287_v13  ;;  %v320_v13 = vand.u32 4294901760, %v319_v37  ;;  %v10302_v37 = vld [vmem:[#allocation10_spill] sm:$0xff] }
  0x46   :  { %5874 = vmatpush3.xpose.msra.mxu1 %v430_v49  ;;  %5886 = vmatpush3.xpose.msra.mxu0 %v6378_v23  ;;  %v10296_v49 = vld [vmem:[#allocation7_spill] sm:$0xff] }
  0x47   :  { %5875 = vmatprep.subr.mxu1 %v549_v61  ;;  %5887 = vmatprep.subr.mxu0 %v6382_v24  ;;  %v10298_v61 = vld [vmem:[#allocation8_spill] sm:$0xff] }
  0x48   :  { %5839 = vmatprep.mubr.f32.mxu0 %v298_v53 }
  0x49   :  { %5840 = vmatmul.mubr.f32.gmra.mxu0 %v298_v53  ;;  %v10299_v53 = vld [vmem:[#allocation18_spill] sm:$0xff] }
  0x4a   :  { %5876 = vmatpush3.xpose.msra.mxu1 %v437_v63  ;;  %5888 = vmatpush3.xpose.msra.mxu0 %v6386_v26  ;;  %v10300_v63 = vld [vmem:[#allocation9_spill] sm:$0xff] }
  0x4b   :  { %5889 = vmatprep.subr.mxu0 %v6402_v35  ;;  %5925 = vmatprep.subr.mxu1 %v6348_v9 }
  0x4c   :  { %5841 = vmatprep.mubr.f32.mxu0 %v309_v32 }
  0x4d   :  { %5878 = vmatmul.mubr.f32.vlgmr.msra.gmra.mxu1 %v6697_v31  ;;  %5842 = vmatmul.mubr.f32.gmra.mxu0 %v309_v32  ;;  %v10301_v32 = vld [vmem:[#allocation20_spill] sm:$0xff] }
  0x4e   :  { %5890 = vmatpush3.xpose.msra.mxu0 %v6415_v40  ;;  %5926 = vmatpush3.xpose.msra.mxu1 %v6350_v10 }
  0x4f   :  { %5891 = vmatprep.subr.mxu0 %v6445_v56  ;;  %5927 = vmatprep.subr.mxu1 %v6352_v11 }
  0x50   :  { %5879 = vmatprep.mubr.f32.mxu1 %v6753_v50  ;;  %5843 = vmatprep.mubr.f32.mxu0 %v320_v13 }
  0x51   :  { %5880 = vmatmul.mubr.f32.gmra.mxu1 %v6753_v50  ;;  %5844 = vmatmul.mubr.f32.gmra.mxu0 %v320_v13  ;;  %v10303_v13 = vld [vmem:[#allocation22_spill] sm:$0xff] }
  0x52   :  { %5892 = vmatpush3.xpose.msra.mxu0 %v6449_v58  ;;  %5928 = vmatpush3.xpose.msra.mxu1 %v6361_v15  ;;  %v10307_v50 = vld [vmem:[#allocation14_spill] sm:$0xff] }
  0x53   :  { %5893 = vmatprep.subr.mxu0 %v6462_v0  ;;  %5929 = vmatprep.subr.mxu1 %v6370_v20 }
  0x54   :  { %5881 = vmatprep.mubr.f32.mxu1 %v6780_v6  ;;  %5917 = vmatprep.mubr.f32.mxu0 %v6720_v34 }
  0x55   :  { %5882 = vmatmul.mubr.f32.gmra.mxu1 %v6780_v6  ;;  %v10306_v6 = vld [vmem:[#allocation28_spill] sm:$0xff] }
  0x56   :  { %5894 = vmatpush3.xpose.msra.mxu0 %v6475_v8  ;;  %5930 = vmatpush3.xpose.msra.mxu1 %v6375_v22 }
  0x57   :  { %5895 = vmatprep.subr.mxu0 %v6497_v27  ;;  %5931 = vmatprep.subr.mxu1 %v6394_v30 }
  0x58   :  { %5883 = vmatprep.mubr.f32.mxu1 %v6802_v29 }
  0x59   :  { %5884 = vmatmul.mubr.f32.gmra.mxu1 %v6802_v29  ;;  %v10305_v29 = vld [vmem:[#allocation12_spill] sm:$0xff] }
  0x5a   :  { %5896 = vmatpush3.xpose.msra.mxu0 %v6504_v38  ;;  %5932 = vmatpush3.xpose.msra.mxu1 %v6398_v33 }
  0x5b   :  { %5897 = vmatprep.subr.mxu0 %v6521_v51  ;;  %5933 = vmatprep.subr.mxu1 %v6424_v43 }
  0x5c   :  { %5957 = vmatprep.mubr.f32.mxu1 %v6729_v36 }
  0x5e   :  { %5898 = vmatpush3.xpose.msra.mxu0 %v6530_v57  ;;  %5934 = vmatpush3.xpose.msra.mxu1 %v6439_v54 }
  0x5f   :  { %5899 = vmatprep.subr.mxu0 %v6540_v1  ;;  %5935 = vmatprep.subr.mxu1 %v6458_v62 }
  0x62   :  { %5900 = vmatpush3.xpose.msra.mxu0 %v6556_v45  ;;  %5936 = vmatpush3.xpose.msra.mxu1 %v6466_v3 }
  0x63   :  { %5901 = vmatprep.subr.mxu0 %v6568_v59  ;;  %5937 = vmatprep.subr.mxu1 %v6484_v16 }
  0x66   :  { %5902 = vmatpush3.xpose.msra.mxu0 %v6584_v5  ;;  %5938 = vmatpush3.xpose.msra.mxu1 %v10292_v19 }
  0x67   :  { %5903 = vmatprep.subr.mxu0 %v10293_v42  ;;  %5939 = vmatprep.subr.mxu1 %v10294_v18 }
  0x6a   :  { %5904 = vmatpush3.xpose.msra.mxu0 %v10295_v17  ;;  %5940 = vmatpush3.xpose.msra.mxu1 %v10296_v49 }
  0x6b   :  { %5905 = vmatprep.subr.mxu0 %v10297_v47  ;;  %5941 = vmatprep.subr.mxu1 %v10298_v61 }
  0x6e   :  { %5906 = vmatpush3.xpose.msra.mxu0 %v10299_v53  ;;  %5942 = vmatpush3.xpose.msra.mxu1 %v10300_v63  ;;  %v10308_v53 = vld [vmem:[#allocation16_spill] sm:$0xff] }
  0x6f   :  { %5907 = vmatprep.subr.mxu0 %v10301_v32  ;;  %5943 = vmatprep.subr.mxu1 %v10302_v37  ;;  %v10309_v32 = vld [vmem:[#allocation19_spill] sm:$0xff] }
  0x72   :  { %5908 = vmatpush3.xpose.msra.mxu0 %v10303_v13  ;;  %5944 = vmatpush3.xpose.msra.mxu1 %v10304_v60  ;;  %v10310_v13 = vld [vmem:[#allocation21_spill] sm:$0xff] }
  0x73   :  { %5909 = vmatprep.subr.mxu0 %v6683_v39  ;;  %5945 = vmatprep.subr.mxu1 %v10305_v29  ;;  %v10311_v39 = vld [vmem:[#allocation23_spill] sm:$0xff] }
  0x76   :  { %5910 = vmatpush3.xpose.msra.mxu0 %v10306_v6  ;;  %5946 = vmatpush3.xpose.msra.mxu1 %v10307_v50  ;;  %v10312_v6 = vld [vmem:[#allocation24_spill] sm:$0xff] }
  0x77   :  { %5911 = vmatprep.subr.mxu0 %v6714_v12  ;;  %5947 = vmatprep.subr.mxu1 %v10308_v53  ;;  %v10313_v12 = vld [vmem:[#allocation26_spill] sm:$0xff]  ;;  %v10314_v53 = vld [vmem:[#allocation27_spill] sm:$0xff] }
  0x7a   :  { %5912 = vmatpush3.xpose.msra.mxu0 %v6738_v48  ;;  %5948 = vmatpush3.xpose.msra.mxu1 %v10309_v32  ;;  %v10315_v32 = vand.u32 4294901760, %v6373_v21  ;;  %v10319_v21 = vand.u32 4294901760, %v6386_v26  ;;  %v10323_v26 = vand.u32 4294901760, %v6445_v56  ;;  %v10336_v56 = vand.u32 4294901760, %v10295_v17 }
  0x7b   :  { %5913 = vmatprep.subr.mxu0 %v6751_v14  ;;  %5949 = vmatprep.subr.mxu1 %v10310_v13 }
  0x7e   :  { %5914 = vmatpush3.xpose.msra.mxu0 %v6764_v7  ;;  %5950 = vmatpush3.xpose.msra.mxu1 %v10311_v39  ;;  %v10316_v7 = vand.u32 4294901760, %v6378_v23  ;;  %v10321_v23 = vand.u32 4294901760, %v6415_v40  ;;  %v10332_v40 = vand.u32 4294901760, %v6556_v45  ;;  %v10348_v45 = vld [vmem:[#allocation29_spill] sm:$0xff] }
  0x7f   :  { %5915 = vmatprep.subr.mxu0 %v6775_v55  ;;  %5951 = vmatprep.subr.mxu1 %v10312_v6  ;;  %v10317_v55 = vld [vmem:[#allocation30_spill] sm:$0xff] }
  0x82   :  { %5916 = vmatpush3.xpose.msra.mxu0 %v6789_v44  ;;  %5952 = vmatpush3.xpose.msra.mxu1 %v10313_v12  ;;  %v10318_v44 = vand.u32 4294901760, %v6382_v24  ;;  %v10322_v24 = vld [vmem:[#allocation36_spill] sm:$0xff] }
  0x83   :  { %5953 = vmatprep.subr.mxu1 %v10314_v53  ;;  %5965 = vmatprep.subr.mxu0 %v10315_v32 }
  0x85   :  { %5918 = vmatmul.mubr.f32.vlgmr.msra.gmra.mxu0 %v6720_v34  ;;  %v10320_v34 = vand.u32 4294901760, %v6402_v35  ;;  %v10329_v35 = vand.u32 4294901760, %v6521_v51 }
  0x86   :  { %5954 = vmatpush3.xpose.msra.mxu1 %v6722_v46  ;;  %5966 = vmatpush3.xpose.msra.mxu0 %v10316_v7  ;;  %v10353_v7 = vand.u32 4294901760, %v6751_v14  ;;  %v10360_v14 = vld [vmem:[#allocation31_spill] sm:$0xff] }
  0x87   :  { %5919 = vmatprep.mubr.f32.mxu0 %v6778_v41  ;;  %5955 = vmatprep.subr.mxu1 %v10317_v55 }
  0x88   :  { %5967 = vmatprep.subr.mxu0 %v10318_v44 }
  0x89   :  { %5920 = vmatmul.mubr.f32.gmra.mxu0 %v6778_v41 }
  0x8a   :  { %5956 = vmatpush3.xpose.msra.mxu1 %v6760_v28  ;;  %5968 = vmatpush3.xpose.msra.mxu0 %v10319_v21 }
  0x8b   :  { %5921 = vmatprep.mubr.f32.mxu0 %v6800_v25  ;;  %5969 = vmatprep.subr.mxu0 %v10320_v34 }
  0x8c   :  { %6005 = vmatprep.subr.mxu1 %v6348_v9  ;;  %v10324_v9 = vand.u32 4294901760, %v6449_v58  ;;  %v10337_v58 = vand.u32 4294901760, %v10297_v47 }
  0x8d   :  { %5922 = vmatmul.mubr.f32.gmra.mxu0 %v6800_v25  ;;  %5958 = vmatmul.mubr.f32.vlgmr.msra.gmra.mxu1 %v6729_v36  ;;  %v10351_v36 = vand.u32 4294901760, %v6738_v48  ;;  %v10358_v25 = vld [vmem:[#allocation35_spill] sm:$0xff] }
  0x8e   :  { %5970 = vmatpush3.xpose.msra.mxu0 %v10321_v23  ;;  %6006 = vmatpush3.xpose.msra.mxu1 %v6350_v10  ;;  %v10325_v10 = vand.u32 4294901760, %v6462_v0  ;;  %v10359_v48 = vand.u32 4294901760, %v10358_v25 }
  0x8f   :  { %5923 = vmatprep.mubr.f32.mxu0 %v6819_v4  ;;  %5959 = vmatprep.mubr.f32.mxu1 %v10322_v24 }
  0x90   :  { %5971 = vmatprep.subr.mxu0 %v10323_v26  ;;  %6007 = vmatprep.subr.mxu1 %v6352_v11  ;;  %v10326_v11 = vand.u32 4294901760, %v6475_v8 }
  0x91   :  { %5924 = vmatmul.mubr.f32.gmra.mxu0 %v6819_v4  ;;  %5960 = vmatmul.mubr.f32.gmra.mxu1 %v10322_v24 }
  0x92   :  { %5972 = vmatpush3.xpose.msra.mxu0 %v10324_v9  ;;  %6008 = vmatpush3.xpose.msra.mxu1 %v6361_v15  ;;  %v10327_v15 = vand.u32 4294901760, %v6497_v27 }
  0x93   :  { %5961 = vmatprep.mubr.f32.mxu1 %v6816_v2  ;;  %5973 = vmatprep.subr.mxu0 %v10325_v10  ;;  %v37_v10 = vld [vmem:[%s10089_s2] sm:$0xff] }
  0x94   :  { %6009 = vmatprep.subr.mxu1 %v6370_v20  ;;  %5997 = vmatprep.mubr.f32.mxu0 %v6697_v31  ;;  %v10328_v20 = vand.u32 4294901760, %v6504_v38  ;;  %v10344_v38 = vld [vmem:[#allocation25_spill] sm:$0xff] }
  0x95   :  { %5962 = vmatmul.mubr.f32.gmra.mxu1 %v6816_v2  ;;  %v10345_v51 = vand.u32 4294901760, %v10344_v38 }
  0x96   :  { %5974 = vmatpush3.xpose.msra.mxu0 %v10326_v11  ;;  %6010 = vmatpush3.xpose.msra.mxu1 %v6375_v22  ;;  %v10330_v22 = vand.u32 4294901760, %v6530_v57  ;;  %v10346_v57 = vld [vmem:[#allocation28_spill] sm:$0xff] }
  0x97   :  { %5963 = vmatprep.mubr.f32.mxu1 %v6829_v52  ;;  %5975 = vmatprep.subr.mxu0 %v10327_v15 }
  0x98   :  { %6011 = vmatprep.subr.mxu1 %v6394_v30  ;;  %v10331_v30 = vand.u32 4294901760, %v6540_v1  ;;  %v10347_v1 = vand.u32 4294901760, %v10346_v57 }
  0x99   :  { %5964 = vmatmul.mubr.f32.gmra.mxu1 %v6829_v52  ;;  %v10352_v52 = vld [vmem:[#allocation19_spill] sm:$0xff] }
  0x9a   :  { %5976 = vmatpush3.xpose.msra.mxu0 %v10328_v20  ;;  %6012 = vmatpush3.xpose.msra.mxu1 %v6398_v33  ;;  %v10333_v33 = vand.u32 4294901760, %v6568_v59  ;;  %v10349_v59 = vand.u32 4294901760, %v10348_v45  ;;  %v38_v20 = vld [vmem:[%s10089_s2 + $0x8] sm:$0xff] }
  0x9b   :  { %5977 = vmatprep.subr.mxu0 %v10329_v35  ;;  %6013 = vmatprep.subr.mxu1 %v6424_v43  ;;  %v10334_v43 = vand.u32 4294901760, %v6584_v5  ;;  %v10350_v5 = vld [vmem:[#allocation16_spill] sm:$0xff] }
  0x9c   :  { %6037 = vmatprep.mubr.f32.mxu1 %v6697_v31 }
  0x9e   :  { %5978 = vmatpush3.xpose.msra.mxu0 %v10330_v22  ;;  %6014 = vmatpush3.xpose.msra.mxu1 %v6439_v54  ;;  %v10335_v54 = vand.u32 4294901760, %v10293_v42 }
  0x9f   :  { %5979 = vmatprep.subr.mxu0 %v10331_v30  ;;  %6015 = vmatprep.subr.mxu1 %v6458_v62  ;;  %v10338_v62 = vld [vmem:[#allocation18_spill] sm:$0xff] }
  0xa0   :  { %v10339_v0 = vand.u32 4294901760, %v10338_v62 }
  0xa2   :  { %5980 = vmatpush3.xpose.msra.mxu0 %v10332_v40  ;;  %6016 = vmatpush3.xpose.msra.mxu1 %v6466_v3  ;;  %v10340_v3 = vld [vmem:[#allocation20_spill] sm:$0xff] }
  0xa3   :  { %5981 = vmatprep.subr.mxu0 %v10333_v33  ;;  %6017 = vmatprep.subr.mxu1 %v6484_v16  ;;  %v10341_v8 = vand.u32 4294901760, %v10340_v3  ;;  %v10342_v16 = vld [vmem:[#allocation22_spill] sm:$0xff] }
  0xa4   :  { %v10343_v27 = vand.u32 4294901760, %v10342_v16 }
  0xa6   :  { %5982 = vmatpush3.xpose.msra.mxu0 %v10334_v43  ;;  %6018 = vmatpush3.xpose.msra.mxu1 %v10292_v19 }
  0xa7   :  { %5983 = vmatprep.subr.mxu0 %v10335_v54  ;;  %6019 = vmatprep.subr.mxu1 %v10294_v18 }
  0xaa   :  { %5984 = vmatpush3.xpose.msra.mxu0 %v10336_v56  ;;  %6020 = vmatpush3.xpose.msra.mxu1 %v10296_v49 }
  0xab   :  { %5985 = vmatprep.subr.mxu0 %v10337_v58  ;;  %6021 = vmatprep.subr.mxu1 %v10298_v61 }
  0xae   :  { %5986 = vmatpush3.xpose.msra.mxu0 %v10339_v0  ;;  %6022 = vmatpush3.xpose.msra.mxu1 %v10300_v63 }
  0xaf   :  { %5987 = vmatprep.subr.mxu0 %v10341_v8  ;;  %6023 = vmatprep.subr.mxu1 %v10302_v37 }
  0xb2   :  { %5988 = vmatpush3.xpose.msra.mxu0 %v10343_v27  ;;  %6024 = vmatpush3.xpose.msra.mxu1 %v10304_v60 }
  0xb3   :  { %5989 = vmatprep.subr.mxu0 %v10345_v51  ;;  %6025 = vmatprep.subr.mxu1 %v10305_v29  ;;  %v10354_v29 = vld [vmem:[#allocation32_spill] sm:$0xff]  ;;  %v39_v51 = vld [vmem:[%s10089_s2 + $0x10] sm:$0xff] }
  0xb4   :  { %v10355_v41 = vand.u32 4294901760, %v10354_v29 }
  0xb6   :  { %5990 = vmatpush3.xpose.msra.mxu0 %v10347_v1  ;;  %6026 = vmatpush3.xpose.msra.mxu1 %v10307_v50  ;;  %v10356_v50 = vld [vmem:[#allocation33_spill] sm:$0xff] }
  0xb7   :  { %5991 = vmatprep.subr.mxu0 %v10349_v59  ;;  %6027 = vmatprep.subr.mxu1 %v10350_v5  ;;  %v10357_v44 = vand.u32 4294901760, %v10356_v50 }
  0xba   :  { %5992 = vmatpush3.xpose.msra.mxu0 %v10351_v36  ;;  %6028 = vmatpush3.xpose.msra.mxu1 %v10352_v52 }
  0xbb   :  { %5993 = vmatprep.subr.mxu0 %v10353_v7  ;;  %6029 = vmatprep.subr.mxu1 %v10310_v13 }
  0xbe   :  { %5994 = vmatpush3.xpose.msra.mxu0 %v10355_v41  ;;  %6030 = vmatpush3.xpose.msra.mxu1 %v10311_v39  ;;  %v10362_v39 = vld [vmem:[#allocation37_spill] sm:$0xff] }
  0xbf   :  { %5995 = vmatprep.subr.mxu0 %v10357_v44  ;;  %6031 = vmatprep.subr.mxu1 %v10312_v6  ;;  %v10361_v6 = vld [vmem:[#allocation34_spill] sm:$0xff] }
  0xc2   :  { %5996 = vmatpush3.xpose.msra.mxu0 %v10359_v48  ;;  %6032 = vmatpush3.xpose.msra.mxu1 %v10313_v12 }
  0xc3   :  { %6033 = vmatprep.subr.mxu1 %v10314_v53 }
  0xc5   :  { %5998 = vmatmul.mubr.f32.vlgmr.msra.gmra.mxu0 %v6697_v31 }
  0xc6   :  { %6034 = vmatpush3.xpose.msra.mxu1 %v6722_v46  ;;  %5999 = vmatprep.mubr.f32.mxu0 %v10360_v14 }
  0xc7   :  { %6035 = vmatprep.subr.mxu1 %v10317_v55 }
  0xc9   :  { %6000 = vmatmul.mubr.f32.gmra.mxu0 %v10360_v14 }
  0xca   :  { %6036 = vmatpush3.xpose.msra.mxu1 %v6760_v28  ;;  %6001 = vmatprep.mubr.f32.mxu0 %v10361_v6 }
  0xcd   :  { %6002 = vmatmul.mubr.f32.gmra.mxu0 %v10361_v6  ;;  %6038 = vmatmul.mubr.f32.vlgmr.msra.gmra.mxu1 %v6697_v31 }
  0xce   :  { %6003 = vmatprep.mubr.f32.mxu0 %v10362_v39  ;;  %6039 = vmatprep.mubr.f32.mxu1 %v10360_v14 }
  0xd1   :  { %6004 = vmatmul.mubr.f32.gmra.mxu0 %v10362_v39  ;;  %6040 = vmatmul.mubr.f32.gmra.mxu1 %v10360_v14 }
  0xd2   :  { %6041 = vmatprep.mubr.f32.mxu1 %v10361_v6 }
  0xd5   :  { %6042 = vmatmul.mubr.f32.gmra.mxu1 %v10361_v6 }
  0xd6   :  { %6043 = vmatprep.mubr.f32.mxu1 %v10362_v39 }
  0xd9   :  { %6044 = vmatmul.mubr.f32.gmra.mxu1 %v10362_v39 }
 0x105   :  { %v289_v55 = vpop.f32.mrf.mxu0 }
 0x106   :  { %v290_v15 = vadd.f32 %v289_v55, %v37_v10 }
 0x107   :  { %v291_v46 = vpop.f32.mrf.mxu0 }
 0x108   :  { %v292_v30 = vadd.f32 %v291_v46, %v38_v20 }
 0x109   :  { %v300_v31 = vpop.f32.mrf.mxu0 }
 0x10a   :  { %v301_v5 = vadd.f32 %v300_v31, %v39_v51 }
 0x10b   :  { %v7031_v60 = vpop.f32.mrf.mxu0 }
 0x10d   :  { %v554_v12 = vpop.f32.mrf.mxu1  ;;  %v7033_v4 = vpop.f32.mrf.mxu0 }
 0x10e   :  { %v555_v40 = vadd.f32 %v554_v12, %v290_v15  ;;  %v10196_v15 = vmov 2475754826  }
 0x10f   :  { %v556_v28 = vpop.f32.mrf.mxu1  ;;  %v7037_v42 = vpop.f32.mrf.mxu0 }
 0x110   :  { %v557_v58 = vadd.f32 %v556_v28, %v292_v30  ;;  %v10192_v30 = vmov 920167782  }
 0x111   :  { %v561_v2 = vpop.f32.mrf.mxu1  ;;  %v7041_v17 = vpop.f32.mrf.mxu0 }
 0x112   :  { %v562_v41 = vadd.f32 %v561_v2, %v301_v5  ;;  %v10186_v2 = vmov 2131351028  }
 0x113   :  { %v7035_v19 = vpop.f32.mrf.mxu1  ;;  %v7045_v47 = vpop.f32.mrf.mxu0 }
 0x115   :  { %v7039_v18 = vpop.f32.mrf.mxu1 }
 0x117   :  { %v7043_v49 = vpop.f32.mrf.mxu1 }
 0x119   :  { %v7047_v61 = vpop.f32.mrf.mxu1 }
 0x11b   :  { %v7049_v63 = vpop.f32.mrf.mxu1 }
 0x145   :  { %v712_v53 = vpop.f32.mrf.mxu0 }
 0x146   :  { %v713_v54 = vadd.f32 %v712_v53, %v555_v40 }
 0x147   :  { %v714_v32 = vpop.f32.mrf.mxu0 }
 0x148   :  { %v715_v0 = vadd.f32 %v714_v32, %v557_v58 }
 0x149   :  { %v720_v13 = vpop.f32.mrf.mxu0 }
 0x14a   :  { %v721_v25 = vadd.f32 %v720_v13, %v562_v41 }
 0x14b   :  { %v7051_v34 = vpop.f32.mrf.mxu0 }
 0x14d   :  { %v842_v37 = vpop.f32.mrf.mxu1  ;;  %v7053_v24 = vpop.f32.mrf.mxu0 }
 0x14e   :  { %v843_v62 = vadd.f32 %v842_v37, %v713_v54 }
 0x14f   :  { %v844_v21 = vpop.f32.mrf.mxu1  ;;  %v7057_v9 = vpop.f32.mrf.mxu0 }
 0x150   :  { %v845_v27 = vadd.f32 %v844_v21, %v715_v0  ;;  %v10188_v21 = vmov 2102212464  }
 0x151   :  { %v851_v23 = vpop.f32.mrf.mxu1  ;;  %v7067_v35 = vpop.f32.mrf.mxu0 }
 0x152   :  { %v852_v6 = vadd.f32 %v851_v23, %v721_v25 }
 0x153   :  { %v7055_v26 = vpop.f32.mrf.mxu1  ;;  %v7071_v33 = vpop.f32.mrf.mxu0 }
 0x155   :  { %v7062_v11 = vpop.f32.mrf.mxu1 }
 0x157   :  { %v7069_v22 = vpop.f32.mrf.mxu1 }
 0x159   :  { %v7073_v43 = vpop.f32.mrf.mxu1 }
 0x15b   :  { %v7075_v3 = vpop.f32.mrf.mxu1 }
 0x185   :  { %v1037_v56 = vpop.f32.mrf.mxu0 }
 0x186   :  { %v1038_v8 = vadd.f32 %v1037_v56, %v843_v62  ;;  %v10190_v56 = vmov 1326507024   ;;  %v40_v62 = vld [vmem:[%s10089_s2 + $0x18] sm:$0xff] }
 0x187   :  { %v1039_v16 = vpop.f32.mrf.mxu0 }
 0x188   :  { %v1040_v1 = vadd.f32 %v1039_v16, %v845_v27 }
 0x189   :  { %v1044_v14 = vpop.f32.mrf.mxu0 }
 0x18a   :  { %v1045_v28 = vadd.f32 %v1044_v14, %v852_v6 }
 0x18d   :  { %v1162_v38 = vpop.f32.mrf.mxu1 }
 0x18e   :  { %v7080_v57 = vadd.f32 %v1162_v38, %v1038_v8  ;;  %v10194_v38 = vmov 683565275  }
 0x18f   :  { %v1164_v45 = vpop.f32.mrf.mxu1 }
 0x190   :  { %v1191_v59 = vand.u32 2139095040, %v7080_v57  ;;  %v7083_v36 = vadd.f32 %v1164_v45, %v1040_v1  ;;  %v10185_v53 = vand.u32 2147483647, %v7080_v57 }
 0x191   :  { %v1169_v12 = vpop.f32.mrf.mxu1 }
 0x192   :  { %v1192_v52 = vshrl.u32 %v1191_v59, 23  ;;  %v1295_v7 = vand.u32 2139095040, %v7083_v36  ;;  %v7087_v32 = vadd.f32 %v1169_v12, %v1045_v28  ;;  %v1195_v27 = vand.u32 8388607, %v10185_v53 }
 0x194   :  { %v5709_v29 = vadd.s32 4294967169, %v1192_v52  ;;  %v1296_v50 = vshrl.u32 %v1295_v7, 23  ;;  %v1399_v52 = vand.u32 2139095040, %v7087_v32  ;;  %v303_v7 = vadd.f32 %v7031_v60, %v40_v62 }
 0x195   :  { %v1196_v25 = vor.u32 8388608, %v1195_v27 }
 0x196   :  { %v1198_v44 = vadd.s32 1, %v5709_v29  ;;  %v5713_v48 = vadd.s32 4294967169, %v1296_v50  ;;  %v1400_v60 = vshrl.u32 %v1399_v52, 23  ;;  %v564_v6 = vadd.f32 %v7035_v19, %v303_v7 }
 0x198   :  { %vm1199_vm1 = vcmp.gt.s32.totalorder %v1198_v44, 0  ;;  %v1302_v55 = vadd.s32 1, %v5713_v48  ;;  %v723_v12 = vadd.f32 %v7051_v34, %v564_v6  ;;  %v5717_v19 = vadd.s32 4294967169, %v1400_v60 }
 0x199   :  { %v1200_v39 = vsel %vm1199_vm1, %v1198_v44, 0 }
 0x19a   :  { %v1202_v46 = vand.u32 31, %v1200_v39  ;;  %vm1303_vm2 = vcmp.gt.s32.totalorder %v1302_v55, 0  ;;  %v7089_v37 = vshrl.u32 %v1200_v39, 5 }
 0x19b   :  { %v1304_v16 = vsel %vm1303_vm2, %v1302_v55, 0 }
 0x19c   :  { %v1203_v31 = vsub.s32 32, %v1202_v46  ;;  %v1214_v23 = vshll.u32 %v10188_v21, %v1202_v46  ;;  %v1217_v54 = vshll.u32 %v10192_v30, %v1202_v46  ;;  %v1208_v0 = vshll.u32 %v10196_v15, %v1202_v46 }
 0x19d   :  { %v1211_v8 = vshll.u32 %v10186_v2, %v1202_v46  ;;  %v1205_v51 = vshll.u32 %v10194_v38, %v1202_v46  ;;  %vm1223_vm3 = vcmp.lt.s32.totalorder %v7089_v37, 4  ;;  %v1306_v50 = vand.u32 31, %v1304_v16 }
 0x19e   :  { %v1209_v13 = vshrl.u32 %v10186_v2, %v1203_v31  ;;  %v1212_v10 = vshrl.u32 %v10188_v21, %v1203_v31  ;;  %v1206_v20 = vshrl.u32 %v10196_v15, %v1203_v31  ;;  %v1215_v40 = vshrl.u32 %v10192_v30, %v1203_v31 }
 0x19f   :  { %v1218_v58 = vshrl.u32 %v10190_v56, %v1203_v31  ;;  %vm1220_vm4 = vcmp.lt.s32.totalorder %v7089_v37, 1  ;;  %vm1222_vm5 = vcmp.lt.s32.totalorder %v7089_v37, 3  ;;  %v7125_v46 = vsub.s32 32, %v1306_v50 }
 0x1a0   :  { %v1216_v1 = vor.u32 %v1215_v40, %v1214_v23  ;;  %v1210_v59 = vor.u32 %v1209_v13, %v1208_v0  ;;  %v1213_v5 = vor.u32 %v1212_v10, %v1211_v8  ;;  %v1207_v29 = vor.u32 %v1206_v20, %v1205_v51  ;;  %v1046_v40 = vpop.f32.mrf.mxu0 }
 0x1a1   :  { %v1219_v45 = vor.u32 %v1218_v58, %v1217_v54  ;;  %vm1221_vm6 = vcmp.lt.s32.totalorder %v7089_v37, 2  ;;  %v7133_v10 = vshll.u32 %v1196_v25, 8  ;;  %v854_v23 = vadd.f32 %v7055_v26, %v723_v12 }
 0x1a2   :  { %v1229_v44 = vsel %vm1223_vm3, %v1216_v1, 920167782  ;;  %v1232_v48 = vsel %vm1220_vm4, %v1210_v59, %v1213_v5  ;;  %v1228_v39 = vsel %vm1220_vm4, %v1207_v29, %v1210_v59  ;;  %v1319_v20 = vshrl.u32 %v10192_v30, %v7125_v46 }
 0x1a3   :  { %v1233_v41 = vsel %vm1223_vm3, %v1219_v45, 1326507024  ;;  %v1230_v55 = vsel %vm1222_vm5, %v1213_v5, %v1229_v44  ;;  %v1204_v54 = vshrl.u32 %v10194_v38, %v1203_v31  ;;  %v7143_v62 = vshrl.u32 %v1304_v16, 5 }
 0x1a4   :  { %v1234_v14 = vsel %vm1222_vm5, %v1216_v1, %v1233_v41  ;;  %v1231_v13 = vsel %vm1221_vm6, %v1228_v39, %v1230_v55  ;;  %v1310_v26 = vshrl.u32 %v10196_v15, %v7125_v46  ;;  %v1318_v27 = vshll.u32 %v10188_v21, %v1306_v50  ;;  %v1171_v39 = vpop.f32.mrf.mxu1 }
 0x1a5   :  { %v1235_v28 = vsel %vm1221_vm6, %v1232_v48, %v1234_v14  ;;  %v7146_v0 = vmul.u32.u64.low %v7133_v10, %v1231_v13  ;;  %v7147_v8 = vmul.u32.u64.high %v7133_v10, %v1231_v13, %v7146_v0  ;;  %v1225_v51 = vsel %vm1223_vm3, %v1213_v5, 2102212464 }
 0x1a6   :  { %v7140_v58 = vmul.u32.u64.low %v7133_v10, %v1235_v28  ;;  %v7141_v34 = vmul.u32.u64.high %v7133_v10, %v1235_v28, %v7140_v58  ;;  %v1313_v31 = vshrl.u32 %v10186_v2, %v7125_v46  ;;  %v1316_v16 = vshrl.u32 %v10188_v21, %v7125_v46 }
 0x1a7   :  { %v1406_v1 = vadd.s32 1, %v5717_v19  ;;  %v1047_v45 = vadd.f32 %v1046_v40, %v854_v23  ;;  %v1309_v52 = vshll.u32 %v10194_v38, %v1306_v50  ;;  %v1320_v7 = vor.u32 %v1319_v20, %v1318_v27 }
 0x1a8   :  { %v1322_v41 = vshrl.u32 %v10190_v56, %v7125_v46  ;;  %v1224_v44 = vsel %vm1220_vm4, %v1204_v54, %v1207_v29  ;;  %v10179_v25 = vand.u32 2147483647, %v7083_v36  ;;  %v1312_v5 = vshll.u32 %v10196_v15, %v1306_v50 }
 0x1a9   :  { %v1315_v48 = vshll.u32 %v10186_v2, %v1306_v50  ;;  %v1226_v14 = vsel %vm1222_vm5, %v1210_v59, %v1225_v51  ;;  %v7169_v60 = vor.u32 %v1310_v26, %v1309_v52  ;;  %v1321_v6 = vshll.u32 %v10192_v30, %v1306_v50 }
 0x1aa   :  { %vm1407_vm7 = vcmp.gt.s32.totalorder %v1406_v1, 0  ;;  %v7172_v55 = vor.u32 %v1313_v31, %v1312_v5  ;;  %vm1327_vm8 = vcmp.lt.s32.totalorder %v7143_v62, 4  ;;  %v1299_v59 = vand.u32 8388607, %v10179_v25 }
 0x1ab   :  { %v1317_v12 = vor.u32 %v1316_v16, %v1315_v48  ;;  %v1408_v29 = vsel %vm1407_vm7, %v1406_v1, 0  ;;  %v1323_v28 = vor.u32 %v1322_v41, %v1321_v6  ;;  %v1333_v13 = vsel %vm1327_vm8, %v1320_v7, 920167782 }
 0x1ac   :  { %v1410_v19 = vand.u32 31, %v1408_v29  ;;  %v10182_v23 = vand.u32 2147483647, %v7087_v32  ;;  %v7180_v20 = vadd.f32 %v1171_v39, %v1047_v45  ;;  %v1227_v50 = vsel %vm1221_vm6, %v1224_v44, %v1226_v14 }
 0x1ad   :  { %v1246_v40 = vadd.s32 1, %v7147_v8  ;;  %vm1324_vm9 = vcmp.lt.s32.totalorder %v7143_v62, 1  ;;  %vm1326_vm10 = vcmp.lt.s32.totalorder %v7143_v62, 3  ;;  %vm1245_vm11 = vc.u32 %v7141_v34, %v7146_v0 }
 0x1ae   :  { %v1332_v54 = vsel %vm1324_vm9, %v7169_v60, %v7172_v55  ;;  %v1334_v58 = vsel %vm1326_vm10, %v1317_v12, %v1333_v13  ;;  %v7195_v26 = vsub.s32 32, %v1410_v19  ;;  %v1337_v37 = vsel %vm1327_vm8, %v1323_v28, 1326507024 }
 0x1af   :  { %v1300_v27 = vor.u32 8388608, %v1299_v59  ;;  %vm1325_vm12 = vcmp.lt.s32.totalorder %v7143_v62, 2  ;;  %v1403_v51 = vand.u32 8388607, %v10182_v23  ;;  %v1503_v31 = vand.u32 2139095040, %v7180_v20 }
 0x1b0   :  { %v1243_v16 = vmul.u32 %v7133_v10, %v1227_v50  ;;  %v1247_v1 = vsel %vm1245_vm11, %v1246_v40, %v7147_v8  ;;  %v1335_v45 = vsel %vm1325_vm12, %v1332_v54, %v1334_v58  ;;  %v1336_v52 = vsel %vm1324_vm9, %v7172_v55, %v1317_v12 }
 0x1b1   :  { %v1338_v41 = vsel %vm1326_vm10, %v1320_v7, %v1337_v37  ;;  %v7212_v44 = vshrl.u32 %v1408_v29, 5  ;;  %v1422_v5 = vshll.u32 %v10188_v21, %v1410_v19  ;;  %v1423_v48 = vshrl.u32 %v10192_v30, %v7195_v26 }
 0x1b2   :  { %v1414_v10 = vshrl.u32 %v10196_v15, %v7195_v26  ;;  %v1417_v8 = vshrl.u32 %v10186_v2, %v7195_v26  ;;  %v1420_v14 = vshrl.u32 %v10188_v21, %v7195_v26  ;;  %v1426_v6 = vshrl.u32 %v10190_v56, %v7195_v26 }
 0x1b3   :  { %v1248_v7 = vadd.s32 %v1247_v1, %v1243_v16  ;;  %v7225_v39 = vshll.u32 %v1300_v27, 8  ;;  %v1424_v29 = vor.u32 %v1423_v48, %v1422_v5  ;;  %v1425_v28 = vshll.u32 %v10192_v30, %v1410_v19 }
 0x1b4   :  { %v1339_v13 = vsel %vm1325_vm12, %v1336_v52, %v1338_v41  ;;  %v1413_v59 = vshll.u32 %v10194_v38, %v1410_v19  ;;  %v1416_v50 = vshll.u32 %v10196_v15, %v1410_v19  ;;  %v1419_v40 = vshll.u32 %v10186_v2, %v1410_v19  ;;  %v41_v19 = vld [vmem:[%s10089_s2 + $0x20] sm:$0xff] }
 0x1b5   :  { %v7234_v54 = vmul.u32.u64.low %v7225_v39, %v1335_v45  ;;  %v7235_v58 = vmul.u32.u64.high %v7225_v39, %v1335_v45, %v7234_v54  ;;  %v1427_v37 = vor.u32 %v1426_v6, %v1425_v28  ;;  %v1504_v27 = vshrl.u32 %v1503_v31, 23 }
 0x1b6   :  { %v1415_v16 = vor.u32 %v1414_v10, %v1413_v59  ;;  %v1418_v1 = vor.u32 %v1417_v8, %v1416_v50  ;;  %v1421_v5 = vor.u32 %v1420_v14, %v1419_v40  ;;  %vm1431_vm13 = vcmp.lt.s32.totalorder %v7212_v44, 4  ;;  %v42_v59 = vld [vmem:[%s10089_s2 + $0x28] sm:$0xff] }
 0x1b7   :  { %v7240_v52 = vmul.u32.u64.low %v7225_v39, %v1339_v13  ;;  %v7241_v41 = vmul.u32.u64.high %v7225_v39, %v1339_v13, %v7240_v52  ;;  %v1437_v48 = vsel %vm1431_vm13, %v1424_v29, 920167782  ;;  %v1249_v45 = vadd.s32 536870912, %v1248_v7 }
 0x1b8   :  { %v1329_v31 = vsel %vm1327_vm8, %v1317_v12, 2102212464  ;;  %vm1428_vm14 = vcmp.lt.s32.totalorder %v7212_v44, 1  ;;  %vm1430_vm15 = vcmp.lt.s32.totalorder %v7212_v44, 3  ;;  %v1441_v10 = vsel %vm1431_vm13, %v1427_v37, 1326507024 }
 0x1b9   :  { %v5721_v8 = vadd.s32 4294967169, %v1504_v27  ;;  %v1308_v14 = vshrl.u32 %v10194_v38, %v7125_v46  ;;  %v1404_v6 = vor.u32 8388608, %v1403_v51  ;;  %v1436_v28 = vsel %vm1428_vm14, %v1415_v16, %v1418_v1 }
 0x1ba   :  { %v1438_v13 = vsel %vm1430_vm15, %v1421_v5, %v1437_v48  ;;  %v312_v12 = vadd.f32 %v7033_v4, %v41_v19  ;;  %v1440_v50 = vsel %vm1428_vm14, %v1418_v1, %v1421_v5  ;;  %v1442_v40 = vsel %vm1430_vm15, %v1424_v29, %v1441_v10 }
 0x1bb   :  { %v7268_v46 = vshrl.u32 %v1249_v45, 30  ;;  %v1328_v51 = vsel %vm1324_vm9, %v1308_v14, %v7169_v60  ;;  %v1330_v4 = vsel %vm1326_vm10, %v7172_v55, %v1329_v31  ;;  %vm1429_vm0 = vcmp.lt.s32.totalorder %v7212_v44, 2 }
 0x1bc   :  { %v1439_v37 = vsel %vm1429_vm0, %v1436_v28, %v1438_v13  ;;  %v1510_v27 = vadd.s32 1, %v5721_v8  ;;  %v314_v52 = vadd.f32 %v7037_v42, %v42_v59  ;;  %v1350_v29 = vadd.s32 1, %v7235_v58 }
 0x1bd   :  { %v1443_v48 = vsel %vm1429_vm0, %v1440_v50, %v1442_v40  ;;  %v1444_v19 = vshll.u32 %v1404_v6, 8  ;;  %v569_v60 = vadd.f32 %v7039_v18, %v312_v12  ;;  %v1331_v45 = vsel %vm1325_vm12, %v1328_v51, %v1330_v4  ;;  %v1051_v50 = vpop.f32.mrf.mxu0 }
 0x1be   :  { %vm1349_vm1 = vc.u32 %v7241_v41, %v7234_v54  ;;  %vm1511_vm2 = vcmp.gt.s32.totalorder %v1510_v27, 0  ;;  %v1251_v55 = vshll.u32 %v7268_v46, 30  ;;  %v1347_v62 = vmul.u32 %v7225_v39, %v1331_v45 }
 0x1bf   :  { %v7289_v31 = vmul.u32.u64.low %v1444_v19, %v1439_v37  ;;  %v7290_v10 = vmul.u32.u64.high %v1444_v19, %v1439_v37, %v7289_v31  ;;  %v1512_v42 = vsel %vm1511_vm2, %v1510_v27, 0  ;;  %v729_v6 = vadd.f32 %v7053_v24, %v569_v60  ;;  %v1176_v60 = vpop.f32.mrf.mxu1 }
 0x1c0   :  { %v7293_v8 = vmul.u32.u64.low %v1444_v19, %v1443_v48  ;;  %v7294_v14 = vmul.u32.u64.high %v1444_v19, %v1443_v48, %v7293_v8  ;;  %v1351_v18 = vsel %vm1349_vm1, %v1350_v29, %v7235_v58  ;;  %v1433_v28 = vsel %vm1431_vm13, %v1421_v5, 2102212464 }
 0x1c1   :  { %v10180_v13 = vand.u32 2147483647, %v7180_v20  ;;  %v1514_v12 = vand.u32 31, %v1512_v42  ;;  %v571_v59 = vadd.f32 %v7043_v49, %v314_v52  ;;  %v7303_v40 = vsub.s32 %v1248_v7, %v1251_v55 }
 0x1c2   :  { %v1412_v51 = vshrl.u32 %v10194_v38, %v7195_v26  ;;  %v861_v24 = vadd.f32 %v7062_v11, %v729_v6  ;;  %v7308_v4 = vadd.s32 %v1351_v18, %v1347_v62  ;;  %v1434_v49 = vsel %vm1430_vm15, %v1418_v1, %v1433_v28 }
 0x1c3   :  { %v7310_v58 = vsub.s32 32, %v1514_v12  ;;  %v731_v39 = vadd.f32 %v7057_v9, %v571_v59  ;;  %v1507_v7 = vand.u32 8388607, %v10180_v13  ;;  %v1254_v27 = vsub.s32 0, %v7303_v40 }
 0x1c4   :  { %v1432_v5 = vsel %vm1428_vm14, %v1412_v51, %v1415_v16  ;;  %v1052_v37 = vadd.f32 %v1051_v50, %v861_v24  ;;  %v1454_v9 = vadd.s32 1, %v7290_v10  ;;  %v1517_v52 = vshll.u32 %v10194_v38, %v1514_v12 }
 0x1c5   :  { %v1518_v26 = vshrl.u32 %v10196_v15, %v7310_v58  ;;  %v1521_v11 = vshrl.u32 %v10186_v2, %v7310_v58  ;;  %v1520_v16 = vshll.u32 %v10196_v15, %v1514_v12  ;;  %v1353_v1 = vadd.s32 536870912, %v7308_v4 }
 0x1c6   :  { %v1435_v29 = vsel %vm1429_vm0, %v1432_v5, %v1434_v49  ;;  %vm1453_vm3 = vc.u32 %v7294_v14, %v7289_v31  ;;  %v1524_v48 = vshrl.u32 %v10188_v21, %v7310_v58  ;;  %v7334_v45 = vshrl.u32 %v1512_v42, 5 }
 0x1c7   :  { %v1519_v55 = vor.u32 %v1518_v26, %v1517_v52  ;;  %v1522_v8 = vor.u32 %v1521_v11, %v1520_v16  ;;  %v1523_v6 = vshll.u32 %v10186_v2, %v1514_v12  ;;  %v1526_v18 = vshll.u32 %v10188_v21, %v1514_v12 }
 0x1c8   :  { %v1527_v62 = vshrl.u32 %v10192_v30, %v7310_v58  ;;  %v1529_v44 = vshll.u32 %v10192_v30, %v1514_v12  ;;  %v1530_v28 = vshrl.u32 %v10190_v56, %v7310_v58  ;;  %v863_v59 = vadd.f32 %v7069_v22, %v731_v39  ;;  %v1053_v12 = vpop.f32.mrf.mxu0 }
 0x1c9   :  { %v1455_v50 = vsel %vm1453_vm3, %v1454_v9, %v7290_v10  ;;  %v1525_v42 = vor.u32 %v1524_v48, %v1523_v6  ;;  %v7345_v51 = vadd.f32 %v1176_v60, %v1052_v37  ;;  %v1451_v24 = vmul.u32 %v1444_v19, %v1435_v29 }
 0x1ca   :  { %v1508_v5 = vor.u32 8388608, %v1507_v7  ;;  %v1528_v49 = vor.u32 %v1527_v62, %v1526_v18  ;;  %v1531_v26 = vor.u32 %v1530_v28, %v1529_v44  ;;  %v5710_v11 = vmin.u32 %v1254_v27, %v7303_v40  ;;  %v1178_v18 = vpop.f32.mrf.mxu1 }
 0x1cb   :  { %v7348_v52 = vshrl.u32 %v1353_v1, 30  ;;  %vm1532_vm4 = vcmp.lt.s32.totalorder %v7334_v45, 1  ;;  %vm1535_vm5 = vcmp.lt.s32.totalorder %v7334_v45, 4  ;;  %v1456_v16 = vadd.s32 %v1455_v50, %v1451_v24  ;;  %v43_v1 = vld [vmem:[%s10089_s2 + $0x30] sm:$0xff]  ;;  %v44_v24 = vld [vmem:[%s10089_s2 + $0x38] sm:$0xff] }
 0x1cc   :  { %vm1534_vm6 = vcmp.lt.s32.totalorder %v7334_v45, 3  ;;  %v1540_v22 = vsel %vm1532_vm4, %v1519_v55, %v1522_v8  ;;  %v1541_v19 = vsel %vm1535_vm5, %v1528_v49, 920167782  ;;  %vm1533_vm7 = vcmp.lt.s32.totalorder %v7334_v45, 2 }
 0x1cd   :  { %10363 = vst [vmem:[#allocation5_spill] sm:$0xff] %v7348_v52  ;;  %v1542_v10 = vsel %vm1534_vm6, %v1525_v42, %v1541_v19  ;;  %v1544_v39 = vsel %vm1532_vm4, %v1522_v8, %v1525_v42  ;;  %v1607_v37 = vand.u32 2139095040, %v7345_v51  ;;  %v1545_v27 = vsel %vm1535_vm5, %v1531_v26, 1326507024 }
 0x1ce   :  { %v1543_v7 = vsel %vm1533_vm7, %v1540_v22, %v1542_v10  ;;  %v1548_v9 = vshll.u32 %v1508_v5, 8  ;;  %v1256_v29 = vclz %v5710_v11  ;;  %v1054_v48 = vadd.f32 %v1053_v12, %v863_v59 }
 0x1cf   :  { %v1355_v60 = vshll.u32 %v7348_v52, 30  ;;  %v1546_v6 = vsel %vm1534_vm6, %v1528_v49, %v1545_v27  ;;  %v1457_v62 = vadd.s32 536870912, %v1456_v16  ;;  %v1537_v59 = vsel %vm1535_vm5, %v1525_v42, 2102212464 }
 0x1d0   :  { %v1547_v44 = vsel %vm1533_vm7, %v1544_v39, %v1546_v6  ;;  %v7375_v28 = vmul.u32.u64.low %v1548_v9, %v1543_v7  ;;  %v7376_v50 = vmul.u32.u64.high %v1548_v9, %v1543_v7, %v7375_v28  ;;  %v1608_v49 = vshrl.u32 %v1607_v37, 23 }
 0x1d1   :  { %v7384_v5 = vmul.u32.u64.low %v1548_v9, %v1547_v44  ;;  %v7385_v26 = vmul.u32.u64.high %v1548_v9, %v1547_v44, %v7384_v5  ;;  %v323_v11 = vadd.f32 %v7041_v17, %v43_v1  ;;  %v1516_v12 = vshrl.u32 %v10194_v38, %v7310_v58 }
 0x1d2   :  { %v7390_v22 = vadd.f32 %v1178_v18, %v1054_v48  ;;  %v5711_v19 = vadd.s32 4294967294, %v1256_v29  ;;  %v5725_v10 = vadd.s32 4294967169, %v1608_v49  ;;  %v325_v39 = vadd.f32 %v7045_v47, %v44_v24 }
 0x1d3   :  { %v1536_v7 = vsel %vm1532_vm4, %v1516_v12, %v1519_v55  ;;  %v1538_v42 = vsel %vm1534_vm6, %v1522_v8, %v1537_v59  ;;  %v7398_v27 = vsub.s32 %v7308_v4, %v1355_v60  ;;  %v7400_v37 = vshrl.u32 %v1457_v62, 30 }
 0x1d4   :  { %v1558_v17 = vadd.s32 1, %v7376_v50  ;;  %v576_v58 = vadd.f32 %v7047_v61, %v323_v11  ;;  %vm1557_vm8 = vc.u32 %v7385_v26, %v7375_v28  ;;  %v1614_v1 = vadd.s32 1, %v5725_v10 }
 0x1d5   :  { %10364 = vst [vmem:[#allocation13_spill] sm:$0xff] %v7400_v37  ;;  %v1711_v47 = vand.u32 2139095040, %v7390_v22  ;;  %vm5712_vm9 = vcmp.lt.s32.totalorder %v5711_v19, 0  ;;  %v1539_v55 = vsel %vm1533_vm7, %v1536_v7, %v1538_v42  ;;  %v578_v8 = vadd.f32 %v7049_v63, %v325_v39 }
 0x1d6   :  { %v737_v4 = vadd.f32 %v7067_v35, %v576_v58  ;;  %v10183_v29 = vand.u32 2147483647, %v7345_v51  ;;  %vm1615_vm10 = vcmp.gt.s32.totalorder %v1614_v1, 0  ;;  %v1358_v48 = vsub.s32 0, %v7398_v27 }
 0x1d7   :  { %v1459_v61 = vshll.u32 %v7400_v37, 30  ;;  %v1559_v60 = vsel %vm1557_vm8, %v1558_v17, %v7376_v50  ;;  %v1616_v6 = vsel %vm1615_vm10, %v1614_v1, 0  ;;  %v7415_v18 = vsel %vm5712_vm9, 0, %v5711_v19 }
 0x1d8   :  { %v1555_v62 = vmul.u32 %v1548_v9, %v1539_v55  ;;  %v1618_v44 = vand.u32 31, %v1616_v6  ;;  %v1712_v45 = vshrl.u32 %v1711_v47, 23  ;;  %v739_v24 = vadd.f32 %v7071_v33, %v578_v8 }
 0x1d9   :  { %v7419_v63 = vadd.f32 %v7073_v43, %v737_v4  ;;  %v7423_v35 = vadd.s32 %v7146_v0, %v7141_v34  ;;  %v1264_v50 = vsub.s32 4294967266, %v7415_v18  ;;  %v5714_v49 = vmin.u32 %v1358_v48, %v7398_v27 }
 0x1da   :  { %v7425_v59 = vadd.s32 %v1559_v60, %v1555_v62  ;;  %v1619_v5 = vsub.s32 32, %v1618_v44  ;;  %v7429_v11 = vsub.s32 %v1456_v16, %v1459_v61  ;;  %v1611_v9 = vand.u32 8388607, %v10183_v29 }
 0x1db   :  { %v1621_v33 = vshll.u32 %v10194_v38, %v1618_v44  ;;  %v1624_v12 = vshll.u32 %v10196_v15, %v1618_v44  ;;  %v5729_v34 = vadd.s32 4294967169, %v1712_v45  ;;  %v1627_v19 = vshll.u32 %v10186_v2, %v1618_v44 }
 0x1dc   :  { %v1622_v43 = vshrl.u32 %v10196_v15, %v1619_v5  ;;  %v1625_v0 = vshrl.u32 %v10186_v2, %v1619_v5  ;;  %v1628_v10 = vshrl.u32 %v10188_v21, %v1619_v5  ;;  %v1631_v39 = vshrl.u32 %v10192_v30, %v1619_v5 }
 0x1dd   :  { %v1561_v16 = vadd.s32 536870912, %v7425_v59  ;;  %v1617_v7 = vshrl.u32 %v1616_v6, 5  ;;  %v1630_v42 = vshll.u32 %v10188_v21, %v1618_v44  ;;  %v1634_v17 = vshrl.u32 %v10190_v56, %v1619_v5 }
 0x1de   :  { %v1623_v58 = vor.u32 %v1622_v43, %v1621_v33  ;;  %v1626_v1 = vor.u32 %v1625_v0, %v1624_v12  ;;  %v1629_v47 = vor.u32 %v1628_v10, %v1627_v19  ;;  %v1633_v55 = vshll.u32 %v10192_v30, %v1618_v44 }
 0x1df   :  { %v1260_v8 = vsub.s32 32, %v7415_v18  ;;  %v7445_v4 = vadd.s32 127, %v1264_v50  ;;  %v1612_v48 = vor.u32 8388608, %v1611_v9  ;;  %v1632_v61 = vor.u32 %v1631_v39, %v1630_v42 }
 0x1e0   :  { %v1360_v60 = vclz %v5714_v49  ;;  %v1462_v62 = vsub.s32 0, %v7429_v11  ;;  %v1635_v45 = vor.u32 %v1634_v17, %v1633_v55  ;;  %v1718_v6 = vadd.s32 1, %v5729_v34  ;;  %v1058_v17 = vpop.f32.mrf.mxu0 }
 0x1e1   :  { %v7448_v25 = vshrl.u32 %v1561_v16, 30  ;;  %v1620_v13 = vshrl.u32 %v10194_v38, %v1619_v5  ;;  %vm1636_vm11 = vcmp.lt.s32.totalorder %v1617_v7, 1  ;;  %vm1639_vm12 = vcmp.lt.s32.totalorder %v1617_v7, 4 }
 0x1e2   :  { %vm1638_vm13 = vcmp.lt.s32.totalorder %v1617_v7, 3  ;;  %v1641_v33 = vsel %vm1639_vm12, %v1629_v47, 2102212464  ;;  %v1644_v44 = vsel %vm1636_vm11, %v1623_v58, %v1626_v1  ;;  %v1645_v43 = vsel %vm1639_vm12, %v1632_v61, 920167782 }
 0x1e3   :  { %vm1637_vm14 = vcmp.lt.s32.totalorder %v1617_v7, 2  ;;  %v1646_v50 = vsel %vm1638_vm13, %v1629_v47, %v1645_v43  ;;  %v1652_v12 = vshll.u32 %v1612_v48, 8  ;;  %v10181_v9 = vand.u32 2147483647, %v7390_v22 }
 0x1e4   :  { %v1640_v49 = vsel %vm1636_vm11, %v1620_v13, %v1623_v58  ;;  %v1647_v0 = vsel %vm1637_vm14, %v1644_v44, %v1646_v50  ;;  %v1648_v19 = vsel %vm1636_vm11, %v1626_v1, %v1629_v47  ;;  %v1649_v34 = vsel %vm1639_vm12, %v1635_v45, 1326507024 }
 0x1e5   :  { %v1642_v10 = vsel %vm1638_vm13, %v1626_v1, %v1641_v33  ;;  %v1650_v39 = vsel %vm1638_vm13, %v1632_v61, %v1649_v34  ;;  %v7453_v16 = vmul.u32.u64.low %v1652_v12, %v1647_v0  ;;  %v7454_v5 = vmul.u32.u64.high %v1652_v12, %v1647_v0, %v7453_v16  ;;  %v1183_v33 = vpop.f32.mrf.mxu1 }
 0x1e6   :  { %v5715_v42 = vadd.s32 4294967294, %v1360_v60  ;;  %v1563_v55 = vshll.u32 %v7448_v25, 30  ;;  %v1651_v43 = vsel %vm1637_vm14, %v1648_v19, %v1650_v39  ;;  %vm1719_vm15 = vcmp.gt.s32.totalorder %v1718_v6, 0 }
 0x1e7   :  { %v5718_v48 = vmin.u32 %v1462_v62, %v7429_v11  ;;  %v7460_v13 = vmul.u32.u64.low %v1652_v12, %v1651_v43  ;;  %v7461_v58 = vmul.u32.u64.high %v1652_v12, %v1651_v43, %v7460_v13  ;;  %v1720_v47 = vsel %vm1719_vm15, %v1718_v6, 0 }
 0x1e8   :  { %v7464_v1 = vadd.f32 %v7075_v3, %v739_v24  ;;  %v1643_v61 = vsel %vm1637_vm14, %v1640_v49, %v1642_v10  ;;  %v1715_v60 = vand.u32 8388607, %v10181_v9  ;;  %v1722_v45 = vand.u32 31, %v1720_v47 }
 0x1e9   :  { %v1261_v44 = vshll.u32 %v7303_v40, %v7415_v18  ;;  %v1262_v50 = vshrl.u32 %v7423_v35, %v1260_v8  ;;  %v1059_v62 = vadd.f32 %v1058_v17, %v7419_v63  ;;  %v1662_v0 = vadd.s32 1, %v7454_v5 }
 0x1ea   :  { %v1266_v6 = vshll.u32 %v7445_v4, 23  ;;  %vm5716_vm0 = vcmp.lt.s32.totalorder %v5715_v42, 0  ;;  %v7476_v3 = vsub.s32 %v7425_v59, %v1563_v55  ;;  %v1723_v24 = vsub.s32 32, %v1722_v45 }
 0x1eb   :  { %v1464_v7 = vclz %v5718_v48  ;;  %v1659_v49 = vmul.u32 %v1652_v12, %v1643_v61  ;;  %vm1661_vm1 = vc.u32 %v7461_v58, %v7453_v16  ;;  %v7480_v19 = vadd.f32 %v1183_v33, %v1059_v62 }
 0x1ec   :  { %v1663_v40 = vsel %vm1661_vm1, %v1662_v0, %v7454_v5  ;;  %v1716_v18 = vor.u32 8388608, %v1715_v60  ;;  %v1726_v63 = vshrl.u32 %v10196_v15, %v1723_v24  ;;  %v1729_v35 = vshrl.u32 %v10186_v2, %v1723_v24 }
 0x1ed   :  { %v1664_v8 = vadd.s32 %v1663_v40, %v1659_v49  ;;  %v1725_v4 = vshll.u32 %v10194_v38, %v1722_v45  ;;  %v1728_v59 = vshll.u32 %v10196_v15, %v1722_v45  ;;  %v1732_v34 = vshrl.u32 %v10188_v21, %v1723_v24 }
 0x1ee   :  { %v1566_v12 = vsub.s32 0, %v7476_v3  ;;  %v1731_v10 = vshll.u32 %v10186_v2, %v1722_v45  ;;  %v1734_v39 = vshll.u32 %v10188_v21, %v1722_v45  ;;  %v1735_v5 = vshrl.u32 %v10192_v30, %v1723_v24 }
 0x1ef   :  { %v1665_v17 = vadd.s32 536870912, %v1664_v8  ;;  %v1721_v55 = vshrl.u32 %v1720_v47, 5  ;;  %v1727_v43 = vor.u32 %v1726_v63, %v1725_v4  ;;  %v1730_v48 = vor.u32 %v1729_v35, %v1728_v59 }
 0x1f0   :  { %v1733_v13 = vor.u32 %v1732_v34, %v1731_v10  ;;  %v1736_v61 = vor.u32 %v1735_v5, %v1734_v39  ;;  %v1737_v60 = vshll.u32 %v10192_v30, %v1722_v45  ;;  %v1738_v33 = vshrl.u32 %v10190_v56, %v1723_v24 }
 0x1f1   :  { %v1263_v62 = vor.u32 %v1262_v50, %v1261_v44  ;;  %v1267_v0 = vor.u32 4788187, %v1266_v6  ;;  %v7495_v49 = vsel %vm5716_vm0, 0, %v5715_v42  ;;  %v7497_v40 = vshrl.u32 %v1665_v17, 30  ;;  %v1060_v17 = vpop.f32.mrf.mxu0 }
 0x1f2   :  { %v5719_v9 = vadd.s32 4294967294, %v1464_v7  ;;  %v1739_v23 = vor.u32 %v1738_v33, %v1737_v60  ;;  %v1756_v29 = vshll.u32 %v1716_v18, 8  ;;  %v1815_v47 = vand.u32 2139095040, %v7480_v19 }
 0x1f3   :  { %v5722_v63 = vmin.u32 %v1566_v12, %v7476_v3  ;;  %v1667_v35 = vshll.u32 %v7497_v40, 30  ;;  %vm1740_vm2 = vcmp.lt.s32.totalorder %v1721_v55, 1  ;;  %vm1743_vm3 = vcmp.lt.s32.totalorder %v1721_v55, 4 }
 0x1f4   :  { %v1745_v45 = vsel %vm1743_vm3, %v1733_v13, 2102212464  ;;  %v1748_v4 = vsel %vm1740_vm2, %v1727_v43, %v1730_v48  ;;  %v1749_v44 = vsel %vm1743_vm3, %v1736_v61, 920167782  ;;  %v1753_v50 = vsel %vm1743_vm3, %v1739_v23, 1326507024 }
 0x1f5   :  { %v7502_v6 = vsub.s32 %v1664_v8, %v1667_v35  ;;  %v1724_v42 = vshrl.u32 %v10194_v38, %v1723_v24  ;;  %vm1742_vm4 = vcmp.lt.s32.totalorder %v1721_v55, 3  ;;  %v1752_v7 = vsel %vm1740_vm2, %v1730_v48, %v1733_v13  ;;  %v1185_v35 = vpop.f32.mrf.mxu1 }
 0x1f6   :  { %vm1741_vm5 = vcmp.lt.s32.totalorder %v1721_v55, 2  ;;  %v1750_v18 = vsel %vm1742_vm4, %v1733_v13, %v1749_v44  ;;  %v1754_v59 = vsel %vm1742_vm4, %v1736_v61, %v1753_v50  ;;  %v1816_v34 = vshrl.u32 %v1815_v47, 23 }
 0x1f7   :  { %v1670_v12 = vsub.s32 0, %v7502_v6  ;;  %v1744_v10 = vsel %vm1740_vm2, %v1724_v42, %v1727_v43  ;;  %v1746_v39 = vsel %vm1742_vm4, %v1730_v48, %v1745_v45  ;;  %v1751_v5 = vsel %vm1741_vm5, %v1748_v4, %v1750_v18 }
 0x1f8   :  { %v1568_v60 = vclz %v5722_v63  ;;  %v1755_v23 = vsel %vm1741_vm5, %v1752_v7, %v1754_v59  ;;  %v7508_v8 = vmul.u32.u64.low %v1756_v29, %v1751_v5  ;;  %v7509_v33 = vmul.u32.u64.high %v1756_v29, %v1751_v5, %v7508_v8 }
 0x1f9   :  { %vm5720_vm6 = vcmp.lt.s32.totalorder %v5719_v9, 0  ;;  %v5726_v24 = vmin.u32 %v1670_v12, %v7502_v6  ;;  %v7513_v13 = vmul.u32.u64.low %v1756_v29, %v1755_v23  ;;  %v7514_v61 = vmul.u32.u64.high %v1756_v29, %v1755_v23, %v7513_v13 }
 0x1fa   :  { %v1368_v47 = vsub.s32 4294967266, %v7495_v49  ;;  %v1747_v43 = vsel %vm1741_vm5, %v1744_v10, %v1746_v39  ;;  %v5733_v48 = vadd.s32 4294967169, %v1816_v34  ;;  %v1268_v45 = vand.u32 2147483647, %v1267_v0 }
 0x1fb   :  { %v7520_v63 = vadd.s32 %v7234_v54, %v7241_v41  ;;  %v1061_v4 = vadd.f32 %v1060_v17, %v7464_v1  ;;  %v1672_v44 = vclz %v5726_v24  ;;  %v7523_v50 = vsel %vm5720_vm6, 0, %v5719_v9 }
 0x1fc   :  { %v5723_v42 = vadd.s32 4294967294, %v1568_v60  ;;  %v1766_v7 = vadd.s32 1, %v7509_v33  ;;  %v1822_v18 = vadd.s32 1, %v5733_v48  ;;  %v1270_v59 = vcvt.s32.f32 %v1263_v62 }
 0x1fd   :  { %v1763_v12 = vmul.u32 %v1756_v29, %v1747_v43  ;;  %vm1765_vm7 = vc.u32 %v7514_v61, %v7508_v8  ;;  %v7528_v55 = vadd.f32 %v1185_v35, %v1061_v4  ;;  %v7530_v0 = vadd.s32 127, %v1368_v47 }
 0x1fe   :  { %v7534_v54 = vadd.s32 %v7289_v31, %v7294_v14  ;;  %v1767_v41 = vsel %vm1765_vm7, %v1766_v7, %v7509_v33  ;;  %vm1823_vm8 = vcmp.gt.s32.totalorder %v1822_v18, 0  ;;  %v1472_v9 = vsub.s32 4294967266, %v7523_v50 }
 0x1ff   :  { %10365 = vst [vmem:[#allocation6_spill] sm:$0xff] %v7528_v55  ;;  %v5727_v1 = vadd.s32 4294967294, %v1672_v44  ;;  %v1768_v34 = vadd.s32 %v1767_v41, %v1763_v12  ;;  %v1824_v62 = vsel %vm1823_vm8, %v1822_v18, 0  ;;  %v7538_v29 = vmul.f32 %v1270_v59, %v1268_v45 }
 0x200   :  { %vm5724_vm9 = vcmp.lt.s32.totalorder %v5723_v42, 0  ;;  %v10184_v10 = vand.u32 2147483647, %v7480_v19  ;;  %v1826_v39 = vand.u32 31, %v1824_v62  ;;  %v1919_v17 = vand.u32 2139095040, %v7528_v55 }
 0x201   :  { %v1769_v14 = vadd.s32 536870912, %v1768_v34  ;;  %v1468_v23 = vsub.s32 32, %v7523_v50  ;;  %v7549_v33 = vadd.s32 %v7375_v28, %v7385_v26  ;;  %v7551_v13 = vadd.s32 127, %v1472_v9 }
 0x202   :  { %v1827_v24 = vsub.s32 32, %v1826_v39  ;;  %v7553_v47 = vsel %vm5724_vm9, 0, %v5723_v42  ;;  %vm5728_vm10 = vcmp.lt.s32.totalorder %v5727_v1, 0  ;;  %v1819_v48 = vand.u32 8388607, %v10184_v10 }
 0x203   :  { %v7555_v43 = vshrl.u32 %v1769_v14, 30  ;;  %v1829_v26 = vshll.u32 %v10194_v38, %v1826_v39  ;;  %v1832_v44 = vshll.u32 %v10196_v15, %v1826_v39  ;;  %v1920_v42 = vshrl.u32 %v1919_v17, 23 }
 0x204   :  { %v1830_v35 = vshrl.u32 %v10196_v15, %v1827_v24  ;;  %v1833_v45 = vshrl.u32 %v10186_v2, %v1827_v24  ;;  %v1836_v4 = vshrl.u32 %v10188_v21, %v1827_v24  ;;  %v7565_v7 = vsel %vm5728_vm10, 0, %v5727_v1 }
 0x205   :  { %v1771_v28 = vshll.u32 %v7555_v43, 30  ;;  %v1835_v18 = vshll.u32 %v10186_v2, %v1826_v39  ;;  %v1838_v59 = vshll.u32 %v10188_v21, %v1826_v39  ;;  %v1839_v12 = vshrl.u32 %v10192_v30, %v1827_v24 }
 0x206   :  { %v1825_v9 = vshrl.u32 %v1824_v62, 5  ;;  %v1831_v14 = vor.u32 %v1830_v35, %v1829_v26  ;;  %v1834_v10 = vor.u32 %v1833_v45, %v1832_v44  ;;  %v1841_v60 = vshll.u32 %v10192_v30, %v1826_v39 }
 0x207   :  { %v7570_v41 = vsub.s32 %v1768_v34, %v1771_v28  ;;  %v1837_v31 = vor.u32 %v1836_v4, %v1835_v18  ;;  %v1840_v53 = vor.u32 %v1839_v12, %v1838_v59  ;;  %v1842_v5 = vshrl.u32 %v10190_v56, %v1827_v24 }
 0x208   :  { %v1474_v1 = vshll.u32 %v7551_v13, 23  ;;  %v1576_v17 = vsub.s32 4294967266, %v7553_v47  ;;  %v1680_v34 = vsub.s32 4294967266, %v7565_v7  ;;  %v1820_v28 = vor.u32 8388608, %v1819_v48 }
 0x209   :  { %v1774_v2 = vsub.s32 0, %v7570_v41  ;;  %v1843_v62 = vor.u32 %v1842_v5, %v1841_v60  ;;  %v5737_v35 = vadd.s32 4294967169, %v1920_v42  ;;  %v1828_v4 = vshrl.u32 %v10194_v38, %v1827_v24 }
 0x20a   :  { %vm1844_vm11 = vcmp.lt.s32.totalorder %v1825_v9, 1  ;;  %vm1847_vm12 = vcmp.lt.s32.totalorder %v1825_v9, 4  ;;  %vm1846_vm13 = vcmp.lt.s32.totalorder %v1825_v9, 3  ;;  %vm1845_vm14 = vcmp.lt.s32.totalorder %v1825_v9, 2 }
 0x20b   :  { %v5730_v45 = vmin.u32 %v1774_v2, %v7570_v41  ;;  %v1849_v39 = vsel %vm1847_vm12, %v1837_v31, 2102212464  ;;  %v1852_v13 = vsel %vm1844_vm11, %v1831_v14, %v1834_v10  ;;  %v1853_v26 = vsel %vm1847_vm12, %v1840_v53, 920167782 }
 0x20c   :  { %v1854_v18 = vsel %vm1846_vm13, %v1837_v31, %v1853_v26  ;;  %v1856_v59 = vsel %vm1844_vm11, %v1834_v10, %v1837_v31  ;;  %v1857_v56 = vsel %vm1847_vm12, %v1843_v62, 1326507024  ;;  %v1860_v48 = vshll.u32 %v1820_v28, 8 }
 0x20d   :  { %v1776_v44 = vclz %v5730_v45  ;;  %v1855_v12 = vsel %vm1845_vm14, %v1852_v13, %v1854_v18  ;;  %v1926_v5 = vadd.s32 1, %v5737_v35  ;;  %v1848_v42 = vsel %vm1844_vm11, %v1828_v4, %v1831_v14 }
 0x20e   :  { %v1850_v2 = vsel %vm1846_vm13, %v1834_v10, %v1849_v39  ;;  %v1858_v30 = vsel %vm1846_vm13, %v1840_v53, %v1857_v56  ;;  %v1676_v24 = vsub.s32 32, %v7565_v7  ;;  %v7589_v45 = vshrl.u32 %v7534_v54, %v1468_v23 }
 0x20f   :  { %v5731_v60 = vadd.s32 4294967294, %v1776_v44  ;;  %v1859_v38 = vsel %vm1845_vm14, %v1856_v59, %v1858_v30  ;;  %v7584_v15 = vmul.u32.u64.low %v1860_v48, %v1855_v12  ;;  %v7585_v21 = vmul.u32.u64.high %v1860_v48, %v1855_v12, %v7584_v15 }
 0x210   :  { %v1681_v31 = vadd.s32 127, %v1680_v34  ;;  %v7591_v13 = vmul.u32.u64.low %v1860_v48, %v1859_v38  ;;  %v7592_v62 = vmul.u32.u64.high %v1860_v48, %v1859_v38, %v7591_v13  ;;  %v1572_v28 = vsub.s32 32, %v7553_v47 }
 0x211   :  { %v1660_v53 = vadd.s32 %v7453_v16, %v7461_v58  ;;  %v1851_v56 = vsel %vm1845_vm14, %v1848_v42, %v1850_v2  ;;  %vm1927_vm15 = vcmp.gt.s32.totalorder %v1926_v5, 0  ;;  %v1577_v30 = vadd.s32 127, %v1576_v17 }
 0x212   :  { %vm5732_vm0 = vcmp.lt.s32.totalorder %v5731_v60, 0  ;;  %v10366_v10 = vand.u32 2147483647, %v7528_v55  ;;  %v1928_v35 = vsel %vm1927_vm15, %v1926_v5, 0  ;;  %v7600_v54 = vor.u32 4788187, %v1474_v1 }
 0x213   :  { %v1678_v23 = vshrl.u32 %v1660_v53, %v1676_v24  ;;  %v1870_v38 = vadd.s32 1, %v7585_v21  ;;  %v1930_v34 = vand.u32 31, %v1928_v35  ;;  %v1682_v39 = vshll.u32 %v1681_v31, 23 }
 0x214   :  { %v1923_v14 = vand.u32 8388607, %v10366_v10  ;;  %v1867_v16 = vmul.u32 %v1860_v48, %v1851_v56  ;;  %vm1869_vm1 = vc.u32 %v7592_v62, %v7584_v15  ;;  %v1677_v58 = vshll.u32 %v7502_v6, %v7565_v7 }
 0x215   :  { %v7609_v9 = vsel %vm5732_vm0, 0, %v5731_v60  ;;  %v1871_v1 = vsel %vm1869_vm1, %v1870_v38, %v7585_v21  ;;  %v1931_v17 = vsub.s32 32, %v1930_v34  ;;  %v1574_v26 = vshrl.u32 %v7549_v33, %v1572_v28 }
 0x216   :  { %v1578_v44 = vshll.u32 %v1577_v30, 23  ;;  %v1872_v18 = vadd.s32 %v1871_v1, %v1867_v16  ;;  %v1924_v59 = vor.u32 8388608, %v1923_v14  ;;  %v1679_v12 = vor.u32 %v1678_v23, %v1677_v58 }
 0x217   :  { %v10367_v5 = vmov 2475754826   ;;  %v10368_v48 = vmov 2131351028   ;;  %v10369_v24 = vmov 2102212464  }
 0x218   :  { %v1934_v42 = vshrl.u32 %v10367_v5, %v1931_v17  ;;  %v1937_v2 = vshrl.u32 %v10368_v48, %v1931_v17  ;;  %v1940_v31 = vshrl.u32 %v10369_v24, %v1931_v17  ;;  %v1683_v13 = vor.u32 4788187, %v1682_v39 }
 0x219   :  { %v1784_v6 = vsub.s32 4294967266, %v7609_v9  ;;  %v1873_v7 = vadd.s32 536870912, %v1872_v18  ;;  %v10370_v60 = vmov 683565275   ;;  %v1936_v21 = vshll.u32 %v10367_v5, %v1930_v34 }
 0x21a   :  { %v1933_v53 = vshll.u32 %v10370_v60, %v1930_v34  ;;  %v1939_v33 = vshll.u32 %v10368_v48, %v1930_v34  ;;  %v1942_v28 = vshll.u32 %v10369_v24, %v1930_v34  ;;  %v10371_v56 = vmov 920167782  }
 0x21b   :  { %v1943_v30 = vshrl.u32 %v10371_v56, %v1931_v17  ;;  %v7622_v10 = vshrl.u32 %v1873_v7, 30  ;;  %v1929_v14 = vshrl.u32 %v1928_v35, 5  ;;  %v1945_v23 = vshll.u32 %v10371_v56, %v1930_v34 }
 0x21c   :  { %v10372_v38 = vmov 1326507024   ;;  %v1935_v16 = vor.u32 %v1934_v42, %v1933_v53  ;;  %v1938_v58 = vor.u32 %v1937_v2, %v1936_v21  ;;  %v1941_v1 = vor.u32 %v1940_v31, %v1939_v33 }
 0x21d   :  { %v1946_v39 = vshrl.u32 %v10372_v38, %v1931_v17  ;;  %v1944_v4 = vor.u32 %v1943_v30, %v1942_v28  ;;  %v7626_v55 = vor.u32 4788187, %v1578_v44  ;;  %v1785_v5 = vadd.s32 127, %v1784_v6 }
 0x21e   :  { %v1875_v48 = vshll.u32 %v7622_v10, 30  ;;  %v1684_v24 = vand.u32 2147483647, %v1683_v13  ;;  %v1686_v52 = vcvt.s32.f32 %v1679_v12  ;;  %v1764_v7 = vadd.s32 %v7508_v8, %v7514_v61 }
 0x21f   :  { %v1947_v37 = vor.u32 %v1946_v39, %v1945_v23  ;;  %v1964_v35 = vshll.u32 %v1924_v59, 8  ;;  %v1780_v34 = vsub.s32 32, %v7609_v9  ;;  %vm1948_vm2 = vcmp.lt.s32.totalorder %v1929_v14, 1 }
 0x220   :  { %v7632_v56 = vsub.s32 %v1872_v18, %v1875_v48  ;;  %vm1951_vm3 = vcmp.lt.s32.totalorder %v1929_v14, 4  ;;  %v1956_v42 = vsel %vm1948_vm2, %v1935_v16, %v1938_v58  ;;  %v1960_v2 = vsel %vm1948_vm2, %v1938_v58, %v1941_v1 }
 0x221   :  { %v1957_v44 = vsel %vm1951_vm3, %v1944_v4, 920167782  ;;  %v1961_v31 = vsel %vm1951_vm3, %v1947_v37, 1326507024  ;;  %v1786_v6 = vshll.u32 %v1785_v5, 23  ;;  %vm1950_vm4 = vcmp.lt.s32.totalorder %v1929_v14, 3 }
 0x222   :  { %v1878_v13 = vsub.s32 0, %v7632_v56  ;;  %v1953_v12 = vsel %vm1951_vm3, %v1941_v1, 2102212464  ;;  %v1932_v8 = vshrl.u32 %v10370_v60, %v1931_v17  ;;  %vm1949_vm5 = vcmp.lt.s32.totalorder %v1929_v14, 2 }
 0x223   :  { %v1958_v61 = vsel %vm1950_vm4, %v1941_v1, %v1957_v44  ;;  %v1962_v59 = vsel %vm1950_vm4, %v1944_v4, %v1961_v31  ;;  %v1782_v18 = vshrl.u32 %v1764_v7, %v1780_v34  ;;  %vm1606_vm6 = vcmp.lt.s32.totalorder %v7345_v51, 0 }
 0x224   :  { %v5734_v48 = vmin.u32 %v1878_v13, %v7632_v56  ;;  %v1959_v53 = vsel %vm1949_vm5, %v1956_v42, %v1958_v61  ;;  %v1963_v21 = vsel %vm1949_vm5, %v1960_v2, %v1962_v59  ;;  %v1952_v37 = vsel %vm1948_vm2, %v1932_v8, %v1935_v16 }
 0x225   :  { %v1954_v5 = vsel %vm1950_vm4, %v1938_v58, %v1953_v12  ;;  %v7643_v33 = vmul.u32.u64.low %v1964_v35, %v1963_v21  ;;  %v7644_v28 = vmul.u32.u64.high %v1964_v35, %v1963_v21, %v7643_v33  ;;  %v1687_v30 = vmul.f32 %v1686_v52, %v1684_v24 }
 0x226   :  { %v1880_v17 = vclz %v5734_v48  ;;  %v7646_v23 = vmul.u32.u64.low %v1964_v35, %v1959_v53  ;;  %v7647_v39 = vmul.u32.u64.high %v1964_v35, %v1959_v53, %v7646_v23  ;;  %v1469_v4 = vshll.u32 %v7429_v11, %v7523_v50 }
 0x227   :  { %v10373_v1 = vshll.u32 %v7476_v3, %v7553_v47  ;;  %v1781_v16 = vshll.u32 %v7570_v41, %v7609_v9  ;;  %v1787_v58 = vor.u32 4788187, %v1786_v6  ;;  %v10374_v34 = vsub.s32 32, %v7495_v49 }
 0x228   :  { %v10375_v24 = vshll.u32 %v7530_v0, 23  ;;  %v5735_v44 = vadd.s32 4294967294, %v1880_v17  ;;  %v1955_v2 = vsel %vm1949_vm5, %v1952_v37, %v1954_v5  ;;  %v1471_v11 = vor.u32 %v7589_v45, %v1469_v4 }
 0x229   :  { %v1575_v7 = vor.u32 %v1574_v26, %v10373_v1  ;;  %v1366_v52 = vshrl.u32 %v7520_v63, %v10374_v34  ;;  %v1580_v50 = vand.u32 2147483647, %v7626_v55  ;;  %v1783_v3 = vor.u32 %v1782_v18, %v1781_v16 }
 0x22a   :  { %v1371_v42 = vor.u32 4788187, %v10375_v24  ;;  %vm1973_vm7 = vc.u32 %v7644_v28, %v7646_v23  ;;  %vm1190_vm8 = vcmp.lt.s32.totalorder %v7080_v57, 0  ;;  %v1476_v47 = vand.u32 2147483647, %v7600_v54 }
 0x22b   :  { %v1688_v41 = vxor.u32 2147483648, %v1687_v30  ;;  %vm5736_vm9 = vcmp.lt.s32.totalorder %v5735_v44, 0  ;;  %v1974_v63 = vadd.s32 1, %v7647_v39  ;;  %v1582_v0 = vcvt.s32.f32 %v1575_v7 }
 0x22c   :  { %v1788_v9 = vand.u32 2147483647, %v1787_v58  ;;  %v1883_v26 = vsel %vm5736_vm9, 0, %v5735_v44  ;;  %v1971_v14 = vmul.u32 %v1964_v35, %v1955_v2  ;;  %v1868_v45 = vadd.s32 %v7584_v15, %v7592_v62 }
 0x22d   :  { %v1884_v55 = vsub.s32 32, %v1883_v26  ;;  %v1888_v31 = vsub.s32 4294967266, %v1883_v26  ;;  %v1975_v6 = vsel %vm1973_vm7, %v1974_v63, %v7647_v39  ;;  %v1478_v13 = vcvt.s32.f32 %v1471_v11 }
 0x22e   :  { %v1583_v12 = vmul.f32 %v1582_v0, %v1580_v50  ;;  %v1790_v8 = vcvt.s32.f32 %v1783_v3  ;;  %v1976_v61 = vadd.s32 %v1975_v6, %v1971_v14  ;;  %v10376_v54 = vand.u32 2147483647, %v7080_v57 }
 0x22f   :  { %v1689_v35 = vsel %vm1606_vm6, %v1688_v41, %v1687_v30  ;;  %v1885_v18 = vshll.u32 %v7632_v56, %v1883_v26  ;;  %v1886_v15 = vshrl.u32 %v1868_v45, %v1884_v55  ;;  %v1889_v62 = vadd.s32 127, %v1888_v31 }
 0x230   :  { %vm7675_vm10 = vcmp.le.f32.partialorder %v10376_v54, 0.7853982  ;;  %v1272_v48 = vxor.u32 2147483648, %v7538_v29  ;;  %v10379_v53 = vshll.u32 %v7398_v27, %v7495_v49  ;;  %v1791_v37 = vmul.f32 %v1790_v8, %v1788_v9 }
 0x231   :  { %v1977_v5 = vadd.s32 536870912, %v1976_v61  ;;  %v1479_v33 = vmul.f32 %v1478_v13, %v1476_v47  ;;  %v10380_v17 = vand.u32 2147483647, %v7345_v51  ;;  %v1887_v30 = vor.u32 %v1886_v15, %v1885_v18 }
 0x232   :  { %v1367_v21 = vor.u32 %v1366_v52, %v10379_v53  ;;  %v1890_v4 = vshll.u32 %v1889_v62, 23  ;;  %vm1398_vm12 = vcmp.lt.s32.totalorder %v7087_v32, 0  ;;  %v1584_v56 = vxor.u32 2147483648, %v1583_v12 }
 0x233   :  { %vm7688_vm11 = vcmp.le.f32.partialorder %v10380_v17, 0.7853982  ;;  %v7696_v27 = vshrl.u32 %v1977_v5, 30  ;;  %v1274_v49 = vsub.s32 4, %v7268_v46  ;;  %v1372_v7 = vand.u32 2147483647, %v1371_v42 }
 0x234   :  { %v1692_v1 = vsel %vm7688_vm11, %v7345_v51, %v1689_v35  ;;  %vm1502_vm13 = vcmp.lt.s32.totalorder %v7180_v20, 0  ;;  %v1891_v16 = vor.u32 4788187, %v1890_v4  ;;  %v1273_v58 = vsel %vm1190_vm8, %v1272_v48, %v7538_v29 }
 0x235   :  { %v1374_v34 = vcvt.s32.f32 %v1367_v21  ;;  %v10383_v52 = vand.u32 2147483647, %v7087_v32  ;;  %v1792_v44 = vxor.u32 2147483648, %v1791_v37  ;;  %v1979_v2 = vshll.u32 %v7696_v27, 30 }
 0x236   :  { %v1480_v11 = vxor.u32 2147483648, %v1479_v33  ;;  %6150 = vcosq.f32 %v1692_v1  ;;  %v1892_v42 = vand.u32 2147483647, %v1891_v16  ;;  %v1894_v50 = vcvt.s32.f32 %v1887_v30  ;;  %v10399_v16 = vld [vmem:[#allocation13_spill] sm:$0xff] }
 0x237   :  { %vm7705_vm14 = vcmp.le.f32.partialorder %v10383_v52, 0.7853982  ;;  %vm1294_vm15 = vcmp.lt.s32.totalorder %v7083_v36, 0  ;;  %v1585_v3 = vsel %vm1502_vm13, %v1584_v56, %v1583_v12  ;;  %v1690_v29 = vsub.s32 4, %v7497_v40 }
 0x238   :  { %6152 = vsinq.f32 %v1692_v1  ;;  %v7714_v47 = vsub.s32 %v1976_v61, %v1979_v2  ;;  %v1375_v41 = vmul.f32 %v1374_v34, %v1372_v7  ;;  %v10386_v63 = vand.u32 2147483647, %v7180_v20 }
 0x239   :  { %vm1710_vm1 = vcmp.lt.s32.totalorder %v7390_v22, 0  ;;  %v1895_v9 = vmul.f32 %v1894_v50, %v1892_v42  ;;  %v7726_v26 = vsel %vm1190_vm8, %v1274_v49, %v7268_v46  ;;  %v7731_v14 = vsel %vm7675_vm10, %v7080_v57, %v1273_v58  ;;  %v10398_v49 = vld [vmem:[#allocation5_spill] sm:$0xff] }
 0x23a   :  { %vm7718_vm0 = vcmp.le.f32.partialorder %v10386_v63, 0.7853982  ;;  %v1793_v45 = vsel %vm1710_vm1, %v1792_v44, %v1791_v37  ;;  %v1982_v55 = vsub.s32 0, %v7714_v47  ;;  %v10389_v6 = vand.u32 2147483647, %v7390_v22 }
 0x23b   :  { %v1588_v31 = vsel %vm7718_vm0, %v7180_v20, %v1585_v3  ;;  %vm1814_vm3 = vcmp.lt.s32.totalorder %v7480_v19, 0  ;;  %v1896_v46 = vxor.u32 2147483648, %v1895_v9  ;;  %v10392_v12 = vand.u32 2147483647, %v7083_v36 }
 0x23c   :  { %vm7741_vm2 = vcmp.le.f32.partialorder %v10389_v6, 0.7853982  ;;  %v1481_v61 = vsel %vm1398_vm12, %v1480_v11, %v1479_v33  ;;  %v1691_v54 = vsel %vm1606_vm6, %v1690_v29, %v7497_v40  ;;  %v1898_v35 = vsub.s32 4, %v7622_v10 }
 0x23d   :  { %vm7748_vm4 = vcmp.le.f32.partialorder %v10392_v12, 0.7853982  ;;  %v5738_v18 = vmin.u32 %v1982_v55, %v7714_v47  ;;  %6154 = vcosq.f32 %v7731_v14  ;;  %v1376_v15 = vxor.u32 2147483648, %v1375_v41 }
 0x23e   :  { %v1796_v62 = vsel %vm7741_vm2, %v7390_v22, %v1793_v45  ;;  %v1897_v48 = vsel %vm1814_vm3, %v1896_v46, %v1895_v9  ;;  %v1586_v53 = vsub.s32 4, %v7448_v25  ;;  %6156 = vcosq.f32 %v1588_v31 }
 0x23f   :  { %v10395_v21 = vand.u32 2147483647, %v7480_v19  ;;  %v1984_v37 = vclz %v5738_v18  ;;  %v1484_v5 = vsel %vm7705_vm14, %v7087_v32, %v1481_v61  ;;  %6158 = vsinq.f32 %v1588_v31 }
 0x240   :  { %v1693_v33 = vsel %vm7688_vm11, 0, %v1691_v54  ;;  %v1794_v17 = vsub.s32 4, %v7555_v43  ;;  %6160 = vcosq.f32 %v1796_v62  ;;  %v1899_v30 = vsel %vm1814_vm3, %v1898_v35, %v7622_v10 }
 0x241   :  { %vm7768_vm5 = vcmp.le.f32.partialorder %v10395_v21, 0.7853982  ;;  %v5739_v56 = vadd.s32 4294967294, %v1984_v37  ;;  %v1377_v1 = vsel %vm1294_vm15, %v1376_v15, %v1375_v41  ;;  %v1378_v7 = vsub.s32 4, %v10398_v49 }
 0x242   :  { %v1900_v4 = vsel %vm7768_vm5, %v7480_v19, %v1897_v48  ;;  %v1482_v39 = vsub.s32 4, %v10399_v16  ;;  %6162 = vsinq.f32 %v1796_v62  ;;  %v1587_v58 = vsel %vm1502_vm13, %v1586_v53, %v7448_v25 }
 0x243   :  { %6164 = vcosq.f32 %v1484_v5  ;;  %v1697_v34 = vadd.s32 3, %v1693_v33  ;;  %vm5740_vm6 = vcmp.lt.s32.totalorder %v5739_v56, 0  ;;  %v1795_v10 = vsel %vm1710_vm1, %v1794_v17, %v7555_v43  ;;  %v6151_v2 = vpop.eup %6150 }
 0x244   :  { %v1901_v52 = vsel %vm7768_vm5, 0, %v1899_v30  ;;  %6166 = vcosq.f32 %v1900_v4  ;;  %v1987_v44 = vsel %vm5740_vm6, 0, %v5739_v56  ;;  %v1972_v11 = vadd.s32 %v7646_v23, %v7644_v28  ;;  %v10400_v30 = vld [vmem:[#allocation6_spill] sm:$0xff] }
 0x245   :  { %6168 = vsinq.f32 %v1900_v4  ;;  %v1988_v42 = vsub.s32 32, %v1987_v44  ;;  %v1992_v50 = vsub.s32 4294967266, %v1987_v44  ;;  %v6153_v3 = vpop.eup %6152  ;;  %v1379_v25 = vsel %vm1294_vm15, %v1378_v7, %v10398_v49 }
 0x246   :  { %v1380_v43 = vsel %vm7748_vm4, %v7083_v36, %v1377_v1  ;;  %v1483_v29 = vsel %vm1398_vm12, %v1482_v39, %v10399_v16  ;;  %6170 = vsinq.f32 %v1484_v5  ;;  %v1797_v41 = vsel %vm7741_vm2, 0, %v1795_v10 }
 0x247   :  { %v1989_v28 = vshll.u32 %v7714_v47, %v1987_v44  ;;  %v1990_v23 = vshrl.u32 %v1972_v11, %v1988_v42  ;;  %v1993_v63 = vadd.s32 127, %v1992_v50  ;;  %v1589_v9 = vsel %vm7718_vm0, 0, %v1587_v58 }
 0x248   :  { %v1905_v45 = vadd.s32 3, %v1901_v52  ;;  %v1698_v55 = vand.u32 3, %v1697_v34  ;;  %v1701_v46 = vxor.u32 2147483648, %v6153_v3  ;;  %v1704_v12 = vxor.u32 2147483648, %v6151_v2 }
 0x249   :  { %v1991_v31 = vor.u32 %v1990_v23, %v1989_v28  ;;  %v1994_v6 = vshll.u32 %v1993_v63, 23  ;;  %v10208_v61 = vmov 0.0   ;;  %v1277_v47 = vsel %vm7675_vm10, 0, %v7726_v26 }
 0x24a   :  { %2117 = vmatprep.mubr.f32.mxu0 %v10208_v61  ;;  %2266 = vmatprep.mubr.f32.mxu1 %v10208_v61  ;;  %v1381_v13 = vsel %vm7748_vm4, 0, %v1379_v25  ;;  %6172 = vcosq.f32 %v1380_v43  ;;  %v1801_v0 = vadd.s32 3, %v1797_v41  ;;  %v7819_v54 = vpop.eup %6154  ;;  %v1485_v35 = vsel %vm7705_vm14, 0, %v1483_v29 }
 0x24b   :  { %6174 = vsinq.f32 %v1380_v43  ;;  %v1593_v18 = vadd.s32 3, %v1589_v9  ;;  %v1995_v15 = vor.u32 4788187, %v1994_v6  ;;  %v6157_v62 = vpop.eup %6156  ;;  %v7824_v48 = vand.u32 3, %v1905_v45 }
 0x24c   :  { %6176 = vsinq.f32 %v7731_v14  ;;  %vm1700_vm7 = vcmp.eq.s32.totalorder %v1698_v55, 0  ;;  %vm1703_vm8 = vcmp.eq.s32.totalorder %v1698_v55, 2  ;;  %v6159_v59 = vpop.eup %6158  ;;  %v1998_v8 = vcvt.s32.f32 %v1991_v31 }
 0x24d   :  { %v1996_v26 = vand.u32 2147483647, %v1995_v15  ;;  %v1702_v53 = vsel %vm1700_vm7, %v6151_v2, %v1701_v46  ;;  %v1705_v21 = vsel %vm1703_vm8, %v1704_v12, %v6153_v3  ;;  %v6161_v40 = vpop.eup %6160  ;;  %v7826_v37 = vadd.s32 3, %v1277_v47 }
 0x24e   :  { %v1385_v5 = vadd.s32 3, %v1381_v13  ;;  %v1489_v24 = vadd.s32 3, %v1485_v35  ;;  %v1802_v33 = vand.u32 3, %v1801_v0  ;;  %vm1918_vm9 = vcmp.lt.s32.totalorder %v10400_v30, 0  ;;  %v2020_v35 = vld [vmem:[%s10090_s3] sm:$0xff] }
 0x24f   :  { %v6163_v17 = vpop.eup %6162  ;;  %v1999_v4 = vmul.f32 %v1998_v8, %v1996_v26  ;;  %vm1699_vm10 = vcmp.lt.s32.totalorder %v1698_v55, 2  ;;  %v1594_v14 = vand.u32 3, %v1593_v18  ;;  %v10401_v1 = vand.u32 2147483647, %v10400_v30 }
 0x250   :  { %v6165_v56 = vpop.eup %6164  ;;  %v2002_v7 = vsub.s32 4, %v7696_v27  ;;  %v1706_v16 = vsel %vm1699_vm10, %v1702_v53, %v1705_v21  ;;  %v1597_v39 = vxor.u32 2147483648, %v6159_v59  ;;  %vm1908_vm12 = vcmp.eq.s32.totalorder %v7824_v48, 0 }
 0x251   :  { %vm7831_vm11 = vcmp.le.f32.partialorder %v10401_v1, 0.7853982  ;;  %v6167_v58 = vpop.eup %6166  ;;  %v2000_v34 = vxor.u32 2147483648, %v1999_v4  ;;  %vm1911_vm13 = vcmp.eq.s32.totalorder %v7824_v48, 2  ;;  %v1600_v10 = vxor.u32 2147483648, %v6157_v62 }
 0x252   :  { %v6169_v52 = vpop.eup %6168  ;;  %vm1804_vm14 = vcmp.eq.s32.totalorder %v1802_v33, 0  ;;  %v1805_v44 = vxor.u32 2147483648, %v6163_v17  ;;  %v1808_v2 = vxor.u32 2147483648, %v6161_v40  ;;  %vm1696_vm15 = vweird.f32 %v7345_v51 }
 0x253   :  { %v6171_v11 = vpop.eup %6170  ;;  %v2001_v42 = vsel %vm1918_vm9, %v2000_v34, %v1999_v4  ;;  %vm1907_vm0 = vcmp.lt.s32.totalorder %v7824_v48, 2  ;;  %vm1807_vm1 = vcmp.eq.s32.totalorder %v1802_v33, 2  ;;  %v7842_v50 = vsel %vm1696_vm15, nan, %v1706_v16 }
 0x254   :  { %vm1596_vm2 = vcmp.eq.s32.totalorder %v1594_v14, 0  ;;  %v2003_v3 = vsel %vm1918_vm9, %v2002_v7, %v7696_v27  ;;  %v2004_v25 = vsel %vm7831_vm11, %v10400_v30, %v2001_v42  ;;  %vm1800_vm3 = vweird.f32 %v7390_v22 }
 0x255   :  { %v1598_v51 = vsel %vm1596_vm2, %v6157_v62, %v1597_v39  ;;  %vm1599_vm4 = vcmp.eq.s32.totalorder %v1594_v14, 2  ;;  %6178 = vcosq.f32 %v2004_v25  ;;  %v1909_v43 = vxor.u32 2147483648, %v6169_v52 }
 0x256   :  { %v1912_v29 = vxor.u32 2147483648, %v6167_v58  ;;  %v1601_v41 = vsel %vm1599_vm4, %v1600_v10, %v6159_v59  ;;  %6180 = vsinq.f32 %v2004_v25  ;;  %vm1904_vm5 = vweird.f32 %v7480_v19 }
 0x257   :  { %v1806_v28 = vsel %vm1804_vm14, %v6161_v40, %v1805_v44  ;;  %v1809_v23 = vsel %vm1807_vm1, %v1808_v2, %v6163_v17  ;;  %v1490_v63 = vand.u32 3, %v1489_v24  ;;  %v6173_v27 = vpop.eup %6172  ;;  %v2005_v9 = vsel %vm7831_vm11, 0, %v2003_v3 }
 0x258   :  { %vm1595_vm6 = vcmp.lt.s32.totalorder %v1594_v14, 2  ;;  %v1493_v45 = vxor.u32 2147483648, %v6171_v11  ;;  %v1496_v55 = vxor.u32 2147483648, %v6165_v56  ;;  %v6175_v31 = vpop.eup %6174  ;;  %vm1803_vm7 = vcmp.lt.s32.totalorder %v1802_v33, 2 }
 0x259   :  { %v7856_v6 = vand.u32 4294901760, %v7842_v50  ;;  %vm1592_vm8 = vweird.f32 %v7180_v20  ;;  %v1602_v46 = vsel %vm1595_vm6, %v1598_v51, %v1601_v41  ;;  %v6177_v12 = vpop.eup %6176  ;;  %v1910_v47 = vsel %vm1908_vm12, %v6167_v58, %v1909_v43  ;;  %v2021_v20 = vld [vmem:[%s10090_s3 + $0x8] sm:$0xff] }
 0x25a   :  { %v1913_v13 = vsel %vm1911_vm13, %v1912_v29, %v6169_v52  ;;  %v1810_v0 = vsel %vm1803_vm7, %v1806_v28, %v1809_v23  ;;  %vm1488_vm9 = vweird.f32 %v7087_v32  ;;  %vm2032_vm10 = vcmask 261120  }
 0x25b   :  { %v2009_v18 = vadd.s32 3, %v2005_v9  ;;  %vm1492_vm11 = vcmp.eq.s32.totalorder %v1490_v63, 0  ;;  %vm1495_vm14 = vcmp.eq.s32.totalorder %v1490_v63, 2  ;;  %v1386_v15 = vand.u32 3, %v1385_v5 }
 0x25c   :  { %v1494_v62 = vsel %vm1492_vm11, %v6165_v56, %v1493_v45  ;;  %v1497_v59 = vsel %vm1495_vm14, %v1496_v55, %v6171_v11  ;;  %v1389_v26 = vxor.u32 2147483648, %v6175_v31  ;;  %v1392_v8 = vxor.u32 2147483648, %v6173_v27 }
 0x25d   :  { %v1914_v53 = vsel %vm1907_vm0, %v1910_v47, %v1913_v13  ;;  %v1603_v21 = vsel %vm1592_vm8, nan, %v1602_v46  ;;  %v1282_v40 = vand.u32 3, %v7826_v37  ;;  %v2034_v24 = vsel %vm2032_vm10, %v2020_v35, 0 }
 0x25e   :  { %v1811_v33 = vsel %vm1800_vm3, nan, %v1810_v0  ;;  %vm1491_vm12 = vcmp.lt.s32.totalorder %v1490_v63, 2  ;;  %v1285_v17 = vxor.u32 2147483648, %v6177_v12  ;;  %v1288_v5 = vxor.u32 2147483648, %v7819_v54 }
 0x25f   :  { %v2010_v4 = vand.u32 3, %v2009_v18  ;;  %v1498_v14 = vsel %vm1491_vm12, %v1494_v62, %v1497_v59  ;;  %vm1388_vm13 = vcmp.eq.s32.totalorder %v1386_v15, 0  ;;  %vm1391_vm15 = vcmp.eq.s32.totalorder %v1386_v15, 2 }
 0x260   :  { %vm2008_vm0 = vweird.f32 %v10400_v30  ;;  %v1915_v48 = vsel %vm1904_vm5, nan, %v1914_v53  ;;  %v1390_v37 = vsel %vm1388_vm13, %v6173_v27, %v1389_v26  ;;  %v1393_v22 = vsel %vm1391_vm15, %v1392_v8, %v6175_v31  ;;  %v2023_v27 = vld [vmem:[%s10090_s3 + $0x18] sm:$0xff] }
 0x261   :  { %v7882_v56 = vand.u32 4294901760, %v2034_v24  ;;  %v7884_v1 = vand.u32 4294901760, %v1811_v33  ;;  %v7886_v49 = vand.u32 4294901760, %v1603_v21  ;;  %vm1284_vm1 = vcmp.eq.s32.totalorder %v1282_v40, 0 }
 0x262   :  { %vm1287_vm2 = vcmp.eq.s32.totalorder %v1282_v40, 2  ;;  %vm1387_vm3 = vcmp.lt.s32.totalorder %v1386_v15, 2  ;;  %v1286_v7 = vsel %vm1284_vm1, %v7819_v54, %v1285_v17  ;;  %v2037_v39 = vsel %vm2032_vm10, %v2021_v20, 0  ;;  %v6179_v58 = vpop.eup %6178  ;;  %v2022_v54 = vld [vmem:[%s10090_s3 + $0x10] sm:$0xff] }
 0x263   :  { %v1289_v16 = vsel %vm1287_vm2, %v1288_v5, %v6177_v12  ;;  %v7890_v34 = vand.u32 4294901760, %v1915_v48  ;;  %v1499_v19 = vsel %vm1488_vm9, nan, %v1498_v14  ;;  %vm1384_vm4 = vweird.f32 %v7083_v36  ;;  %v6181_v52 = vpop.eup %6180 }
 0x264   :  { %v1394_v10 = vsel %vm1387_vm3, %v1390_v37, %v1393_v22  ;;  %vm2011_vm5 = vcmp.lt.s32.totalorder %v2010_v4, 2  ;;  %v2016_v44 = vxor.u32 2147483648, %v6179_v58  ;;  %vm1283_vm6 = vcmp.lt.s32.totalorder %v1282_v40, 2 }
 0x265   :  { %v7896_v2 = vsub.f32 %v2034_v24, %v7882_v56  ;;  %v2013_v11 = vxor.u32 2147483648, %v6181_v52  ;;  %vm2015_vm7 = vcmp.eq.s32.totalorder %v2010_v4, 2  ;;  %v1290_v42 = vsel %vm1283_vm6, %v1286_v7, %v1289_v16 }
 0x266   :  { %v7901_v3 = vand.u32 4294901760, %v2037_v39  ;;  %vm2012_vm8 = vcmp.eq.s32.totalorder %v2010_v4, 0  ;;  %v2017_v32 = vsel %vm2015_vm7, %v2016_v44, %v6181_v52  ;;  %v7903_v36 = vand.u32 4294901760, %v1499_v19 }
 0x267   :  { %v1395_v25 = vsel %vm1384_vm4, nan, %v1394_v10  ;;  %v2014_v51 = vsel %vm2012_vm8, %v6179_v58, %v2013_v11  ;;  %v7906_v43 = vsub.f32 %v1915_v48, %v7890_v34  ;;  %vm1280_vm9 = vweird.f32 %v7080_v57 }
 0x268   :  { %v2040_v29 = vsel %vm2032_vm10, %v2022_v54, 0  ;;  %v2018_v41 = vsel %vm2011_vm5, %v2014_v51, %v2017_v32  ;;  %v1291_v28 = vsel %vm1280_vm9, nan, %v1290_v42  ;;  %v2120_v23 = vand.u32 4294901760, %v7896_v2 }
 0x269   :  { %v7913_v63 = vsub.f32 %v1811_v33, %v7884_v1  ;;  %v2019_v9 = vsel %vm2008_vm0, nan, %v2018_v41  ;;  %v7920_v45 = vand.u32 4294901760, %v1395_v25  ;;  %v7923_v57 = vsub.f32 %v2037_v39, %v7901_v3 }
 0x26a   :  { %v7925_v55 = vand.u32 4294901760, %v2019_v9  ;;  %v7929_v31 = vsub.f32 %v7842_v50, %v7856_v6  ;;  %v7931_v46 = vand.u32 4294901760, %v2040_v29  ;;  %v7933_v12 = vand.u32 4294901760, %v1291_v28 }
 0x26b   :  { %v2194_v47 = vand.u32 4294901760, %v7906_v43  ;;  %v7937_v30 = vsub.f32 %v1603_v21, %v7886_v49  ;;  %v2043_v13 = vsel %vm2032_vm10, %v2023_v27, 0  ;;  %v7942_v0 = vsub.f32 %v1499_v19, %v7903_v36 }
 0x26c   :  { %2070 = vmatprep.subr.mxu0 %v7925_v55  ;;  %v2121_v50 = vsub.f32 %v7896_v2, %v2120_v23  ;;  %v7948_v35 = vsub.f32 %v2019_v9, %v7925_v55  ;;  %v2200_v18 = vand.u32 4294901760, %v7913_v63  ;;  %v2131_v15 = vand.u32 4294901760, %v7923_v57 }
 0x26d   :  { %2072 = vmatpush1.msra.mxu0 %v7890_v34  ;;  %v7954_v62 = vsub.f32 %v1395_v25, %v7920_v45  ;;  %v2206_v26 = vand.u32 4294901760, %v7929_v31  ;;  %v7960_v8 = vsub.f32 %v2040_v29, %v7931_v46  ;;  %v7962_v53 = vand.u32 4294901760, %v2043_v13 }
 0x26e   :  { %2074 = vmatprep.subr.mxu0 %v7884_v1  ;;  %v2188_v59 = vand.u32 4294901760, %v7948_v35  ;;  %v7966_v21 = vsub.f32 %v1291_v28, %v7933_v12  ;;  %v2195_v40 = vsub.f32 %v7906_v43, %v2194_v47  ;;  %v2212_v24 = vand.u32 4294901760, %v7937_v30 }
 0x26f   :  { %2076 = vmatpush1.msra.mxu0 %v7856_v6  ;;  %v2122_v33 = vand.u32 4294901760, %v2121_v50  ;;  %v2201_v5 = vsub.f32 %v7913_v63, %v2200_v18  ;;  %v2218_v4 = vand.u32 4294901760, %v7942_v0  ;;  %v2132_v14 = vsub.f32 %v7923_v57, %v2131_v15 }
 0x270   :  { %2078 = vmatprep.subr.mxu0 %v7886_v49  ;;  %v2189_v17 = vsub.f32 %v7948_v35, %v2188_v59  ;;  %v2224_v20 = vand.u32 4294901760, %v7954_v62  ;;  %v2207_v37 = vsub.f32 %v7929_v31, %v2206_v26  ;;  %v2142_v22 = vand.u32 4294901760, %v7960_v8 }
 0x271   :  { %2080 = vmatpush1.msra.mxu0 %v7903_v36  ;;  %v7989_v7 = vsub.f32 %v2043_v13, %v7962_v53  ;;  %v2196_v16 = vand.u32 4294901760, %v2195_v40  ;;  %v2213_v39 = vsub.f32 %v7937_v30, %v2212_v24  ;;  %v2230_v58 = vand.u32 4294901760, %v7966_v21 }
 0x272   :  { %2082 = vmatprep.subr.mxu0 %v7920_v45  ;;  %v2190_v48 = vand.u32 4294901760, %v2189_v17  ;;  %v2202_v19 = vand.u32 4294901760, %v2201_v5  ;;  %v2219_v10 = vsub.f32 %v7942_v0, %v2218_v4  ;;  %v2133_v52 = vand.u32 4294901760, %v2132_v14 }
 0x273   :  { %2084 = vmatpush1.msra.mxu0 %v7933_v12  ;;  %v2225_v44 = vsub.f32 %v7954_v62, %v2224_v20  ;;  %v2208_v54 = vand.u32 4294901760, %v2207_v37  ;;  %v2143_v11 = vsub.f32 %v7960_v8, %v2142_v22  ;;  %v2153_v42 = vand.u32 4294901760, %v7989_v7 }
 0x274   :  { %2123 = vmatmul.mubr.f32.vlgmr.msra.gmra.mxu0 %v2122_v33  ;;  %2191 = vmatprep.subr.mxu1 %v2190_v48  ;;  %v2214_v32 = vand.u32 4294901760, %v2213_v39  ;;  %v2231_v25 = vsub.f32 %v7966_v21, %v2230_v58  ;;  %v2220_v51 = vand.u32 4294901760, %v2219_v10 }
 0x275   :  { %2321 = vmatprep.subr.mxu0 %v7948_v35  ;;  %2197 = vmatpush1.msra.mxu1 %v2196_v16  ;;  %v2226_v29 = vand.u32 4294901760, %v2225_v44  ;;  %v2144_v41 = vand.u32 4294901760, %v2143_v11  ;;  %v2154_v28 = vsub.f32 %v7989_v7, %v2153_v42 }
 0x276   :  { %2324 = vmatpush1.msra.mxu0 %v7906_v43  ;;  %2203 = vmatprep.subr.mxu1 %v2202_v19  ;;  %v2232_v27 = vand.u32 4294901760, %v2231_v25 }
 0x277   :  { %2327 = vmatprep.subr.mxu0 %v7913_v63  ;;  %2128 = vmatprep.mubr.f32.mxu0 %v10208_v61  ;;  %v2155_v9 = vand.u32 4294901760, %v2154_v28 }
 0x278   :  { %2209 = vmatpush1.msra.mxu1 %v2208_v54  ;;  %2330 = vmatpush1.msra.mxu0 %v7929_v31 }
 0x279   :  { %2134 = vmatmul.mubr.f32.gmra.mxu0 %v2133_v52  ;;  %2215 = vmatprep.subr.mxu1 %v2214_v32 }
 0x27a   :  { %2333 = vmatprep.subr.mxu0 %v7937_v30  ;;  %2221 = vmatpush1.msra.mxu1 %v2220_v51 }
 0x27b   :  { %2336 = vmatpush1.msra.mxu0 %v7942_v0  ;;  %2227 = vmatprep.subr.mxu1 %v2226_v29 }
 0x27c   :  { %2339 = vmatprep.subr.mxu0 %v7954_v62  ;;  %2139 = vmatprep.mubr.f32.mxu0 %v10208_v61 }
 0x27d   :  { %2233 = vmatpush1.msra.mxu1 %v2232_v27  ;;  %2342 = vmatpush1.msra.mxu0 %v7966_v21 }
 0x27e   :  { %2145 = vmatmul.mubr.f32.gmra.mxu0 %v2144_v41  ;;  %2268 = vmatmul.mubr.f32.vlgmr.msra.gmra.mxu1 %v7882_v56 }
 0x27f   :  { %2433 = vmatprep.subr.mxu1 %v7925_v55  ;;  %2544 = vmatprep.subr.mxu0 %v2188_v59 }
 0x280   :  { %2435 = vmatpush1.msra.mxu1 %v7890_v34  ;;  %2150 = vmatprep.mubr.f32.mxu0 %v10208_v61 }
 0x281   :  { %2437 = vmatprep.subr.mxu1 %v7884_v1  ;;  %2273 = vmatprep.mubr.f32.mxu1 %v10208_v61 }
 0x282   :  { %2439 = vmatpush1.msra.mxu1 %v7856_v6  ;;  %2156 = vmatmul.mubr.f32.gmra.mxu0 %v2155_v9 }
 0x283   :  { %2275 = vmatmul.mubr.f32.gmra.mxu1 %v7901_v3  ;;  %2441 = vmatprep.subr.mxu1 %v7886_v49 }
 0x284   :  { %2443 = vmatpush1.msra.mxu1 %v7903_v36  ;;  %2280 = vmatprep.mubr.f32.mxu1 %v10208_v61 }
 0x285   :  { %2445 = vmatprep.subr.mxu1 %v7920_v45  ;;  %2375 = vmatprep.mubr.f32.mxu0 %v10208_v61 }
 0x286   :  { %2447 = vmatpush1.msra.mxu1 %v7933_v12  ;;  %2378 = vmatmul.mubr.f32.vlgmr.msra.gmra.mxu0 %v7896_v2 }
 0x287   :  { %2282 = vmatmul.mubr.f32.gmra.mxu1 %v7931_v46  ;;  %2548 = vmatpush1.msra.mxu0 %v2194_v47 }
 0x288   :  { %2659 = vmatprep.subr.mxu1 %v7925_v55  ;;  %2552 = vmatprep.subr.mxu0 %v2200_v18 }
 0x289   :  { %2556 = vmatpush1.msra.mxu0 %v2206_v26  ;;  %2287 = vmatprep.mubr.f32.mxu1 %v10208_v61 }
 0x28a   :  { %2383 = vmatprep.mubr.f32.mxu0 %v10208_v61  ;;  %2560 = vmatprep.subr.mxu0 %v2212_v24 }
 0x28b   :  { %2289 = vmatmul.mubr.f32.gmra.mxu1 %v7962_v53  ;;  %2386 = vmatmul.mubr.f32.gmra.mxu0 %v7923_v57 }
 0x28c   :  { %2564 = vmatpush1.msra.mxu0 %v2218_v4  ;;  %2391 = vmatprep.mubr.f32.mxu0 %v10208_v61 }
 0x28d   :  { %2568 = vmatprep.subr.mxu0 %v2224_v20  ;;  %2480 = vmatprep.mubr.f32.mxu1 %v10208_v61 }
 0x28e   :  { %2572 = vmatpush1.msra.mxu0 %v2230_v58  ;;  %v2026_v58 = vld [vmem:[%s10091_s4 + $0x10] sm:$0xff] }
 0x28f   :  { %2394 = vmatmul.mubr.f32.gmra.mxu0 %v7960_v8  ;;  %2484 = vmatmul.mubr.f32.vlgmr.msra.gmra.mxu1 %v2120_v23  ;;  %v2025_v8 = vld [vmem:[%s10091_s4 + $0x8] sm:$0xff] }
 0x290   :  { %2661 = vmatpush1.msra.mxu1 %v7890_v34  ;;  %2399 = vmatprep.mubr.f32.mxu0 %v10208_v61 }
 0x291   :  { %2663 = vmatprep.subr.mxu1 %v7884_v1  ;;  %2489 = vmatprep.mubr.f32.mxu1 %v10208_v61 }
 0x292   :  { %2665 = vmatpush1.msra.mxu1 %v7856_v6 }
 0x293   :  { %2667 = vmatprep.subr.mxu1 %v7886_v49  ;;  %2402 = vmatmul.mubr.f32.gmra.mxu0 %v7989_v7 }
 0x294   :  { %2493 = vmatmul.mubr.f32.gmra.mxu1 %v2131_v15  ;;  %2605 = vmatprep.mubr.f32.mxu0 %v10208_v61  ;;  %v2024_v15 = vld [vmem:[%s10091_s4] sm:$0xff] }
 0x295   :  { %2669 = vmatpush1.msra.mxu1 %v7903_v36  ;;  %2498 = vmatprep.mubr.f32.mxu1 %v10208_v61 }
 0x296   :  { %2671 = vmatprep.subr.mxu1 %v7920_v45 }
 0x297   :  { %2673 = vmatpush1.msra.mxu1 %v7933_v12  ;;  %2607 = vmatmul.mubr.f32.vlgmr.msra.gmra.mxu0 %v7882_v56 }
 0x298   :  { %2502 = vmatmul.mubr.f32.gmra.mxu1 %v2142_v22  ;;  %2612 = vmatprep.mubr.f32.mxu0 %v10208_v61 }
 0x299   :  { %2507 = vmatprep.mubr.f32.mxu1 %v10208_v61 }
 0x29b   :  { %2614 = vmatmul.mubr.f32.gmra.mxu0 %v7901_v3 }
 0x29c   :  { %2511 = vmatmul.mubr.f32.gmra.mxu1 %v2153_v42  ;;  %2619 = vmatprep.mubr.f32.mxu0 %v10208_v61 }
 0x29d   :  { %2706 = vmatprep.mubr.f32.mxu1 %v10208_v61 }
 0x29f   :  { %2621 = vmatmul.mubr.f32.gmra.mxu0 %v7931_v46 }
 0x2a0   :  { %2708 = vmatmul.mubr.f32.vlgmr.msra.gmra.mxu1 %v7882_v56  ;;  %2626 = vmatprep.mubr.f32.mxu0 %v10208_v61 }
 0x2a1   :  { %2713 = vmatprep.mubr.f32.mxu1 %v10208_v61 }
 0x2a3   :  { %2628 = vmatmul.mubr.f32.gmra.mxu0 %v7962_v53 }
 0x2a4   :  { %2715 = vmatmul.mubr.f32.gmra.mxu1 %v7901_v3  ;;  %3663 = vmatprep.mubr.f32.mxu0 %v10208_v61 }
 0x2a5   :  { %2720 = vmatprep.mubr.f32.mxu1 %v10208_v61 }
 0x2a8   :  { %2722 = vmatmul.mubr.f32.gmra.mxu1 %v7931_v46 }
 0x2a9   :  { %2727 = vmatprep.mubr.f32.mxu1 %v10208_v61 }
 0x2ac   :  { %2729 = vmatmul.mubr.f32.gmra.mxu1 %v7962_v53 }
 0x2ad   :  { %3812 = vmatprep.mubr.f32.mxu1 %v10208_v61 }
 0x334   :  { %v2124_v6 = vpop.f32.mrf.mxu0 }
 0x335   :  { %v2125_v26 = vadd.f32 %v2124_v6, %v2024_v15 }
 0x336   :  { %v2126_v56 = vpop.f32.mrf.mxu0 }
 0x337   :  { %v2127_v24 = vadd.f32 %v2126_v56, %v2025_v8  ;;  %v10404_v8 = vmov 2475754826  }
 0x339   :  { %v2135_v1 = vpop.f32.mrf.mxu0 }
 0x33a   :  { %v2136_v54 = vadd.f32 %v2135_v1, %v2026_v58 }
 0x33b   :  { %v8098_v49 = vpop.f32.mrf.mxu0 }
 0x33e   :  { %v8100_v34 = vpop.f32.mrf.mxu0  ;;  %v2269_v2 = vpop.f32.mrf.mxu1 }
 0x33f   :  { %v2270_v33 = vadd.f32 %v2269_v2, %v2125_v26 }
 0x340   :  { %v8102_v3 = vpop.f32.mrf.mxu0  ;;  %v2271_v36 = vpop.f32.mrf.mxu1 }
 0x341   :  { %v2272_v4 = vadd.f32 %v2271_v36, %v2127_v24 }
 0x342   :  { %v8104_v43 = vpop.f32.mrf.mxu0 }
 0x343   :  { %v2276_v23 = vpop.f32.mrf.mxu1 }
 0x344   :  { %v8106_v63 = vpop.f32.mrf.mxu0  ;;  %v2277_v51 = vadd.f32 %v2276_v23, %v2136_v54 }
 0x345   :  { %v8108_v45 = vpop.f32.mrf.mxu1 }
 0x346   :  { %v2379_v57 = vpop.f32.mrf.mxu0 }
 0x347   :  { %v8110_v55 = vpop.f32.mrf.mxu1  ;;  %v2380_v14 = vadd.f32 %v2379_v57, %v2270_v33  ;;  %v10405_v33 = vmov 2131351028  }
 0x348   :  { %v2381_v31 = vpop.f32.mrf.mxu0 }
 0x349   :  { %v8112_v46 = vpop.f32.mrf.mxu1  ;;  %v2382_v48 = vadd.f32 %v2381_v31, %v2272_v4 }
 0x34b   :  { %v8114_v12 = vpop.f32.mrf.mxu1  ;;  %v2387_v47 = vpop.f32.mrf.mxu0 }
 0x34c   :  { %v2388_v28 = vadd.f32 %v2387_v47, %v2277_v51 }
 0x34d   :  { %v8116_v30 = vpop.f32.mrf.mxu1  ;;  %v8118_v13 = vpop.f32.mrf.mxu0 }
 0x34f   :  { %v8120_v0 = vpop.f32.mrf.mxu0  ;;  %v2485_v50 = vpop.f32.mrf.mxu1 }
 0x350   :  { %v2486_v37 = vadd.f32 %v2485_v50, %v2380_v14  ;;  %v10406_v14 = vmov 2102212464  }
 0x351   :  { %v8122_v35 = vpop.f32.mrf.mxu0  ;;  %v2487_v18 = vpop.f32.mrf.mxu1 }
 0x352   :  { %v2488_v16 = vadd.f32 %v2487_v18, %v2382_v48 }
 0x353   :  { %v8127_v62 = vpop.f32.mrf.mxu0 }
 0x354   :  { %v2494_v59 = vpop.f32.mrf.mxu1 }
 0x355   :  { %v8132_v53 = vpop.f32.mrf.mxu0  ;;  %v2495_v56 = vadd.f32 %v2494_v59, %v2388_v28 }
 0x356   :  { %v8134_v21 = vpop.f32.mrf.mxu1 }
 0x357   :  { %v2608_v17 = vpop.f32.mrf.mxu0 }
 0x358   :  { %v8136_v40 = vpop.f32.mrf.mxu1  ;;  %v2609_v39 = vadd.f32 %v2608_v17, %v2486_v37 }
 0x359   :  { %v2610_v22 = vpop.f32.mrf.mxu0 }
 0x35a   :  { %v8138_v5 = vpop.f32.mrf.mxu1  ;;  %v2611_v10 = vadd.f32 %v2610_v22, %v2488_v16  ;;  %v10407_v22 = vmov 920167782  }
 0x35b   :  { %v2615_v9 = vpop.f32.mrf.mxu0 }
 0x35c   :  { %v8140_v20 = vpop.f32.mrf.mxu1  ;;  %v2616_v31 = vadd.f32 %v2615_v9, %v2495_v56 }
 0x35e   :  { %v8142_v7 = vpop.f32.mrf.mxu1 }
 0x360   :  { %v2709_v19 = vpop.f32.mrf.mxu1 }
 0x361   :  { %v8147_v52 = vadd.f32 %v2709_v19, %v2609_v39 }
 0x362   :  { %v2711_v44 = vpop.f32.mrf.mxu1 }
 0x363   :  { %v2738_v11 = vand.u32 2139095040, %v8147_v52  ;;  %v8150_v42 = vadd.f32 %v2711_v44, %v2611_v10  ;;  %v10214_v2 = vand.u32 2147483647, %v8147_v52 }
 0x364   :  { %v2716_v57 = vpop.f32.mrf.mxu1 }
 0x365   :  { %v2739_v32 = vshrl.u32 %v2738_v11, 23  ;;  %v2842_v25 = vand.u32 2139095040, %v8150_v42  ;;  %v2742_v18 = vand.u32 8388607, %v10214_v2  ;;  %v8156_v23 = vadd.f32 %v2716_v57, %v2616_v31  ;;  %v2027_v11 = vld [vmem:[%s10091_s4 + $0x18] sm:$0xff] }
 0x367   :  { %v5741_v29 = vadd.s32 4294967169, %v2739_v32  ;;  %v2843_v41 = vshrl.u32 %v2842_v25, 23  ;;  %v2743_v32 = vor.u32 8388608, %v2742_v18 }
 0x369   :  { %v2745_v27 = vadd.s32 1, %v5741_v29  ;;  %v5745_v6 = vadd.s32 4294967169, %v2843_v41  ;;  %v2946_v29 = vand.u32 2139095040, %v8156_v23  ;;  %v2783_v18 = vshll.u32 %v2743_v32, 8 }
 0x36b   :  { %vm2746_vm11 = vcmp.gt.s32.totalorder %v2745_v27, 0  ;;  %v2849_v1 = vadd.s32 1, %v5745_v6  ;;  %v2138_v6 = vadd.f32 %v8098_v49, %v2027_v11  ;;  %v10210_v11 = vand.u32 2147483647, %v8150_v42 }
 0x36c   :  { %v2747_v36 = vsel %vm2746_vm11, %v2745_v27, 0 }
 0x36d   :  { %v2749_v50 = vand.u32 31, %v2747_v36  ;;  %v8158_v26 = vshrl.u32 %v2747_v36, 5  ;;  %vm2850_vm14 = vcmp.gt.s32.totalorder %v2849_v1, 0  ;;  %v2279_v57 = vadd.f32 %v8108_v45, %v2138_v6 }
 0x36e   :  { %v2851_v54 = vsel %vm2850_vm14, %v2849_v1, 0 }
 0x36f   :  { %v2750_v15 = vsub.s32 32, %v2749_v50  ;;  %v2752_v47 = vshll.u32 %v10370_v60, %v2749_v50  ;;  %v2755_v59 = vshll.u32 %v10404_v8, %v2749_v50  ;;  %v2758_v4 = vshll.u32 %v10405_v33, %v2749_v50 }
 0x370   :  { %v2761_v37 = vshll.u32 %v10406_v14, %v2749_v50  ;;  %v2764_v39 = vshll.u32 %v10407_v22, %v2749_v50  ;;  %vm2767_vm12 = vcmp.lt.s32.totalorder %v8158_v26, 1  ;;  %vm2769_vm13 = vcmp.lt.s32.totalorder %v8158_v26, 3 }
 0x371   :  { %v2753_v24 = vshrl.u32 %v10404_v8, %v2750_v15  ;;  %v2756_v17 = vshrl.u32 %v10405_v33, %v2750_v15  ;;  %v2759_v48 = vshrl.u32 %v10406_v14, %v2750_v15  ;;  %v2762_v16 = vshrl.u32 %v10407_v22, %v2750_v15 }
 0x372   :  { %v2765_v58 = vshrl.u32 %v10372_v38, %v2750_v15  ;;  %vm2770_vm15 = vcmp.lt.s32.totalorder %v8158_v26, 4  ;;  %v2853_v9 = vand.u32 31, %v2851_v54  ;;  %vm2768_vm0 = vcmp.lt.s32.totalorder %v8158_v26, 2 }
 0x373   :  { %v2754_v19 = vor.u32 %v2753_v24, %v2752_v47  ;;  %v2757_v10 = vor.u32 %v2756_v17, %v2755_v59  ;;  %v2760_v44 = vor.u32 %v2759_v48, %v2758_v4  ;;  %v2763_v25 = vor.u32 %v2762_v16, %v2761_v37  ;;  %v2617_v24 = vpop.f32.mrf.mxu0 }
 0x374   :  { %v2766_v51 = vor.u32 %v2765_v58, %v2764_v39  ;;  %v2947_v50 = vshrl.u32 %v2946_v29, 23  ;;  %v8196_v47 = vsub.s32 32, %v2853_v9  ;;  %v2390_v59 = vadd.f32 %v8118_v13, %v2279_v57 }
 0x375   :  { %v2775_v41 = vsel %vm2767_vm12, %v2754_v19, %v2757_v10  ;;  %v2776_v28 = vsel %vm2770_vm15, %v2763_v25, 920167782  ;;  %v2779_v36 = vsel %vm2767_vm12, %v2757_v10, %v2760_v44  ;;  %v2772_v13 = vsel %vm2770_vm15, %v2760_v44, 2102212464 }
 0x376   :  { %v2780_v27 = vsel %vm2770_vm15, %v2766_v51, 1326507024  ;;  %v2777_v56 = vsel %vm2769_vm13, %v2760_v44, %v2776_v28  ;;  %v2497_v48 = vadd.f32 %v8134_v21, %v2390_v59  ;;  %v5749_v16 = vadd.s32 4294967169, %v2947_v50 }
 0x377   :  { %v2781_v1 = vsel %vm2769_vm13, %v2763_v25, %v2780_v27  ;;  %v2778_v31 = vsel %vm2768_vm0, %v2775_v41, %v2777_v56  ;;  %v2866_v39 = vshrl.u32 %v10407_v22, %v8196_v47  ;;  %v2857_v32 = vshrl.u32 %v10404_v8, %v8196_v47 }
 0x378   :  { %v2782_v49 = vsel %vm2768_vm0, %v2779_v36, %v2781_v1  ;;  %v8199_v17 = vmul.u32.u64.low %v2783_v18, %v2778_v31  ;;  %v8200_v4 = vmul.u32.u64.high %v2783_v18, %v2778_v31, %v8199_v17  ;;  %v2618_v58 = vadd.f32 %v2617_v24, %v2497_v48 }
 0x379   :  { %v8204_v45 = vmul.u32.u64.low %v2783_v18, %v2782_v49  ;;  %v8205_v37 = vmul.u32.u64.high %v2783_v18, %v2782_v49, %v8204_v45  ;;  %v2860_v25 = vshrl.u32 %v10405_v33, %v8196_v47  ;;  %v2865_v21 = vshll.u32 %v10406_v14, %v2853_v9  ;;  %v2718_v49 = vpop.f32.mrf.mxu1 }
 0x37a   :  { %v2751_v51 = vshrl.u32 %v10370_v60, %v2750_v15  ;;  %v8218_v29 = vshrl.u32 %v2851_v54, 5  ;;  %v2863_v41 = vshrl.u32 %v10406_v14, %v8196_v47  ;;  %v2953_v28 = vadd.s32 1, %v5749_v16 }
 0x37b   :  { %v2856_v27 = vshll.u32 %v10370_v60, %v2853_v9  ;;  %v2859_v44 = vshll.u32 %v10404_v8, %v2853_v9  ;;  %v2867_v6 = vor.u32 %v2866_v39, %v2865_v21  ;;  %v2869_v56 = vshrl.u32 %v10372_v38, %v8196_v47 }
 0x37c   :  { %v2771_v36 = vsel %vm2767_vm12, %v2751_v51, %v2754_v19  ;;  %v2773_v15 = vsel %vm2769_vm13, %v2757_v10, %v2772_v13  ;;  %v2862_v54 = vshll.u32 %v10405_v33, %v2853_v9  ;;  %v2868_v1 = vshll.u32 %v10407_v22, %v2853_v9 }
 0x37d   :  { %v2793_v57 = vadd.s32 1, %v8200_v4  ;;  %v8233_v31 = vor.u32 %v2857_v32, %v2856_v27  ;;  %v8235_v50 = vor.u32 %v2860_v25, %v2859_v44  ;;  %vm2954_vm1 = vcmp.gt.s32.totalorder %v2953_v28, 0 }
 0x37e   :  { %vm2792_vm2 = vc.u32 %v8205_v37, %v8199_v17  ;;  %v2864_v59 = vor.u32 %v2863_v41, %v2862_v54  ;;  %vm2874_vm3 = vcmp.lt.s32.totalorder %v8218_v29, 4  ;;  %v2955_v19 = vsel %vm2954_vm1, %v2953_v28, 0 }
 0x37f   :  { %v2774_v10 = vsel %vm2768_vm0, %v2771_v36, %v2773_v15  ;;  %v2870_v24 = vor.u32 %v2869_v56, %v2868_v1  ;;  %v2880_v9 = vsel %vm2874_vm3, %v2867_v6, 920167782  ;;  %v2957_v48 = vand.u32 31, %v2955_v19 }
 0x380   :  { %v2846_v45 = vand.u32 8388607, %v10210_v11  ;;  %v8246_v16 = vadd.f32 %v2718_v49, %v2618_v58  ;;  %v2794_v39 = vsel %vm2792_vm2, %v2793_v57, %v8200_v4  ;;  %vm2871_vm4 = vcmp.lt.s32.totalorder %v8218_v29, 1 }
 0x381   :  { %vm2873_vm5 = vcmp.lt.s32.totalorder %v8218_v29, 3  ;;  %v10213_v13 = vand.u32 2147483647, %v8156_v23  ;;  %v2790_v26 = vmul.u32 %v2783_v18, %v2774_v10  ;;  %v2879_v32 = vsel %vm2871_vm4, %v8233_v31, %v8235_v50 }
 0x382   :  { %v2881_v25 = vsel %vm2873_vm5, %v2864_v59, %v2880_v9  ;;  %v8258_v21 = vsub.s32 32, %v2957_v48  ;;  %v2884_v4 = vsel %vm2874_vm3, %v2870_v24, 1326507024  ;;  %v2847_v51 = vor.u32 8388608, %v2846_v45 }
 0x383   :  { %v2795_v58 = vadd.s32 %v2794_v39, %v2790_v26  ;;  %vm2872_vm6 = vcmp.lt.s32.totalorder %v8218_v29, 2  ;;  %v2883_v41 = vsel %vm2871_vm4, %v8235_v50, %v2864_v59  ;;  %v2950_v28 = vand.u32 8388607, %v10213_v13 }
 0x384   :  { %v2882_v18 = vsel %vm2872_vm6, %v2879_v32, %v2881_v25  ;;  %v3050_v27 = vand.u32 2139095040, %v8246_v16  ;;  %v2885_v44 = vsel %vm2873_vm5, %v2867_v6, %v2884_v4  ;;  %v8273_v56 = vshrl.u32 %v2955_v19, 5 }
 0x385   :  { %v2969_v36 = vshll.u32 %v10406_v14, %v2957_v48  ;;  %v2970_v15 = vshrl.u32 %v10407_v22, %v8258_v21  ;;  %v2961_v54 = vshrl.u32 %v10404_v8, %v8258_v21  ;;  %v2964_v1 = vshrl.u32 %v10405_v33, %v8258_v21 }
 0x386   :  { %v2967_v57 = vshrl.u32 %v10406_v14, %v8258_v21  ;;  %v2973_v49 = vshrl.u32 %v10372_v38, %v8258_v21  ;;  %v2796_v6 = vadd.s32 536870912, %v2795_v58  ;;  %v8286_v19 = vshll.u32 %v2847_v51, 8 }
 0x387   :  { %v2971_v10 = vor.u32 %v2970_v15, %v2969_v36  ;;  %v2972_v24 = vshll.u32 %v10407_v22, %v2957_v48  ;;  %v2886_v9 = vsel %vm2872_vm6, %v2883_v41, %v2885_v44  ;;  %v2960_v45 = vshll.u32 %v10370_v60, %v2957_v48 }
 0x388   :  { %v2963_v39 = vshll.u32 %v10404_v8, %v2957_v48  ;;  %v2966_v26 = vshll.u32 %v10405_v33, %v2957_v48  ;;  %v8295_v32 = vmul.u32.u64.low %v8286_v19, %v2882_v18  ;;  %v8296_v25 = vmul.u32.u64.high %v8286_v19, %v2882_v18, %v8295_v32  ;;  %v2028_v48 = vld [vmem:[%s10091_s4 + $0x20] sm:$0xff] }
 0x389   :  { %v2974_v4 = vor.u32 %v2973_v49, %v2972_v24  ;;  %v3051_v51 = vshrl.u32 %v3050_v27, 23  ;;  %v2962_v61 = vor.u32 %v2961_v54, %v2960_v45  ;;  %vm2978_vm7 = vcmp.lt.s32.totalorder %v8273_v56, 4 }
 0x38a   :  { %v2965_v36 = vor.u32 %v2964_v1, %v2963_v39  ;;  %v2968_v15 = vor.u32 %v2967_v57, %v2966_v26  ;;  %v8301_v41 = vmul.u32.u64.low %v8286_v19, %v2886_v9  ;;  %v8302_v44 = vmul.u32.u64.high %v8286_v19, %v2886_v9, %v8301_v41 }
 0x38b   :  { %v2984_v11 = vsel %vm2978_vm7, %v2971_v10, 920167782  ;;  %v8309_v18 = vshrl.u32 %v2796_v6, 30  ;;  %v2876_v27 = vsel %vm2874_vm3, %v2864_v59, 2102212464  ;;  %vm2975_vm8 = vcmp.lt.s32.totalorder %v8273_v56, 1 }
 0x38c   :  { %vm2977_vm9 = vcmp.lt.s32.totalorder %v8273_v56, 3  ;;  %v2988_v54 = vsel %vm2978_vm7, %v2974_v4, 1326507024  ;;  %v5753_v1 = vadd.s32 4294967169, %v3051_v51  ;;  %v2855_v57 = vshrl.u32 %v10370_v60, %v8196_v47 }
 0x38d   :  { %10408 = vst [vmem:[#allocation15_spill] sm:$0xff] %v8309_v18  ;;  %v2951_v49 = vor.u32 8388608, %v2950_v28  ;;  %v2983_v24 = vsel %vm2975_vm8, %v2962_v61, %v2965_v36  ;;  %v2985_v6 = vsel %vm2977_vm9, %v2968_v15, %v2984_v11  ;;  %v2147_v59 = vadd.f32 %v8100_v34, %v2028_v48 }
 0x38e   :  { %v2987_v9 = vsel %vm2975_vm8, %v2965_v36, %v2968_v15  ;;  %v2989_v45 = vsel %vm2977_vm9, %v2971_v10, %v2988_v54  ;;  %v2798_v39 = vshll.u32 %v8309_v18, 30  ;;  %v2875_v47 = vsel %vm2871_vm4, %v2855_v57, %v8233_v31  ;;  %v2029_v31 = vld [vmem:[%s10091_s4 + $0x28] sm:$0xff] }
 0x38f   :  { %v2877_v28 = vsel %vm2873_vm5, %v8235_v50, %v2876_v27  ;;  %vm2976_vm11 = vcmp.lt.s32.totalorder %v8273_v56, 2  ;;  %v3057_v11 = vadd.s32 1, %v5753_v1  ;;  %v2897_v26 = vadd.s32 1, %v8296_v25 }
 0x390   :  { %v2986_v34 = vsel %vm2976_vm11, %v2983_v24, %v2985_v6  ;;  %v2990_v10 = vsel %vm2976_vm11, %v2987_v9, %v2989_v45  ;;  %v8341_v4 = vshll.u32 %v2951_v49, 8  ;;  %v2284_v51 = vadd.f32 %v8110_v55, %v2147_v59  ;;  %v2622_v45 = vpop.f32.mrf.mxu0 }
 0x391   :  { %v2878_v50 = vsel %vm2872_vm6, %v2875_v47, %v2877_v28  ;;  %vm2896_vm14 = vc.u32 %v8302_v44, %v8295_v32  ;;  %vm3058_vm12 = vcmp.gt.s32.totalorder %v3057_v11, 0  ;;  %v8351_v41 = vsub.s32 %v2795_v58, %v2798_v39 }
 0x392   :  { %v8354_v48 = vmul.u32.u64.low %v8341_v4, %v2986_v34  ;;  %v8355_v27 = vmul.u32.u64.high %v8341_v4, %v2986_v34, %v8354_v48  ;;  %v3059_v54 = vsel %vm3058_vm12, %v3057_v11, 0  ;;  %v2149_v55 = vadd.f32 %v8102_v3, %v2029_v31 }
 0x393   :  { %v8359_v1 = vmul.u32.u64.low %v8341_v4, %v2990_v10  ;;  %v8360_v57 = vmul.u32.u64.high %v8341_v4, %v2990_v10, %v8359_v1  ;;  %v2396_v29 = vadd.f32 %v8120_v0, %v2284_v51  ;;  %v2898_v49 = vsel %vm2896_vm14, %v2897_v26, %v8296_v25  ;;  %v2723_v51 = vpop.f32.mrf.mxu1 }
 0x394   :  { %v2894_v24 = vmul.u32 %v8286_v19, %v2878_v50  ;;  %v2980_v58 = vsel %vm2978_vm7, %v2968_v15, 2102212464  ;;  %v10211_v6 = vand.u32 2147483647, %v8246_v16  ;;  %v3061_v59 = vand.u32 31, %v3059_v54 }
 0x395   :  { %v2286_v9 = vadd.f32 %v8112_v46, %v2149_v55  ;;  %v2801_v39 = vsub.s32 0, %v8351_v41  ;;  %v2959_v3 = vshrl.u32 %v10370_v60, %v8258_v21  ;;  %v2504_v0 = vadd.f32 %v8136_v40, %v2396_v29 }
 0x396   :  { %v8374_v47 = vadd.s32 %v2898_v49, %v2894_v24  ;;  %v3062_v25 = vsub.s32 32, %v3061_v59  ;;  %v2981_v28 = vsel %vm2977_vm9, %v2965_v36, %v2980_v58  ;;  %v3054_v34 = vand.u32 8388607, %v10211_v6 }
 0x397   :  { %v2398_v19 = vadd.f32 %v8122_v35, %v2286_v9  ;;  %v2979_v15 = vsel %vm2975_vm8, %v2959_v3, %v2962_v61  ;;  %v2623_v46 = vadd.f32 %v2622_v45, %v2504_v0  ;;  %v5742_v40 = vmin.u32 %v2801_v39, %v8351_v41 }
 0x398   :  { %v3065_v11 = vshrl.u32 %v10404_v8, %v3062_v25  ;;  %v3068_v21 = vshrl.u32 %v10405_v33, %v3062_v25  ;;  %v3001_v26 = vadd.s32 1, %v8355_v27  ;;  %v3064_v35 = vshll.u32 %v10370_v60, %v3061_v59 }
 0x399   :  { %v3067_v10 = vshll.u32 %v10404_v8, %v3061_v59  ;;  %v2900_v61 = vadd.s32 536870912, %v8374_v47  ;;  %v2982_v36 = vsel %vm2976_vm11, %v2979_v15, %v2981_v28  ;;  %vm3000_vm13 = vc.u32 %v8360_v57, %v8354_v48 }
 0x39a   :  { %v3071_v31 = vshrl.u32 %v10406_v14, %v3062_v25  ;;  %v8395_v50 = vshrl.u32 %v3059_v54, 5  ;;  %v3066_v1 = vor.u32 %v3065_v11, %v3064_v35  ;;  %v3070_v29 = vshll.u32 %v10405_v33, %v3061_v59 }
 0x39b   :  { %v3069_v55 = vor.u32 %v3068_v21, %v3067_v10  ;;  %v3073_v49 = vshll.u32 %v10406_v14, %v3061_v59  ;;  %v3074_v24 = vshrl.u32 %v10407_v22, %v3062_v25  ;;  %v3076_v58 = vshll.u32 %v10407_v22, %v3061_v59  ;;  %v2624_v59 = vpop.f32.mrf.mxu0 }
 0x39c   :  { %v3077_v56 = vshrl.u32 %v10372_v38, %v3062_v25  ;;  %v3002_v9 = vsel %vm3000_vm13, %v3001_v26, %v8355_v27  ;;  %v3055_v45 = vor.u32 8388608, %v3054_v34  ;;  %v3072_v39 = vor.u32 %v3071_v31, %v3070_v29  ;;  %v2030_v29 = vld [vmem:[%s10091_s4 + $0x30] sm:$0xff] }
 0x39d   :  { %v8403_v3 = vadd.f32 %v2723_v51, %v2623_v46  ;;  %v2803_v54 = vclz %v5742_v40  ;;  %v2998_v0 = vmul.u32 %v8341_v4, %v2982_v36  ;;  %v3075_v15 = vor.u32 %v3074_v24, %v3073_v49  ;;  %v2725_v51 = vpop.f32.mrf.mxu1 }
 0x39e   :  { %v3078_v28 = vor.u32 %v3077_v56, %v3076_v58  ;;  %v2506_v11 = vadd.f32 %v8138_v5, %v2398_v19  ;;  %v8407_v21 = vshrl.u32 %v2900_v61, 30  ;;  %vm3079_vm15 = vcmp.lt.s32.totalorder %v8395_v50, 1 }
 0x39f   :  { %vm3082_vm0 = vcmp.lt.s32.totalorder %v8395_v50, 4  ;;  %v3003_v35 = vadd.s32 %v3002_v9, %v2998_v0  ;;  %vm3081_vm1 = vcmp.lt.s32.totalorder %v8395_v50, 3  ;;  %v3087_v27 = vsel %vm3079_vm15, %v3066_v1, %v3069_v55 }
 0x3a0   :  { %10409 = vst [vmem:[#allocation7_spill] sm:$0xff] %v8407_v21  ;;  %v3088_v4 = vsel %vm3082_vm0, %v3075_v15, 920167782  ;;  %vm3080_vm2 = vcmp.lt.s32.totalorder %v8395_v50, 2  ;;  %v3091_v19 = vsel %vm3079_vm15, %v3069_v55, %v3072_v39  ;;  %v3154_v46 = vand.u32 2139095040, %v8403_v3 }
 0x3a1   :  { %v3089_v5 = vsel %vm3081_vm1, %v3072_v39, %v3088_v4  ;;  %v5743_v34 = vadd.s32 4294967294, %v2803_v54  ;;  %v3092_v26 = vsel %vm3082_vm0, %v3078_v28, 1326507024  ;;  %v3095_v10 = vshll.u32 %v3055_v45, 8 }
 0x3a2   :  { %v3090_v40 = vsel %vm3080_vm2, %v3087_v27, %v3089_v5  ;;  %v2625_v61 = vadd.f32 %v2624_v59, %v2506_v11  ;;  %v2902_v36 = vshll.u32 %v8407_v21, 30  ;;  %v3093_v31 = vsel %vm3081_vm1, %v3075_v15, %v3092_v26  ;;  %v2031_v59 = vld [vmem:[%s10091_s4 + $0x38] sm:$0xff] }
 0x3a3   :  { %v3004_v49 = vadd.s32 536870912, %v3003_v35  ;;  %v3094_v24 = vsel %vm3080_vm2, %v3091_v19, %v3093_v31  ;;  %v8434_v58 = vmul.u32.u64.low %v3095_v10, %v3090_v40  ;;  %v8435_v56 = vmul.u32.u64.high %v3095_v10, %v3090_v40, %v8434_v58 }
 0x3a4   :  { %v3084_v9 = vsel %vm3082_vm0, %v3072_v39, 2102212464  ;;  %v8440_v45 = vmul.u32.u64.low %v3095_v10, %v3094_v24  ;;  %v8441_v54 = vmul.u32.u64.high %v3095_v10, %v3094_v24, %v8440_v45  ;;  %v3155_v0 = vshrl.u32 %v3154_v46, 23 }
 0x3a5   :  { %vm5744_vm3 = vcmp.lt.s32.totalorder %v5743_v34, 0  ;;  %v3063_v15 = vshrl.u32 %v10370_v60, %v3062_v25  ;;  %v8444_v28 = vadd.f32 %v2725_v51, %v2625_v61  ;;  %v2158_v11 = vadd.f32 %v8104_v43, %v2030_v29 }
 0x3a6   :  { %v5757_v27 = vadd.s32 4294967169, %v3155_v0  ;;  %v3085_v39 = vsel %vm3081_vm1, %v3069_v55, %v3084_v9  ;;  %v8454_v5 = vsel %vm5744_vm3, 0, %v5743_v34  ;;  %v8457_v19 = vsub.s32 %v8374_v47, %v2902_v36 }
 0x3a7   :  { %v3083_v4 = vsel %vm3079_vm15, %v3063_v15, %v3066_v1  ;;  %v8459_v25 = vshrl.u32 %v3004_v49, 30  ;;  %v3105_v43 = vadd.s32 1, %v8435_v56  ;;  %v2160_v46 = vadd.f32 %v8106_v63, %v2031_v59 }
 0x3a8   :  { %vm3104_vm4 = vc.u32 %v8441_v54, %v8434_v58  ;;  %v3161_v40 = vadd.s32 1, %v5757_v27  ;;  %v3258_v1 = vand.u32 2139095040, %v8444_v28  ;;  %v2291_v26 = vadd.f32 %v8114_v12, %v2158_v11 }
 0x3a9   :  { %10410 = vst [vmem:[#allocation17_spill] sm:$0xff] %v8459_v25  ;;  %v3086_v55 = vsel %vm3080_vm2, %v3083_v4, %v3085_v39  ;;  %v2293_v47 = vadd.f32 %v8116_v30, %v2160_v46  ;;  %v2811_v34 = vsub.s32 4294967266, %v8454_v5  ;;  %v10216_v61 = vand.u32 2147483647, %v8403_v3 }
 0x3aa   :  { %vm3162_vm5 = vcmp.gt.s32.totalorder %v3161_v40, 0  ;;  %v2905_v63 = vsub.s32 0, %v8457_v19  ;;  %v3006_v36 = vshll.u32 %v8459_v25, 30  ;;  %v3106_v31 = vsel %vm3104_vm4, %v3105_v43, %v8435_v56 }
 0x3ab   :  { %v3163_v51 = vsel %vm3162_vm5, %v3161_v40, 0  ;;  %v2404_v29 = vadd.f32 %v8127_v62, %v2291_v26  ;;  %v3102_v12 = vmul.u32 %v3095_v10, %v3086_v55  ;;  %v3259_v50 = vshrl.u32 %v3258_v1, 23 }
 0x3ac   :  { %v3165_v49 = vand.u32 31, %v3163_v51  ;;  %v2406_v24 = vadd.f32 %v8132_v53, %v2293_v47  ;;  %v8482_v9 = vadd.s32 %v8199_v17, %v8205_v37  ;;  %v8486_v15 = vadd.s32 127, %v2811_v34 }
 0x3ad   :  { %v8478_v30 = vadd.f32 %v8140_v20, %v2404_v29  ;;  %v8484_v45 = vadd.s32 %v3106_v31, %v3102_v12  ;;  %v5746_v56 = vmin.u32 %v2905_v63, %v8457_v19  ;;  %v8489_v62 = vsub.s32 %v3003_v35, %v3006_v36 }
 0x3ae   :  { %v3166_v0 = vsub.s32 32, %v3165_v49  ;;  %v3158_v10 = vand.u32 8388607, %v10216_v61  ;;  %v3168_v53 = vshll.u32 %v10370_v60, %v3165_v49  ;;  %v3171_v11 = vshll.u32 %v10404_v8, %v3165_v49 }
 0x3af   :  { %v5761_v17 = vadd.s32 4294967169, %v3259_v50  ;;  %v3174_v59 = vshll.u32 %v10405_v33, %v3165_v49  ;;  %v3108_v35 = vadd.s32 536870912, %v8484_v45  ;;  %v3164_v39 = vshrl.u32 %v3163_v51, 5 }
 0x3b0   :  { %v3169_v20 = vshrl.u32 %v10404_v8, %v3166_v0  ;;  %v3172_v37 = vshrl.u32 %v10405_v33, %v3166_v0  ;;  %v3175_v27 = vshrl.u32 %v10406_v14, %v3166_v0  ;;  %v3178_v4 = vshrl.u32 %v10407_v22, %v3166_v0 }
 0x3b1   :  { %v3177_v43 = vshll.u32 %v10406_v14, %v3165_v49  ;;  %v3181_v46 = vshrl.u32 %v10372_v38, %v3166_v0  ;;  %v3180_v55 = vshll.u32 %v10407_v22, %v3165_v49  ;;  %v2807_v47 = vsub.s32 32, %v8454_v5 }
 0x3b2   :  { %v3170_v40 = vor.u32 %v3169_v20, %v3168_v53  ;;  %v3173_v1 = vor.u32 %v3172_v37, %v3171_v11  ;;  %v3176_v26 = vor.u32 %v3175_v27, %v3174_v59  ;;  %v2813_v34 = vshll.u32 %v8486_v15, 23 }
 0x3b3   :  { %v3159_v63 = vor.u32 8388608, %v3158_v10  ;;  %v3179_v36 = vor.u32 %v3178_v4, %v3177_v43  ;;  %v2907_v31 = vclz %v5746_v56  ;;  %v3009_v29 = vsub.s32 0, %v8489_v62 }
 0x3b4   :  { %v3182_v12 = vor.u32 %v3181_v46, %v3180_v55  ;;  %v3265_v51 = vadd.s32 1, %v5761_v17  ;;  %v8507_v50 = vshrl.u32 %v3108_v35, 30  ;;  %v3167_v6 = vshrl.u32 %v10370_v60, %v3166_v0  ;;  %v2629_v46 = vpop.f32.mrf.mxu0 }
 0x3b5   :  { %vm3183_vm6 = vcmp.lt.s32.totalorder %v3164_v39, 1  ;;  %vm3186_vm7 = vcmp.lt.s32.totalorder %v3164_v39, 4  ;;  %vm3185_vm8 = vcmp.lt.s32.totalorder %v3164_v39, 3  ;;  %vm3184_vm9 = vcmp.lt.s32.totalorder %v3164_v39, 2 }
 0x3b6   :  { %10411 = vst [vmem:[#allocation8_spill] sm:$0xff] %v8507_v50  ;;  %v3188_v53 = vsel %vm3186_vm7, %v3176_v26, 2102212464  ;;  %v3191_v49 = vsel %vm3183_vm6, %v3170_v40, %v3173_v1  ;;  %v3192_v20 = vsel %vm3186_vm7, %v3179_v36, 920167782  ;;  %v3199_v15 = vshll.u32 %v3159_v63, 8 }
 0x3b7   :  { %v3193_v11 = vsel %vm3185_vm8, %v3176_v26, %v3192_v20  ;;  %v10212_v10 = vand.u32 2147483647, %v8444_v28  ;;  %v3187_v56 = vsel %vm3183_vm6, %v3167_v6, %v3170_v40  ;;  %v3195_v59 = vsel %vm3183_vm6, %v3173_v1, %v3176_v26 }
 0x3b8   :  { %v3194_v37 = vsel %vm3184_vm9, %v3191_v49, %v3193_v11  ;;  %v3196_v17 = vsel %vm3186_vm7, %v3182_v12, 1326507024  ;;  %v3189_v27 = vsel %vm3185_vm8, %v3173_v1, %v3188_v53  ;;  %v5747_v43 = vadd.s32 4294967294, %v2907_v31  ;;  %v2730_v53 = vpop.f32.mrf.mxu1 }
 0x3b9   :  { %v3197_v4 = vsel %vm3185_vm8, %v3179_v36, %v3196_v17  ;;  %v8512_v35 = vmul.u32.u64.low %v3199_v15, %v3194_v37  ;;  %v8513_v0 = vmul.u32.u64.high %v3199_v15, %v3194_v37, %v8512_v35  ;;  %v3110_v55 = vshll.u32 %v8507_v50, 30 }
 0x3ba   :  { %v3198_v20 = vsel %vm3184_vm9, %v3195_v59, %v3197_v4  ;;  %vm3266_vm11 = vcmp.gt.s32.totalorder %v3265_v51, 0  ;;  %v5750_v63 = vmin.u32 %v3009_v29, %v8489_v62  ;;  %v8523_v1 = vadd.f32 %v8142_v7, %v2406_v24 }
 0x3bb   :  { %v8519_v6 = vmul.u32.u64.low %v3199_v15, %v3198_v20  ;;  %v8520_v40 = vmul.u32.u64.high %v3199_v15, %v3198_v20, %v8519_v6  ;;  %v3267_v26 = vsel %vm3266_vm11, %v3265_v51, 0  ;;  %v3190_v36 = vsel %vm3184_vm9, %v3187_v56, %v3189_v27 }
 0x3bc   :  { %v3262_v31 = vand.u32 8388607, %v10212_v10  ;;  %v3269_v12 = vand.u32 31, %v3267_v26  ;;  %v2808_v49 = vshll.u32 %v8351_v41, %v8454_v5  ;;  %v2809_v11 = vshrl.u32 %v8482_v9, %v2807_v47 }
 0x3bd   :  { %v2630_v29 = vadd.f32 %v2629_v46, %v8478_v30  ;;  %v3209_v37 = vadd.s32 1, %v8513_v0  ;;  %v8533_v51 = vor.u32 4788187, %v2813_v34  ;;  %vm5748_vm14 = vcmp.lt.s32.totalorder %v5747_v43, 0 }
 0x3be   :  { %v8536_v7 = vsub.s32 %v8484_v45, %v3110_v55  ;;  %v3270_v24 = vsub.s32 32, %v3269_v12  ;;  %v3011_v39 = vclz %v5750_v63  ;;  %v3206_v56 = vmul.u32 %v3199_v15, %v3190_v36 }
 0x3bf   :  { %vm3208_vm12 = vc.u32 %v8520_v40, %v8512_v35  ;;  %v8540_v59 = vadd.f32 %v2730_v53, %v2630_v29  ;;  %v3263_v5 = vor.u32 8388608, %v3262_v31  ;;  %v3272_v34 = vshll.u32 %v10370_v60, %v3269_v12 }
 0x3c0   :  { %v3210_v41 = vsel %vm3208_vm12, %v3209_v37, %v8513_v0  ;;  %v3273_v30 = vshrl.u32 %v10404_v8, %v3270_v24  ;;  %v3276_v9 = vshrl.u32 %v10405_v33, %v3270_v24  ;;  %v3275_v45 = vshll.u32 %v10404_v8, %v3269_v12 }
 0x3c1   :  { %10412 = vst [vmem:[#allocation9_spill] sm:$0xff] %v8540_v59  ;;  %v3211_v47 = vadd.s32 %v3210_v41, %v3206_v56  ;;  %v3279_v17 = vshrl.u32 %v10406_v14, %v3270_v24  ;;  %v3113_v15 = vsub.s32 0, %v8536_v7  ;;  %v3278_v27 = vshll.u32 %v10405_v33, %v3269_v12 }
 0x3c2   :  { %v3281_v4 = vshll.u32 %v10406_v14, %v3269_v12  ;;  %v3282_v0 = vshrl.u32 %v10407_v22, %v3270_v24  ;;  %v3268_v55 = vshrl.u32 %v3267_v26, 5  ;;  %v3274_v20 = vor.u32 %v3273_v30, %v3272_v34 }
 0x3c3   :  { %v3212_v46 = vadd.s32 536870912, %v3211_v47  ;;  %v3277_v63 = vor.u32 %v3276_v9, %v3275_v45  ;;  %v3280_v6 = vor.u32 %v3279_v17, %v3278_v27  ;;  %v3284_v31 = vshll.u32 %v10407_v22, %v3269_v12 }
 0x3c4   :  { %v3283_v36 = vor.u32 %v3282_v0, %v3281_v4  ;;  %v3285_v53 = vshrl.u32 %v10372_v38, %v3270_v24  ;;  %v2810_v29 = vor.u32 %v2809_v11, %v2808_v49  ;;  %v2815_v37 = vand.u32 2147483647, %v8533_v51 }
 0x3c5   :  { %v8556_v56 = vsel %vm5748_vm14, 0, %v5747_v43  ;;  %v8558_v41 = vshrl.u32 %v3212_v46, 30  ;;  %v5751_v10 = vadd.s32 4294967294, %v3011_v39  ;;  %v3303_v2 = vshll.u32 %v3263_v5, 8  ;;  %v2631_v46 = vpop.f32.mrf.mxu0 }
 0x3c6   :  { %v3286_v13 = vor.u32 %v3285_v53, %v3284_v31  ;;  %v3362_v26 = vand.u32 2139095040, %v8540_v59  ;;  %v5754_v30 = vmin.u32 %v3113_v15, %v8536_v7  ;;  %vm3287_vm13 = vcmp.lt.s32.totalorder %v3268_v55, 1 }
 0x3c7   :  { %v3214_v9 = vshll.u32 %v8558_v41, 30  ;;  %vm3290_vm15 = vcmp.lt.s32.totalorder %v3268_v55, 4  ;;  %v3295_v49 = vsel %vm3287_vm13, %v3274_v20, %v3277_v63  ;;  %v3271_v43 = vshrl.u32 %v10370_v60, %v3270_v24 }
 0x3c8   :  { %v3292_v12 = vsel %vm3290_vm15, %v3280_v6, 2102212464  ;;  %v3296_v11 = vsel %vm3290_vm15, %v3283_v36, 920167782  ;;  %v3300_v51 = vsel %vm3290_vm15, %v3286_v13, 1326507024  ;;  %v3299_v39 = vsel %vm3287_vm13, %v3277_v63, %v3280_v6 }
 0x3c9   :  { %v8563_v34 = vsub.s32 %v3211_v47, %v3214_v9  ;;  %vm3289_vm0 = vcmp.lt.s32.totalorder %v3268_v55, 3  ;;  %vm3288_vm1 = vcmp.lt.s32.totalorder %v3268_v55, 2  ;;  %v3363_v17 = vshrl.u32 %v3362_v26, 23  ;;  %v2732_v9 = vpop.f32.mrf.mxu1 }
 0x3ca   :  { %v3297_v5 = vsel %vm3289_vm0, %v3280_v6, %v3296_v11  ;;  %v3301_v45 = vsel %vm3289_vm0, %v3283_v36, %v3300_v51  ;;  %v3291_v27 = vsel %vm3287_vm13, %v3271_v43, %v3274_v20  ;;  %v3293_v4 = vsel %vm3289_vm0, %v3277_v63, %v3292_v12 }
 0x3cb   :  { %v3217_v15 = vsub.s32 0, %v8563_v34  ;;  %v3298_v0 = vsel %vm3288_vm1, %v3295_v49, %v3297_v5  ;;  %v3115_v31 = vclz %v5754_v30  ;;  %v3302_v13 = vsel %vm3288_vm1, %v3299_v39, %v3301_v45 }
 0x3cc   :  { %v8569_v47 = vmul.u32.u64.low %v3303_v2, %v3298_v0  ;;  %v8570_v53 = vmul.u32.u64.high %v3303_v2, %v3298_v0, %v8569_v47  ;;  %vm5752_vm2 = vcmp.lt.s32.totalorder %v5751_v10, 0  ;;  %v2915_v26 = vsub.s32 4294967266, %v8556_v56 }
 0x3cd   :  { %v5758_v24 = vmin.u32 %v3217_v15, %v8563_v34  ;;  %v8574_v6 = vmul.u32.u64.low %v3303_v2, %v3302_v13  ;;  %v8575_v36 = vmul.u32.u64.high %v3303_v2, %v3302_v13, %v8574_v6  ;;  %v3294_v20 = vsel %vm3288_vm1, %v3291_v27, %v3293_v4 }
 0x3ce   :  { %v5765_v63 = vadd.s32 4294967169, %v3363_v17  ;;  %v2817_v12 = vcvt.s32.f32 %v2810_v29  ;;  %v8581_v30 = vadd.s32 %v8295_v32, %v8302_v44  ;;  %v2632_v49 = vadd.f32 %v2631_v46, %v8523_v1 }
 0x3cf   :  { %v3219_v11 = vclz %v5758_v24  ;;  %v8584_v51 = vsel %vm5752_vm2, 0, %v5751_v10  ;;  %v5755_v43 = vadd.s32 4294967294, %v3115_v31  ;;  %v3313_v39 = vadd.s32 1, %v8570_v53 }
 0x3d0   :  { %v3369_v5 = vadd.s32 1, %v5765_v63  ;;  %v8587_v45 = vmul.f32 %v2817_v12, %v2815_v37  ;;  %v3310_v55 = vmul.u32 %v3303_v2, %v3294_v20  ;;  %vm3312_vm3 = vc.u32 %v8575_v36, %v8569_v47 }
 0x3d1   :  { %v8591_v29 = vadd.f32 %v2732_v9, %v2632_v49  ;;  %v8593_v17 = vadd.s32 127, %v2915_v26  ;;  %v8597_v32 = vadd.s32 %v8354_v48, %v8360_v57  ;;  %v3314_v44 = vsel %vm3312_vm3, %v3313_v39, %v8570_v53 }
 0x3d2   :  { %vm3370_vm4 = vcmp.gt.s32.totalorder %v3369_v5, 0  ;;  %v3019_v10 = vsub.s32 4294967266, %v8584_v51  ;;  %v5759_v1 = vadd.s32 4294967294, %v3219_v11  ;;  %v3315_v37 = vadd.s32 %v3314_v44, %v3310_v55 }
 0x3d3   :  { %v3371_v15 = vsel %vm3370_vm4, %v3369_v5, 0  ;;  %vm5756_vm5 = vcmp.lt.s32.totalorder %v5755_v43, 0  ;;  %v10215_v27 = vand.u32 2147483647, %v8540_v59  ;;  %v3466_v46 = vand.u32 2139095040, %v8591_v29 }
 0x3d4   :  { %v3373_v4 = vand.u32 31, %v3371_v15  ;;  %v3316_v57 = vadd.s32 536870912, %v3315_v37  ;;  %v3015_v13 = vsub.s32 32, %v8584_v51  ;;  %v8611_v53 = vadd.s32 %v8434_v58, %v8441_v54 }
 0x3d5   :  { %v8613_v6 = vadd.s32 127, %v3019_v10  ;;  %v8615_v26 = vsel %vm5756_vm5, 0, %v5755_v43  ;;  %vm5760_vm6 = vcmp.lt.s32.totalorder %v5759_v1, 0  ;;  %v3366_v63 = vand.u32 8388607, %v10215_v27 }
 0x3d6   :  { %v3374_v24 = vsub.s32 32, %v3373_v4  ;;  %v8617_v20 = vshrl.u32 %v3316_v57, 30  ;;  %v3376_v54 = vshll.u32 %v10370_v60, %v3373_v4  ;;  %v3379_v11 = vshll.u32 %v10404_v8, %v3373_v4 }
 0x3d7   :  { %v3467_v43 = vshrl.u32 %v3466_v46, 23  ;;  %v8627_v39 = vsel %vm5760_vm6, 0, %v5759_v1  ;;  %v3382_v5 = vshll.u32 %v10405_v33, %v3373_v4  ;;  %v3385_v55 = vshll.u32 %v10406_v14, %v3373_v4 }
 0x3d8   :  { %10413 = vst [vmem:[#allocation10_spill] sm:$0xff] %v8617_v20  ;;  %v3377_v9 = vshrl.u32 %v10404_v8, %v3374_v24  ;;  %v3380_v12 = vshrl.u32 %v10405_v33, %v3374_v24  ;;  %v3383_v49 = vshrl.u32 %v10406_v14, %v3374_v24  ;;  %v3318_v58 = vshll.u32 %v8617_v20, 30 }
 0x3d9   :  { %v3386_v44 = vshrl.u32 %v10407_v22, %v3374_v24  ;;  %v3372_v57 = vshrl.u32 %v3371_v15, 5  ;;  %v3388_v31 = vshll.u32 %v10407_v22, %v3373_v4  ;;  %v3389_v2 = vshrl.u32 %v10372_v38, %v3374_v24 }
 0x3da   :  { %v8632_v10 = vsub.s32 %v3315_v37, %v3318_v58  ;;  %v3378_v27 = vor.u32 %v3377_v9, %v3376_v54  ;;  %v3381_v0 = vor.u32 %v3380_v12, %v3379_v11  ;;  %v3384_v61 = vor.u32 %v3383_v49, %v3382_v5 }
 0x3db   :  { %v3387_v48 = vor.u32 %v3386_v44, %v3385_v55  ;;  %v3021_v1 = vshll.u32 %v8613_v6, 23  ;;  %v3123_v46 = vsub.s32 4294967266, %v8615_v26  ;;  %v3227_v37 = vsub.s32 4294967266, %v8627_v39 }
 0x3dc   :  { %v3321_v25 = vsub.s32 0, %v8632_v10  ;;  %v3367_v58 = vor.u32 8388608, %v3366_v63  ;;  %v3390_v15 = vor.u32 %v3389_v2, %v3388_v31  ;;  %v5769_v9 = vadd.s32 4294967169, %v3467_v43 }
 0x3dd   :  { %v3375_v49 = vshrl.u32 %v10370_v60, %v3374_v24  ;;  %vm3391_vm7 = vcmp.lt.s32.totalorder %v3372_v57, 1  ;;  %vm3394_vm8 = vcmp.lt.s32.totalorder %v3372_v57, 4  ;;  %vm3393_vm9 = vcmp.lt.s32.totalorder %v3372_v57, 3 }
 0x3de   :  { %v5762_v12 = vmin.u32 %v3321_v25, %v8632_v10  ;;  %v3396_v4 = vsel %vm3394_vm8, %v3384_v61, 2102212464  ;;  %v3399_v6 = vsel %vm3391_vm7, %v3378_v27, %v3381_v0  ;;  %v3400_v54 = vsel %vm3394_vm8, %v3387_v48, 920167782 }
 0x3df   :  { %vm3392_vm11 = vcmp.lt.s32.totalorder %v3372_v57, 2  ;;  %v3401_v5 = vsel %vm3393_vm9, %v3384_v61, %v3400_v54  ;;  %v3403_v55 = vsel %vm3391_vm7, %v3381_v0, %v3384_v61  ;;  %v3404_v21 = vsel %vm3394_vm8, %v3390_v15, 1326507024 }
 0x3e0   :  { %v3323_v11 = vclz %v5762_v12  ;;  %v3402_v44 = vsel %vm3392_vm11, %v3399_v6, %v3401_v5  ;;  %v3407_v63 = vshll.u32 %v3367_v58, 8  ;;  %v3473_v2 = vadd.s32 1, %v5769_v9 }
 0x3e1   :  { %v3395_v43 = vsel %vm3391_vm7, %v3375_v49, %v3378_v27  ;;  %v3397_v25 = vsel %vm3393_vm9, %v3381_v0, %v3396_v4  ;;  %v3405_v20 = vsel %vm3393_vm9, %v3387_v48, %v3404_v21  ;;  %v3223_v24 = vsub.s32 32, %v8627_v39 }
 0x3e2   :  { %v5763_v31 = vadd.s32 4294967294, %v3323_v11  ;;  %v3406_v50 = vsel %vm3392_vm11, %v3403_v55, %v3405_v20  ;;  %v8646_v59 = vmul.u32.u64.low %v3407_v63, %v3402_v44  ;;  %v8647_v18 = vmul.u32.u64.high %v3407_v63, %v3402_v44, %v8646_v59 }
 0x3e3   :  { %v8651_v12 = vshrl.u32 %v8597_v32, %v3015_v13  ;;  %v3228_v61 = vadd.s32 127, %v3227_v37  ;;  %v8653_v6 = vmul.u32.u64.low %v3407_v63, %v3406_v50  ;;  %v8654_v15 = vmul.u32.u64.high %v3407_v63, %v3406_v50, %v8653_v6 }
 0x3e4   :  { %v3119_v58 = vsub.s32 32, %v8615_v26  ;;  %v3207_v21 = vadd.s32 %v8512_v35, %v8520_v40  ;;  %v3398_v27 = vsel %vm3392_vm11, %v3395_v43, %v3397_v25  ;;  %vm3474_vm14 = vcmp.gt.s32.totalorder %v3473_v2, 0 }
 0x3e5   :  { %v3124_v0 = vadd.s32 127, %v3123_v46  ;;  %vm5764_vm12 = vcmp.lt.s32.totalorder %v5763_v31, 0  ;;  %v10414_v48 = vand.u32 2147483647, %v8591_v29  ;;  %v3475_v9 = vsel %vm3474_vm14, %v3473_v2, 0 }
 0x3e6   :  { %v8662_v32 = vor.u32 4788187, %v3021_v1  ;;  %v3225_v13 = vshrl.u32 %v3207_v21, %v3223_v24  ;;  %v3417_v50 = vadd.s32 1, %v8647_v18  ;;  %v3477_v37 = vand.u32 31, %v3475_v9 }
 0x3e7   :  { %v3470_v20 = vand.u32 8388607, %v10414_v48  ;;  %v3229_v4 = vshll.u32 %v3228_v61, 23  ;;  %v3414_v35 = vmul.u32 %v3407_v63, %v3398_v27  ;;  %vm3416_vm13 = vc.u32 %v8654_v15, %v8646_v59 }
 0x3e8   :  { %v3224_v40 = vshll.u32 %v8563_v34, %v8627_v39  ;;  %v8671_v57 = vsel %vm5764_vm12, 0, %v5763_v31  ;;  %v3418_v1 = vsel %vm3416_vm13, %v3417_v50, %v8647_v18  ;;  %v3478_v46 = vsub.s32 32, %v3477_v37 }
 0x3e9   :  { %v3121_v54 = vshrl.u32 %v8611_v53, %v3119_v58  ;;  %v3125_v11 = vshll.u32 %v3124_v0, 23  ;;  %v3419_v5 = vadd.s32 %v3418_v1, %v3414_v35  ;;  %v3471_v55 = vor.u32 8388608, %v3470_v20 }
 0x3ea   :  { %v3226_v44 = vor.u32 %v3225_v13, %v3224_v40  ;;  %v3481_v2 = vshrl.u32 %v10404_v8, %v3478_v46  ;;  %v3484_v63 = vshrl.u32 %v10405_v33, %v3478_v46  ;;  %v3487_v43 = vshrl.u32 %v10406_v14, %v3478_v46 }
 0x3eb   :  { %v3230_v25 = vor.u32 4788187, %v3229_v4  ;;  %v3331_v34 = vsub.s32 4294967266, %v8671_v57  ;;  %v3420_v39 = vadd.s32 536870912, %v3419_v5  ;;  %v3480_v31 = vshll.u32 %v10370_v60, %v3477_v37 }
 0x3ec   :  { %v3483_v18 = vshll.u32 %v10404_v8, %v3477_v37  ;;  %v3486_v53 = vshll.u32 %v10405_v33, %v3477_v37  ;;  %v3489_v24 = vshll.u32 %v10406_v14, %v3477_v37  ;;  %v3490_v61 = vshrl.u32 %v10407_v22, %v3478_v46 }
 0x3ed   :  { %v8684_v6 = vshrl.u32 %v3420_v39, 30  ;;  %v3476_v58 = vshrl.u32 %v3475_v9, 5  ;;  %v3492_v21 = vshll.u32 %v10407_v22, %v3477_v37  ;;  %v3493_v27 = vshrl.u32 %v10372_v38, %v3478_v46 }
 0x3ee   :  { %v3482_v0 = vor.u32 %v3481_v2, %v3480_v31  ;;  %v3485_v48 = vor.u32 %v3484_v63, %v3483_v18  ;;  %v3488_v20 = vor.u32 %v3487_v43, %v3486_v53  ;;  %v3491_v13 = vor.u32 %v3490_v61, %v3489_v24 }
 0x3ef   :  { %v8688_v50 = vor.u32 4788187, %v3125_v11  ;;  %v3332_v4 = vadd.s32 127, %v3331_v34  ;;  %v3422_v35 = vshll.u32 %v8684_v6, 30  ;;  %v3494_v40 = vor.u32 %v3493_v27, %v3492_v21 }
 0x3f0   :  { %v3231_v1 = vand.u32 2147483647, %v3230_v25  ;;  %v3233_v49 = vcvt.s32.f32 %v3226_v44  ;;  %v3311_v39 = vadd.s32 %v8569_v47, %v8575_v36  ;;  %v3511_v9 = vshll.u32 %v3471_v55, 8 }
 0x3f1   :  { %v3327_v37 = vsub.s32 32, %v8671_v57  ;;  %v8694_v22 = vsub.s32 %v3419_v5, %v3422_v35  ;;  %vm3495_vm15 = vcmp.lt.s32.totalorder %v3476_v58, 1  ;;  %vm3498_vm0 = vcmp.lt.s32.totalorder %v3476_v58, 4 }
 0x3f2   :  { %v3503_v2 = vsel %vm3495_vm15, %v3482_v0, %v3485_v48  ;;  %v3504_v11 = vsel %vm3498_vm0, %v3491_v13, 920167782  ;;  %v3507_v63 = vsel %vm3495_vm15, %v3485_v48, %v3488_v20  ;;  %v3508_v43 = vsel %vm3498_vm0, %v3494_v40, 1326507024 }
 0x3f3   :  { %v3333_v34 = vshll.u32 %v3332_v4, 23  ;;  %v3425_v25 = vsub.s32 0, %v8694_v22  ;;  %vm3497_vm1 = vcmp.lt.s32.totalorder %v3476_v58, 3  ;;  %v3500_v44 = vsel %vm3498_vm0, %v3488_v20, 2102212464 }
 0x3f4   :  { %v3479_v47 = vshrl.u32 %v10370_v60, %v3478_v46  ;;  %vm3496_vm2 = vcmp.lt.s32.totalorder %v3476_v58, 2  ;;  %v3505_v36 = vsel %vm3497_vm1, %v3488_v20, %v3504_v11  ;;  %v3509_v55 = vsel %vm3497_vm1, %v3491_v13, %v3508_v43 }
 0x3f5   :  { %v3329_v5 = vshrl.u32 %v3311_v39, %v3327_v37  ;;  %v5766_v31 = vmin.u32 %v3425_v25, %v8694_v22  ;;  %v3506_v18 = vsel %vm3496_vm2, %v3503_v2, %v3505_v36  ;;  %v3510_v53 = vsel %vm3496_vm2, %v3507_v63, %v3509_v55 }
 0x3f6   :  { %vm3153_vm3 = vcmp.lt.s32.totalorder %v8403_v3, 0  ;;  %v3499_v24 = vsel %vm3495_vm15, %v3479_v47, %v3482_v0  ;;  %v3501_v61 = vsel %vm3497_vm1, %v3485_v48, %v3500_v44  ;;  %v3234_v4 = vmul.f32 %v3233_v49, %v3231_v1 }
 0x3f7   :  { %v8705_v21 = vmul.u32.u64.low %v3511_v9, %v3510_v53  ;;  %v8706_v27 = vmul.u32.u64.high %v3511_v9, %v3510_v53, %v8705_v21  ;;  %v3427_v46 = vclz %v5766_v31  ;;  %vm2737_vm4 = vcmp.lt.s32.totalorder %v8147_v52, 0 }
 0x3f8   :  { %v8708_v35 = vmul.u32.u64.low %v3511_v9, %v3506_v18  ;;  %v8709_v20 = vmul.u32.u64.high %v3511_v9, %v3506_v18, %v8708_v35  ;;  %v3016_v13 = vshll.u32 %v8489_v62, %v8584_v51  ;;  %v10415_v40 = vshll.u32 %v8536_v7, %v8615_v26 }
 0x3f9   :  { %v3328_v0 = vshll.u32 %v8632_v10, %v8671_v57  ;;  %v3334_v48 = vor.u32 4788187, %v3333_v34  ;;  %v10416_v49 = vsub.s32 32, %v8556_v56  ;;  %v10417_v37 = vshll.u32 %v8593_v17, 23 }
 0x3fa   :  { %v3122_v39 = vor.u32 %v3121_v54, %v10415_v40  ;;  %v5767_v11 = vadd.s32 4294967294, %v3427_v46  ;;  %v3502_v63 = vsel %vm3496_vm2, %v3499_v24, %v3501_v61  ;;  %v3018_v62 = vor.u32 %v8651_v12, %v3016_v13 }
 0x3fb   :  { %v2913_v1 = vshrl.u32 %v8581_v30, %v10416_v49  ;;  %v2918_v2 = vor.u32 4788187, %v10417_v37  ;;  %v3127_v51 = vand.u32 2147483647, %v8688_v50  ;;  %v3330_v7 = vor.u32 %v3329_v5, %v3328_v0 }
 0x3fc   :  { %vm3520_vm5 = vc.u32 %v8706_v27, %v8708_v35  ;;  %v3023_v26 = vand.u32 2147483647, %v8662_v32  ;;  %v3235_v10 = vxor.u32 2147483648, %v3234_v4  ;;  %vm5768_vm6 = vcmp.lt.s32.totalorder %v5767_v11, 0 }
 0x3fd   :  { %v3521_v30 = vadd.s32 1, %v8709_v20  ;;  %v3129_v57 = vcvt.s32.f32 %v3122_v39  ;;  %v3335_v17 = vand.u32 2147483647, %v3334_v48  ;;  %v3430_v54 = vsel %vm5768_vm6, 0, %v5767_v11 }
 0x3fe   :  { %v3518_v43 = vmul.u32 %v3511_v9, %v3502_v63  ;;  %v3415_v58 = vadd.s32 %v8646_v59, %v8654_v15  ;;  %v3431_v12 = vsub.s32 32, %v3430_v54  ;;  %v3435_v34 = vsub.s32 4294967266, %v3430_v54 }
 0x3ff   :  { %v3522_v50 = vsel %vm3520_vm5, %v3521_v30, %v8709_v20  ;;  %v3025_v25 = vcvt.s32.f32 %v3018_v62  ;;  %v3130_v44 = vmul.f32 %v3129_v57, %v3127_v51  ;;  %v3337_v47 = vcvt.s32.f32 %v3330_v7 }
 0x400   :  { %v3523_v36 = vadd.s32 %v3522_v50, %v3518_v43  ;;  %v3236_v32 = vsel %vm3153_vm3, %v3235_v10, %v3234_v4  ;;  %v3432_v55 = vshll.u32 %v8694_v22, %v3430_v54  ;;  %v3433_v5 = vshrl.u32 %v3415_v58, %v3431_v12  ;;  %v10432_v54 = vld [vmem:[#allocation15_spill] sm:$0xff] }
 0x401   :  { %v3436_v31 = vadd.s32 127, %v3435_v34  ;;  %v10418_v9 = vshll.u32 %v8457_v19, %v8556_v56  ;;  %v10419_v59 = vand.u32 2147483647, %v8403_v3  ;;  %v3338_v53 = vmul.f32 %v3337_v47, %v3335_v17 }
 0x402   :  { %v3524_v24 = vadd.s32 536870912, %v3523_v36  ;;  %v10422_v61 = vxor.u32 2147483648, %v8587_v45  ;;  %v3026_v21 = vmul.f32 %v3025_v25, %v3023_v26  ;;  %v3434_v4 = vor.u32 %v3433_v5, %v3432_v55 }
 0x403   :  { %v2914_v18 = vor.u32 %v2913_v1, %v10418_v9  ;;  %vm8743_vm7 = vcmp.le.f32.partialorder %v10419_v59, 0.7853982  ;;  %v3437_v46 = vshll.u32 %v3436_v31, 23  ;;  %v10423_v19 = vand.u32 2147483647, %v8147_v52 }
 0x404   :  { %v2820_v22 = vsel %vm2737_vm4, %v10422_v61, %v8587_v45  ;;  %v3131_v20 = vxor.u32 2147483648, %v3130_v44  ;;  %v3239_v13 = vsel %vm8743_vm7, %v8403_v3, %v3236_v32  ;;  %v8761_v40 = vshrl.u32 %v3524_v24, 30  ;;  %v10440_v24 = vld [vmem:[#allocation8_spill] sm:$0xff] }
 0x405   :  { %vm8754_vm8 = vcmp.le.f32.partialorder %v10423_v19, 0.7853982  ;;  %v2919_v39 = vand.u32 2147483647, %v2918_v2  ;;  %vm2945_vm9 = vcmp.lt.s32.totalorder %v8156_v23, 0  ;;  %vm3049_vm11 = vcmp.lt.s32.totalorder %v8246_v16, 0 }
 0x406   :  { %v3438_v45 = vor.u32 4788187, %v3437_v46  ;;  %v2823_v0 = vsel %vm8754_vm8, %v8147_v52, %v2820_v22  ;;  %v2921_v48 = vcvt.s32.f32 %v2914_v18  ;;  %v10426_v49 = vand.u32 2147483647, %v8156_v23  ;;  %v10444_v19 = vld [vmem:[#allocation10_spill] sm:$0xff] }
 0x407   :  { %v3339_v37 = vxor.u32 2147483648, %v3338_v53  ;;  %v3526_v11 = vshll.u32 %v8761_v40, 30  ;;  %v3027_v2 = vxor.u32 2147483648, %v3026_v21  ;;  %6182 = vcosq.f32 %v3239_v13 }
 0x408   :  { %vm8770_vm14 = vcmp.le.f32.partialorder %v10426_v49, 0.7853982  ;;  %v3439_v63 = vand.u32 2147483647, %v3438_v45  ;;  %v3441_v62 = vcvt.s32.f32 %v3434_v4  ;;  %vm2841_vm12 = vcmp.lt.s32.totalorder %v8150_v42, 0 }
 0x409   :  { %v3132_v51 = vsel %vm3049_vm11, %v3131_v20, %v3130_v44  ;;  %v3237_v7 = vsub.s32 4, %v8558_v41  ;;  %6184 = vsinq.f32 %v3239_v13  ;;  %v8779_v26 = vsub.s32 %v3523_v36, %v3526_v11  ;;  %v10436_v44 = vld [vmem:[#allocation9_spill] sm:$0xff] }
 0x40a   :  { %v2922_v10 = vmul.f32 %v2921_v48, %v2919_v39  ;;  %v10429_v30 = vand.u32 2147483647, %v8246_v16  ;;  %vm3257_vm15 = vcmp.lt.s32.totalorder %v8444_v28, 0  ;;  %v3442_v17 = vmul.f32 %v3441_v62, %v3439_v63  ;;  %v10445_v48 = vld [vmem:[#allocation7_spill] sm:$0xff] }
 0x40b   :  { %v2821_v43 = vsub.s32 4, %v10432_v54  ;;  %6186 = vcosq.f32 %v2823_v0  ;;  %v3340_v58 = vsel %vm3257_vm15, %v3339_v37, %v3338_v53  ;;  %v3529_v12 = vsub.s32 0, %v8779_v26  ;;  %v10446_v37 = vld [vmem:[#allocation17_spill] sm:$0xff] }
 0x40c   :  { %vm8783_vm13 = vcmp.le.f32.partialorder %v10429_v30, 0.7853982  ;;  %v10433_v50 = vand.u32 2147483647, %v8444_v28  ;;  %vm3361_vm1 = vcmp.lt.s32.totalorder %v10436_v44, 0  ;;  %v3443_v47 = vxor.u32 2147483648, %v3442_v17 }
 0x40d   :  { %v3135_v34 = vsel %vm8783_vm13, %v8246_v16, %v3132_v51  ;;  %v10437_v36 = vand.u32 2147483647, %v8150_v42  ;;  %v3028_v55 = vsel %vm2945_vm9, %v3027_v2, %v3026_v21  ;;  %v3238_v5 = vsel %vm3153_vm3, %v3237_v7, %v8558_v41 }
 0x40e   :  { %vm8797_vm0 = vcmp.le.f32.partialorder %v10433_v50, 0.7853982  ;;  %v3445_v31 = vsub.s32 4, %v8684_v6  ;;  %v5770_v9 = vmin.u32 %v3529_v12, %v8779_v26  ;;  %6188 = vsinq.f32 %v2823_v0 }
 0x40f   :  { %vm8804_vm2 = vcmp.le.f32.partialorder %v10437_v36, 0.7853982  ;;  %v2923_v18 = vxor.u32 2147483648, %v2922_v10  ;;  %v3343_v59 = vsel %vm8797_vm0, %v8444_v28, %v3340_v58  ;;  %v3444_v53 = vsel %vm3361_vm1, %v3443_v47, %v3442_v17 }
 0x410   :  { %v3133_v61 = vsub.s32 4, %v10440_v24  ;;  %6190 = vcosq.f32 %v3135_v34  ;;  %v10441_v22 = vand.u32 2147483647, %v10436_v44  ;;  %v3531_v21 = vclz %v5770_v9 }
 0x411   :  { %v3031_v4 = vsel %vm8770_vm14, %v8156_v23, %v3028_v55  ;;  %6192 = vsinq.f32 %v3135_v34  ;;  %v3240_v46 = vsel %vm8743_vm7, 0, %v3238_v5  ;;  %v3341_v20 = vsub.s32 4, %v10444_v19 }
 0x412   :  { %vm8823_vm5 = vcmp.le.f32.partialorder %v10441_v22, 0.7853982  ;;  %6194 = vcosq.f32 %v3343_v59  ;;  %v3446_v13 = vsel %vm3361_vm1, %v3445_v31, %v8684_v6  ;;  %v5771_v45 = vadd.s32 4294967294, %v3531_v21 }
 0x413   :  { %v3447_v39 = vsel %vm8823_vm5, %v10436_v44, %v3444_v53  ;;  %v2924_v0 = vsel %vm2841_vm12, %v2923_v18, %v2922_v10  ;;  %v2925_v49 = vsub.s32 4, %v10445_v48  ;;  %v3029_v15 = vsub.s32 4, %v10446_v37 }
 0x414   :  { %6196 = vsinq.f32 %v3343_v59  ;;  %v3134_v11 = vsel %vm3049_vm11, %v3133_v61, %v10440_v24  ;;  %v3244_v2 = vadd.s32 3, %v3240_v46  ;;  %vm5772_vm3 = vcmp.lt.s32.totalorder %v5771_v45, 0  ;;  %v6183_v51 = vpop.eup %6182 }
 0x415   :  { %6198 = vcosq.f32 %v3031_v4  ;;  %v3342_v6 = vsel %vm3257_vm15, %v3341_v20, %v10444_v19  ;;  %v3448_v63 = vsel %vm8823_vm5, 0, %v3446_v13  ;;  %v3534_v62 = vsel %vm5772_vm3, 0, %v5771_v45 }
 0x416   :  { %6200 = vcosq.f32 %v3447_v39  ;;  %v3519_v7 = vadd.s32 %v8708_v35, %v8706_v27  ;;  %v3535_v10 = vsub.s32 32, %v3534_v62  ;;  %v3539_v30 = vsub.s32 4294967266, %v3534_v62  ;;  %v6185_v17 = vpop.eup %6184 }
 0x417   :  { %6202 = vsinq.f32 %v3447_v39  ;;  %v2822_v58 = vsel %vm2737_vm4, %v2821_v43, %v10432_v54  ;;  %v2926_v12 = vsel %vm2841_vm12, %v2925_v49, %v10445_v48  ;;  %v2927_v34 = vsel %vm8804_vm2, %v8150_v42, %v2924_v0 }
 0x418   :  { %6204 = vsinq.f32 %v3031_v4  ;;  %v3344_v50 = vsel %vm8797_vm0, 0, %v3342_v6  ;;  %v3536_v27 = vshll.u32 %v8779_v26, %v3534_v62  ;;  %v3537_v35 = vshrl.u32 %v3519_v7, %v3535_v10  ;;  %v8865_v36 = vpop.eup %6186 }
 0x419   :  { %v3540_v47 = vadd.s32 127, %v3539_v30  ;;  %v3030_v54 = vsel %vm2945_vm9, %v3029_v15, %v10446_v37  ;;  %v3136_v43 = vsel %vm8783_vm13, 0, %v3134_v11  ;;  %v3452_v55 = vadd.s32 3, %v3448_v63 }
 0x41a   :  { %v3245_v5 = vand.u32 3, %v3244_v2  ;;  %v3538_v31 = vor.u32 %v3537_v35, %v3536_v27  ;;  %v3248_v18 = vxor.u32 2147483648, %v6185_v17  ;;  %v3251_v25 = vxor.u32 2147483648, %v6183_v51 }
 0x41b   :  { %v3541_v9 = vshll.u32 %v3540_v47, 23  ;;  %v2824_v26 = vsel %vm8754_vm8, 0, %v2822_v58  ;;  %6206 = vcosq.f32 %v2927_v34  ;;  %v3348_v59 = vadd.s32 3, %v3344_v50  ;;  %v8874_v53 = vpop.eup %6188 }
 0x41c   :  { %v2928_v24 = vsel %vm8804_vm2, 0, %v2926_v12  ;;  %6208 = vsinq.f32 %v2927_v34  ;;  %v3140_v61 = vadd.s32 3, %v3136_v43  ;;  %v3032_v41 = vsel %vm8770_vm14, 0, %v3030_v54 }
 0x41d   :  { %v3542_v57 = vor.u32 4788187, %v3541_v9  ;;  %v6191_v22 = vpop.eup %6190  ;;  %v8880_v21 = vand.u32 3, %v3452_v55  ;;  %vm3247_vm4 = vcmp.eq.s32.totalorder %v3245_v5, 0  ;;  %vm3250_vm6 = vcmp.eq.s32.totalorder %v3245_v5, 2 }
 0x41e   :  { %v6193_v56 = vpop.eup %6192  ;;  %v3545_v46 = vcvt.s32.f32 %v3538_v31  ;;  %v3249_v19 = vsel %vm3247_vm4, %v6183_v51, %v3248_v18  ;;  %v3252_v20 = vsel %vm3250_vm6, %v3251_v25, %v6185_v17  ;;  %v8882_v39 = vadd.s32 3, %v2824_v26 }
 0x41f   :  { %v3543_v4 = vand.u32 2147483647, %v3542_v57  ;;  %v6195_v13 = vpop.eup %6194  ;;  %v2932_v32 = vadd.s32 3, %v2928_v24  ;;  %v3349_v45 = vand.u32 3, %v3348_v59  ;;  %v3036_v48 = vadd.s32 3, %v3032_v41 }
 0x420   :  { %vm3246_vm7 = vcmp.lt.s32.totalorder %v3245_v5, 2  ;;  %v3141_v1 = vand.u32 3, %v3140_v61  ;;  %vm3465_vm8 = vcmp.lt.s32.totalorder %v8591_v29, 0  ;;  %v3549_v15 = vsub.s32 4, %v8761_v40 }
 0x421   :  { %v6197_v0 = vpop.eup %6196  ;;  %v3546_v49 = vmul.f32 %v3545_v46, %v3543_v4  ;;  %v3253_v11 = vsel %vm3246_vm7, %v3249_v19, %v3252_v20  ;;  %v3144_v2 = vxor.u32 2147483648, %v6193_v56  ;;  %v10447_v63 = vand.u32 2147483647, %v8591_v29 }
 0x422   :  { %v6199_v37 = vpop.eup %6198  ;;  %vm3455_vm11 = vcmp.eq.s32.totalorder %v8880_v21, 0  ;;  %v3147_v7 = vxor.u32 2147483648, %v6191_v22  ;;  %vm3351_vm14 = vcmp.eq.s32.totalorder %v3349_v45, 0  ;;  %v3352_v30 = vxor.u32 2147483648, %v6197_v0 }
 0x423   :  { %v6201_v6 = vpop.eup %6200  ;;  %vm8888_vm9 = vcmp.le.f32.partialorder %v10447_v63, 0.7853982  ;;  %v3547_v51 = vxor.u32 2147483648, %v3546_v49  ;;  %v3355_v17 = vxor.u32 2147483648, %v6195_v13  ;;  %vm3243_vm12 = vweird.f32 %v8403_v3 }
 0x424   :  { %v6203_v10 = vpop.eup %6202  ;;  %vm3454_vm13 = vcmp.lt.s32.totalorder %v8880_v21, 2  ;;  %vm3354_vm15 = vcmp.eq.s32.totalorder %v3349_v45, 2  ;;  %v8897_v34 = vsel %vm3243_vm12, nan, %v3253_v11  ;;  %vm3143_vm0 = vcmp.eq.s32.totalorder %v3141_v1, 0 }
 0x425   :  { %v6205_v58 = vpop.eup %6204  ;;  %v3548_v12 = vsel %vm3465_vm8, %v3547_v51, %v3546_v49  ;;  %v3550_v50 = vsel %vm3465_vm8, %v3549_v15, %v8761_v40  ;;  %vm3347_vm1 = vweird.f32 %v8444_v28  ;;  %v3145_v3 = vsel %vm3143_vm0, %v6191_v22, %v3144_v2  ;;  %v3567_v22 = vld [vmem:[%s10092_s5] sm:$0xff] }
 0x426   :  { %v3551_v27 = vsel %vm8888_vm9, %v8591_v29, %v3548_v12  ;;  %vm3146_vm2 = vcmp.eq.s32.totalorder %v3141_v1, 2  ;;  %v3456_v35 = vxor.u32 2147483648, %v6203_v10  ;;  %v3459_v47 = vxor.u32 2147483648, %v6201_v6 }
 0x427   :  { %6210 = vcosq.f32 %v3551_v27  ;;  %v3148_v54 = vsel %vm3146_vm2, %v3147_v7, %v6193_v56  ;;  %vm3451_vm5 = vweird.f32 %v10436_v44  ;;  %v3353_v43 = vsel %vm3351_vm14, %v6195_v13, %v3352_v30 }
 0x428   :  { %6212 = vsinq.f32 %v3551_v27  ;;  %v3356_v55 = vsel %vm3354_vm15, %v3355_v17, %v6197_v0  ;;  %v3037_v5 = vand.u32 3, %v3036_v48  ;;  %v6207_v40 = vpop.eup %6206  ;;  %v3552_v31 = vsel %vm8888_vm9, 0, %v3550_v50 }
 0x429   :  { %vm3458_vm3 = vcmp.eq.s32.totalorder %v8880_v21, 2  ;;  %v3040_v9 = vxor.u32 2147483648, %v6205_v58  ;;  %v3043_v18 = vxor.u32 2147483648, %v6199_v37  ;;  %v6209_v25 = vpop.eup %6208  ;;  %vm3350_vm4 = vcmp.lt.s32.totalorder %v3349_v45, 2 }
 0x42a   :  { %v8912_v26 = vand.u32 4294901760, %v8897_v34  ;;  %vm3139_vm6 = vweird.f32 %v8246_v16  ;;  %vm3142_vm7 = vcmp.lt.s32.totalorder %v3141_v1, 2  ;;  %v3457_v59 = vsel %vm3455_vm11, %v6201_v6, %v3456_v35  ;;  %v3568_v16 = vld [vmem:[%s10092_s5 + $0x8] sm:$0xff] }
 0x42b   :  { %v3460_v24 = vsel %vm3458_vm3, %v3459_v47, %v6203_v10  ;;  %v3357_v61 = vsel %vm3350_vm4, %v3353_v43, %v3356_v55  ;;  %v3149_v57 = vsel %vm3142_vm7, %v3145_v3, %v3148_v54  ;;  %vm3035_vm8 = vweird.f32 %v8156_v23 }
 0x42c   :  { %v3556_v41 = vadd.s32 3, %v3552_v31  ;;  %vm3039_vm9 = vcmp.eq.s32.totalorder %v3037_v5, 0  ;;  %vm3042_vm14 = vcmp.eq.s32.totalorder %v3037_v5, 2  ;;  %v2933_v56 = vand.u32 3, %v2932_v32  ;;  %v3570_v31 = vld [vmem:[%s10092_s5 + $0x18] sm:$0xff] }
 0x42d   :  { %v3041_v4 = vsel %vm3039_vm9, %v6199_v37, %v3040_v9  ;;  %v3044_v46 = vsel %vm3042_vm14, %v3043_v18, %v6205_v58  ;;  %v2936_v19 = vxor.u32 2147483648, %v6209_v25  ;;  %v2939_v20 = vxor.u32 2147483648, %v6207_v40 }
 0x42e   :  { %v3461_v13 = vsel %vm3454_vm13, %v3457_v59, %v3460_v24  ;;  %v3150_v45 = vsel %vm3139_vm6, nan, %v3149_v57  ;;  %v2829_v0 = vand.u32 3, %v8882_v39  ;;  %v3580_v48 = vsel %vm2032_vm10, %v3567_v22, 0 }
 0x42f   :  { %v3358_v49 = vsel %vm3347_vm1, nan, %v3357_v61  ;;  %vm3038_vm11 = vcmp.lt.s32.totalorder %v3037_v5, 2  ;;  %v2832_v32 = vxor.u32 2147483648, %v8874_v53  ;;  %v2835_v1 = vxor.u32 2147483648, %v8865_v36 }
 0x430   :  { %v3557_v37 = vand.u32 3, %v3556_v41  ;;  %v3045_v15 = vsel %vm3038_vm11, %v3041_v4, %v3044_v46  ;;  %vm2935_vm12 = vcmp.eq.s32.totalorder %v2933_v56, 0  ;;  %vm2938_vm15 = vcmp.eq.s32.totalorder %v2933_v56, 2 }
 0x431   :  { %vm3555_vm13 = vweird.f32 %v8591_v29  ;;  %v3462_v21 = vsel %vm3451_vm5, nan, %v3461_v13  ;;  %v2937_v28 = vsel %vm2935_vm12, %v6207_v40, %v2936_v19  ;;  %v2940_v39 = vsel %vm2938_vm15, %v2939_v20, %v6209_v25 }
 0x432   :  { %v8937_v11 = vand.u32 4294901760, %v3580_v48  ;;  %v8939_v2 = vand.u32 4294901760, %v3358_v49  ;;  %v8941_v6 = vand.u32 4294901760, %v3150_v45  ;;  %vm2831_vm0 = vcmp.eq.s32.totalorder %v2829_v0, 0 }
 0x433   :  { %vm2834_vm1 = vcmp.eq.s32.totalorder %v2829_v0, 2  ;;  %vm2934_vm2 = vcmp.lt.s32.totalorder %v2933_v56, 2  ;;  %v2833_v63 = vsel %vm2831_vm0, %v8865_v36, %v2832_v32  ;;  %v3583_v51 = vsel %vm2032_vm10, %v3568_v16, 0  ;;  %v3569_v36 = vld [vmem:[%s10092_s5 + $0x10] sm:$0xff] }
 0x434   :  { %v2836_v62 = vsel %vm2834_vm1, %v2835_v1, %v8874_v53  ;;  %v6211_v7 = vpop.eup %6210  ;;  %v8946_v44 = vand.u32 4294901760, %v3462_v21  ;;  %v3046_v10 = vsel %vm3035_vm8, nan, %v3045_v15  ;;  %vm2931_vm5 = vweird.f32 %v8150_v42 }
 0x435   :  { %v2941_v30 = vsel %vm2934_vm2, %v2937_v28, %v2940_v39  ;;  %v6213_v17 = vpop.eup %6212  ;;  %vm3558_vm3 = vcmp.lt.s32.totalorder %v3557_v37, 2  ;;  %v3563_v58 = vxor.u32 2147483648, %v6211_v7  ;;  %vm2830_vm4 = vcmp.lt.s32.totalorder %v2829_v0, 2 }
 0x436   :  { %v8952_v12 = vsub.f32 %v3580_v48, %v8937_v11  ;;  %v3560_v53 = vxor.u32 2147483648, %v6213_v17  ;;  %vm3562_vm6 = vcmp.eq.s32.totalorder %v3557_v37, 2  ;;  %v2837_v50 = vsel %vm2830_vm4, %v2833_v63, %v2836_v62 }
 0x437   :  { %v8957_v27 = vand.u32 4294901760, %v3583_v51  ;;  %vm3559_vm7 = vcmp.eq.s32.totalorder %v3557_v37, 0  ;;  %v3564_v23 = vsel %vm3562_vm6, %v3563_v58, %v6213_v17  ;;  %v8959_v42 = vand.u32 4294901760, %v3046_v10 }
 0x438   :  { %v2942_v3 = vsel %vm2931_vm5, nan, %v2941_v30  ;;  %v3561_v35 = vsel %vm3559_vm7, %v6211_v7, %v3560_v53  ;;  %v8962_v47 = vsub.f32 %v3462_v21, %v8946_v44  ;;  %vm2827_vm8 = vweird.f32 %v8147_v52 }
 0x439   :  { %v3586_v54 = vsel %vm2032_vm10, %v3569_v36, 0  ;;  %v3565_v43 = vsel %vm3558_vm3, %v3561_v35, %v3564_v23  ;;  %v2838_v55 = vsel %vm2827_vm8, nan, %v2837_v50  ;;  %v3666_v5 = vand.u32 4294901760, %v8952_v12 }
 0x43a   :  { %v8969_v40 = vsub.f32 %v3358_v49, %v8939_v2  ;;  %v3566_v9 = vsel %vm3555_vm13, nan, %v3565_v43  ;;  %v8976_v18 = vand.u32 4294901760, %v2942_v3  ;;  %v8979_v52 = vsub.f32 %v3583_v51, %v8957_v27 }
 0x43b   :  { %v8981_v25 = vand.u32 4294901760, %v3566_v9  ;;  %v8985_v59 = vsub.f32 %v8897_v34, %v8912_v26  ;;  %v8987_v24 = vand.u32 4294901760, %v3586_v54  ;;  %v8989_v61 = vand.u32 4294901760, %v2838_v55 }
 0x43c   :  { %v3740_v57 = vand.u32 4294901760, %v8962_v47  ;;  %v8993_v29 = vsub.f32 %v3150_v45, %v8941_v6  ;;  %v3589_v22 = vsel %vm2032_vm10, %v3570_v31, 0  ;;  %v8998_v41 = vsub.f32 %v3046_v10, %v8959_v42 }
 0x43d   :  { %3616 = vmatprep.subr.mxu0 %v8981_v25  ;;  %v3667_v34 = vsub.f32 %v8952_v12, %v3666_v5  ;;  %v9004_v56 = vsub.f32 %v3566_v9, %v8981_v25  ;;  %v3746_v4 = vand.u32 4294901760, %v8969_v40  ;;  %v3677_v46 = vand.u32 4294901760, %v8979_v52 }
 0x43e   :  { %3618 = vmatpush1.msra.mxu0 %v8946_v44  ;;  %v9010_v19 = vsub.f32 %v2942_v3, %v8976_v18  ;;  %v3752_v13 = vand.u32 4294901760, %v8985_v59  ;;  %v9016_v45 = vsub.f32 %v3586_v54, %v8987_v24  ;;  %v9018_v0 = vand.u32 4294901760, %v3589_v22 }
 0x43f   :  { %3620 = vmatprep.subr.mxu0 %v8939_v2  ;;  %v3734_v20 = vand.u32 4294901760, %v9004_v56  ;;  %v9022_v48 = vsub.f32 %v2838_v55, %v8989_v61  ;;  %v3741_v49 = vsub.f32 %v8962_v47, %v3740_v57  ;;  %v3758_v32 = vand.u32 4294901760, %v8993_v29 }
 0x440   :  { %3622 = vmatpush1.msra.mxu0 %v8912_v26  ;;  %v3668_v1 = vand.u32 4294901760, %v3667_v34  ;;  %v3747_v15 = vsub.f32 %v8969_v40, %v3746_v4  ;;  %v3764_v16 = vand.u32 4294901760, %v8998_v41  ;;  %v3678_v21 = vsub.f32 %v8979_v52, %v3677_v46 }
 0x441   :  { %3624 = vmatprep.subr.mxu0 %v8941_v6  ;;  %v3735_v37 = vsub.f32 %v9004_v56, %v3734_v20  ;;  %v3770_v28 = vand.u32 4294901760, %v9010_v19  ;;  %v3753_v63 = vsub.f32 %v8985_v59, %v3752_v13  ;;  %v3688_v62 = vand.u32 4294901760, %v9016_v45 }
 0x442   :  { %3626 = vmatpush1.msra.mxu0 %v8959_v42  ;;  %v9045_v51 = vsub.f32 %v3589_v22, %v9018_v0  ;;  %v3742_v7 = vand.u32 4294901760, %v3741_v49  ;;  %v3759_v10 = vsub.f32 %v8993_v29, %v3758_v32  ;;  %v3776_v30 = vand.u32 4294901760, %v9022_v48  ;;  %v3572_v49 = vld [vmem:[%s10093_s6 + $0x8] sm:$0xff] }
 0x443   :  { %3628 = vmatprep.subr.mxu0 %v8976_v18  ;;  %v3736_v39 = vand.u32 4294901760, %v3735_v37  ;;  %v3748_v17 = vand.u32 4294901760, %v3747_v15  ;;  %v3765_v58 = vsub.f32 %v8998_v41, %v3764_v16  ;;  %v3679_v36 = vand.u32 4294901760, %v3678_v21 }
 0x444   :  { %3630 = vmatpush1.msra.mxu0 %v8989_v61  ;;  %v3771_v53 = vsub.f32 %v9010_v19, %v3770_v28  ;;  %v3754_v50 = vand.u32 4294901760, %v3753_v63  ;;  %v3689_v23 = vsub.f32 %v9016_v45, %v3688_v62  ;;  %v3699_v3 = vand.u32 4294901760, %v9045_v51 }
 0x445   :  { %3669 = vmatmul.mubr.f32.vlgmr.msra.gmra.mxu0 %v3668_v1  ;;  %3737 = vmatprep.subr.mxu1 %v3736_v39  ;;  %v10450_v35 = vmov 0.0   ;;  %v3760_v54 = vand.u32 4294901760, %v3759_v10  ;;  %v3777_v43 = vsub.f32 %v9022_v48, %v3776_v30  ;;  %v3766_v55 = vand.u32 4294901760, %v3765_v58 }
 0x446   :  { %3867 = vmatprep.subr.mxu0 %v9004_v56  ;;  %3743 = vmatpush1.msra.mxu1 %v3742_v7  ;;  %v3772_v31 = vand.u32 4294901760, %v3771_v53  ;;  %v3690_v9 = vand.u32 4294901760, %v3689_v23  ;;  %v3700_v22 = vsub.f32 %v9045_v51, %v3699_v3  ;;  %v3573_v53 = vld [vmem:[%s10093_s6 + $0x10] sm:$0xff] }
 0x447   :  { %3870 = vmatpush1.msra.mxu0 %v8962_v47  ;;  %3749 = vmatprep.subr.mxu1 %v3748_v17  ;;  %v3778_v34 = vand.u32 4294901760, %v3777_v43 }
 0x448   :  { %3873 = vmatprep.subr.mxu0 %v8969_v40  ;;  %3674 = vmatprep.mubr.f32.mxu0 %v10450_v35  ;;  %v3701_v56 = vand.u32 4294901760, %v3700_v22 }
 0x449   :  { %3755 = vmatpush1.msra.mxu1 %v3754_v50  ;;  %3876 = vmatpush1.msra.mxu0 %v8985_v59 }
 0x44a   :  { %3680 = vmatmul.mubr.f32.gmra.mxu0 %v3679_v36  ;;  %3761 = vmatprep.subr.mxu1 %v3760_v54 }
 0x44b   :  { %3879 = vmatprep.subr.mxu0 %v8993_v29  ;;  %3767 = vmatpush1.msra.mxu1 %v3766_v55 }
 0x44c   :  { %3882 = vmatpush1.msra.mxu0 %v8998_v41  ;;  %3773 = vmatprep.subr.mxu1 %v3772_v31 }
 0x44d   :  { %3885 = vmatprep.subr.mxu0 %v9010_v19  ;;  %3685 = vmatprep.mubr.f32.mxu0 %v10450_v35 }
 0x44e   :  { %3779 = vmatpush1.msra.mxu1 %v3778_v34  ;;  %3888 = vmatpush1.msra.mxu0 %v9022_v48 }
 0x44f   :  { %3691 = vmatmul.mubr.f32.gmra.mxu0 %v3690_v9  ;;  %3814 = vmatmul.mubr.f32.vlgmr.msra.gmra.mxu1 %v8937_v11 }
 0x450   :  { %3979 = vmatprep.subr.mxu1 %v8981_v25  ;;  %4090 = vmatprep.subr.mxu0 %v3734_v20 }
 0x451   :  { %3981 = vmatpush1.msra.mxu1 %v8946_v44  ;;  %3696 = vmatprep.mubr.f32.mxu0 %v10450_v35 }
 0x452   :  { %3983 = vmatprep.subr.mxu1 %v8939_v2  ;;  %3819 = vmatprep.mubr.f32.mxu1 %v10450_v35 }
 0x453   :  { %3985 = vmatpush1.msra.mxu1 %v8912_v26  ;;  %3702 = vmatmul.mubr.f32.gmra.mxu0 %v3701_v56 }
 0x454   :  { %3821 = vmatmul.mubr.f32.gmra.mxu1 %v8957_v27  ;;  %3987 = vmatprep.subr.mxu1 %v8941_v6 }
 0x455   :  { %3989 = vmatpush1.msra.mxu1 %v8959_v42  ;;  %3826 = vmatprep.mubr.f32.mxu1 %v10450_v35 }
 0x456   :  { %3991 = vmatprep.subr.mxu1 %v8976_v18  ;;  %3921 = vmatprep.mubr.f32.mxu0 %v10450_v35 }
 0x457   :  { %3993 = vmatpush1.msra.mxu1 %v8989_v61  ;;  %3924 = vmatmul.mubr.f32.vlgmr.msra.gmra.mxu0 %v8952_v12 }
 0x458   :  { %3828 = vmatmul.mubr.f32.gmra.mxu1 %v8987_v24  ;;  %4094 = vmatpush1.msra.mxu0 %v3740_v57 }
 0x459   :  { %4205 = vmatprep.subr.mxu1 %v8981_v25  ;;  %4098 = vmatprep.subr.mxu0 %v3746_v4 }
 0x45a   :  { %4102 = vmatpush1.msra.mxu0 %v3752_v13  ;;  %3833 = vmatprep.mubr.f32.mxu1 %v10450_v35  ;;  %v3571_v13 = vld [vmem:[%s10093_s6] sm:$0xff] }
 0x45b   :  { %3929 = vmatprep.mubr.f32.mxu0 %v10450_v35  ;;  %4106 = vmatprep.subr.mxu0 %v3758_v32 }
 0x45c   :  { %3835 = vmatmul.mubr.f32.gmra.mxu1 %v9018_v0  ;;  %3932 = vmatmul.mubr.f32.gmra.mxu0 %v8979_v52 }
 0x45d   :  { %4110 = vmatpush1.msra.mxu0 %v3764_v16  ;;  %3937 = vmatprep.mubr.f32.mxu0 %v10450_v35 }
 0x45e   :  { %4114 = vmatprep.subr.mxu0 %v3770_v28  ;;  %4026 = vmatprep.mubr.f32.mxu1 %v10450_v35 }
 0x45f   :  { %4118 = vmatpush1.msra.mxu0 %v3776_v30 }
 0x460   :  { %3940 = vmatmul.mubr.f32.gmra.mxu0 %v9016_v45  ;;  %4030 = vmatmul.mubr.f32.vlgmr.msra.gmra.mxu1 %v3666_v5 }
 0x461   :  { %4207 = vmatpush1.msra.mxu1 %v8946_v44  ;;  %3945 = vmatprep.mubr.f32.mxu0 %v10450_v35 }
 0x462   :  { %4209 = vmatprep.subr.mxu1 %v8939_v2  ;;  %4035 = vmatprep.mubr.f32.mxu1 %v10450_v35 }
 0x463   :  { %4211 = vmatpush1.msra.mxu1 %v8912_v26 }
 0x464   :  { %4213 = vmatprep.subr.mxu1 %v8941_v6  ;;  %3948 = vmatmul.mubr.f32.gmra.mxu0 %v9045_v51 }
 0x465   :  { %4039 = vmatmul.mubr.f32.gmra.mxu1 %v3677_v46  ;;  %4151 = vmatprep.mubr.f32.mxu0 %v10450_v35 }
 0x466   :  { %4215 = vmatpush1.msra.mxu1 %v8959_v42  ;;  %4044 = vmatprep.mubr.f32.mxu1 %v10450_v35 }
 0x467   :  { %4217 = vmatprep.subr.mxu1 %v8976_v18 }
 0x468   :  { %4219 = vmatpush1.msra.mxu1 %v8989_v61  ;;  %4153 = vmatmul.mubr.f32.vlgmr.msra.gmra.mxu0 %v8937_v11 }
 0x469   :  { %4048 = vmatmul.mubr.f32.gmra.mxu1 %v3688_v62  ;;  %4158 = vmatprep.mubr.f32.mxu0 %v10450_v35 }
 0x46a   :  { %4053 = vmatprep.mubr.f32.mxu1 %v10450_v35 }
 0x46c   :  { %4160 = vmatmul.mubr.f32.gmra.mxu0 %v8957_v27 }
 0x46d   :  { %4057 = vmatmul.mubr.f32.gmra.mxu1 %v3699_v3  ;;  %4165 = vmatprep.mubr.f32.mxu0 %v10450_v35 }
 0x46e   :  { %4252 = vmatprep.mubr.f32.mxu1 %v10450_v35 }
 0x470   :  { %4167 = vmatmul.mubr.f32.gmra.mxu0 %v8987_v24 }
 0x471   :  { %4254 = vmatmul.mubr.f32.vlgmr.msra.gmra.mxu1 %v8937_v11  ;;  %4172 = vmatprep.mubr.f32.mxu0 %v10450_v35 }
 0x472   :  { %4259 = vmatprep.mubr.f32.mxu1 %v10450_v35 }
 0x474   :  { %4174 = vmatmul.mubr.f32.gmra.mxu0 %v9018_v0 }
 0x475   :  { %4261 = vmatmul.mubr.f32.gmra.mxu1 %v8957_v27  ;;  %5201 = vmatprep.mubr.f32.mxu0 %v10450_v35 }
 0x476   :  { %4266 = vmatprep.mubr.f32.mxu1 %v10450_v35 }
 0x479   :  { %4268 = vmatmul.mubr.f32.gmra.mxu1 %v8987_v24 }
 0x47a   :  { %4273 = vmatprep.mubr.f32.mxu1 %v10450_v35 }
 0x47d   :  { %4275 = vmatmul.mubr.f32.gmra.mxu1 %v9018_v0 }
 0x47e   :  { %5317 = vmatprep.mubr.f32.mxu1 %v10450_v35 }
 0x505   :  { %v3670_v26 = vpop.f32.mrf.mxu0 }
 0x506   :  { %v3671_v48 = vadd.f32 %v3670_v26, %v3571_v13 }
 0x507   :  { %v3672_v11 = vpop.f32.mrf.mxu0 }
 0x508   :  { %v3673_v15 = vadd.f32 %v3672_v11, %v3572_v49 }
 0x50a   :  { %v3681_v2 = vpop.f32.mrf.mxu0 }
 0x50b   :  { %v3682_v55 = vadd.f32 %v3681_v2, %v3573_v53 }
 0x50c   :  { %v9154_v6 = vpop.f32.mrf.mxu0 }
 0x50f   :  { %v9156_v44 = vpop.f32.mrf.mxu0  ;;  %v3815_v12 = vpop.f32.mrf.mxu1 }
 0x510   :  { %v3816_v16 = vadd.f32 %v3815_v12, %v3671_v48 }
 0x511   :  { %v9158_v27 = vpop.f32.mrf.mxu0  ;;  %v3817_v42 = vpop.f32.mrf.mxu1 }
 0x512   :  { %v3818_v39 = vadd.f32 %v3817_v42, %v3673_v15 }
 0x513   :  { %v9160_v47 = vpop.f32.mrf.mxu0 }
 0x514   :  { %v3822_v5 = vpop.f32.mrf.mxu1 }
 0x515   :  { %v9162_v40 = vpop.f32.mrf.mxu0  ;;  %v3823_v34 = vadd.f32 %v3822_v5, %v3682_v55 }
 0x516   :  { %v9164_v18 = vpop.f32.mrf.mxu1 }
 0x517   :  { %v3925_v52 = vpop.f32.mrf.mxu0 }
 0x518   :  { %v9166_v25 = vpop.f32.mrf.mxu1  ;;  %v3926_v63 = vadd.f32 %v3925_v52, %v3816_v16 }
 0x519   :  { %v3927_v59 = vpop.f32.mrf.mxu0 }
 0x51a   :  { %v9168_v24 = vpop.f32.mrf.mxu1  ;;  %v3928_v51 = vadd.f32 %v3927_v59, %v3818_v39 }
 0x51c   :  { %v9170_v61 = vpop.f32.mrf.mxu1  ;;  %v3933_v57 = vpop.f32.mrf.mxu0 }
 0x51d   :  { %v3934_v11 = vadd.f32 %v3933_v57, %v3823_v34 }
 0x51e   :  { %v9172_v29 = vpop.f32.mrf.mxu1  ;;  %v9174_v41 = vpop.f32.mrf.mxu0 }
 0x520   :  { %v9176_v4 = vpop.f32.mrf.mxu0  ;;  %v4031_v46 = vpop.f32.mrf.mxu1 }
 0x521   :  { %v4032_v7 = vadd.f32 %v4031_v46, %v3926_v63 }
 0x522   :  { %v9178_v19 = vpop.f32.mrf.mxu0  ;;  %v4033_v20 = vpop.f32.mrf.mxu1 }
 0x523   :  { %v4034_v17 = vadd.f32 %v4033_v20, %v3928_v51 }
 0x524   :  { %v9183_v45 = vpop.f32.mrf.mxu0 }
 0x525   :  { %v4040_v0 = vpop.f32.mrf.mxu1 }
 0x526   :  { %v9188_v32 = vpop.f32.mrf.mxu0  ;;  %v4041_v59 = vadd.f32 %v4040_v0, %v3934_v11 }
 0x527   :  { %v9190_v1 = vpop.f32.mrf.mxu1 }
 0x528   :  { %v4154_v21 = vpop.f32.mrf.mxu0 }
 0x529   :  { %v9192_v37 = vpop.f32.mrf.mxu1  ;;  %v4155_v58 = vadd.f32 %v4154_v21, %v4032_v7  ;;  %v10451_v7 = vmov 920167782  }
 0x52a   :  { %v4156_v10 = vpop.f32.mrf.mxu0 }
 0x52b   :  { %v9194_v28 = vpop.f32.mrf.mxu1  ;;  %v4157_v50 = vadd.f32 %v4156_v10, %v4034_v17 }
 0x52c   :  { %v4161_v42 = vpop.f32.mrf.mxu0 }
 0x52d   :  { %v9196_v62 = vpop.f32.mrf.mxu1  ;;  %v4162_v49 = vadd.f32 %v4161_v42, %v4041_v59 }
 0x52f   :  { %v9198_v30 = vpop.f32.mrf.mxu1 }
 0x531   :  { %v4255_v36 = vpop.f32.mrf.mxu1 }
 0x532   :  { %v9203_v23 = vadd.f32 %v4255_v36, %v4155_v58 }
 0x533   :  { %v4257_v3 = vpop.f32.mrf.mxu1 }
 0x534   :  { %v4284_v54 = vand.u32 2139095040, %v9203_v23  ;;  %v9206_v43 = vadd.f32 %v4257_v3, %v4157_v50  ;;  %v10235_v52 = vand.u32 2147483647, %v9203_v23 }
 0x535   :  { %v4262_v48 = vpop.f32.mrf.mxu1 }
 0x536   :  { %v4285_v31 = vshrl.u32 %v4284_v54, 23  ;;  %v4388_v9 = vand.u32 2139095040, %v9206_v43  ;;  %v4288_v2 = vand.u32 8388607, %v10235_v52  ;;  %v9217_v16 = vadd.f32 %v4262_v48, %v4162_v49 }
 0x538   :  { %v5773_v22 = vadd.s32 4294967169, %v4285_v31  ;;  %v4389_v56 = vshrl.u32 %v4388_v9, 23  ;;  %v4492_v9 = vand.u32 2139095040, %v9217_v16  ;;  %v4289_v11 = vor.u32 8388608, %v4288_v2 }
 0x53a   :  { %v4291_v26 = vadd.s32 1, %v5773_v22  ;;  %v5777_v12 = vadd.s32 4294967169, %v4389_v56  ;;  %v3574_v22 = vld [vmem:[%s10093_s6 + $0x18] sm:$0xff] }
 0x53c   :  { %vm4292_vm9 = vcmp.gt.s32.totalorder %v4291_v26, 0  ;;  %v4395_v20 = vadd.s32 1, %v5777_v12 }
 0x53d   :  { %v4293_v46 = vsel %vm4292_vm9, %v4291_v26, 0 }
 0x53e   :  { %v4295_v13 = vand.u32 31, %v4293_v46  ;;  %v9214_v5 = vshrl.u32 %v4293_v46, 5  ;;  %vm4396_vm14 = vcmp.gt.s32.totalorder %v4395_v20, 0  ;;  %v3684_v46 = vadd.f32 %v9154_v6, %v3574_v22 }
 0x53f   :  { %v4397_v3 = vsel %vm4396_vm14, %v4395_v20, 0  ;;  %v4493_v20 = vshrl.u32 %v4492_v9, 23 }
 0x540   :  { %v9212_v15 = vsub.s32 32, %v4295_v13  ;;  %v4301_v57 = vshll.u32 %v10404_v8, %v4295_v13  ;;  %v4304_v39 = vshll.u32 %v10405_v33, %v4295_v13  ;;  %v4307_v51 = vshll.u32 %v10406_v14, %v4295_v13 }
 0x541   :  { %v4310_v17 = vshll.u32 %v10451_v7, %v4295_v13  ;;  %v4298_v36 = vshll.u32 %v10370_v60, %v4295_v13  ;;  %v4399_v31 = vand.u32 31, %v4397_v3  ;;  %vm4316_vm11 = vcmp.lt.s32.totalorder %v9214_v5, 4 }
 0x542   :  { %v4299_v0 = vshrl.u32 %v10404_v8, %v9212_v15  ;;  %v4302_v21 = vshrl.u32 %v10405_v33, %v9212_v15  ;;  %v4305_v63 = vshrl.u32 %v10406_v14, %v9212_v15  ;;  %v4308_v10 = vshrl.u32 %v10451_v7, %v9212_v15 }
 0x543   :  { %v4311_v58 = vshrl.u32 %v10372_v38, %v9212_v15  ;;  %vm4313_vm12 = vcmp.lt.s32.totalorder %v9214_v5, 1  ;;  %vm4315_vm15 = vcmp.lt.s32.totalorder %v9214_v5, 3  ;;  %v9251_v59 = vsub.s32 32, %v4399_v31 }
 0x544   :  { %v9233_v53 = vor.u32 %v4302_v21, %v4301_v57  ;;  %v4306_v50 = vor.u32 %v4305_v63, %v4304_v39  ;;  %v4309_v54 = vor.u32 %v4308_v10, %v4307_v51  ;;  %v4300_v34 = vor.u32 %v4299_v0, %v4298_v36 }
 0x545   :  { %v4312_v55 = vor.u32 %v4311_v58, %v4310_v17  ;;  %vm4314_vm13 = vcmp.lt.s32.totalorder %v9214_v5, 2  ;;  %v3825_v49 = vadd.f32 %v9164_v18, %v3684_v46  ;;  %v9263_v57 = vshll.u32 %v4289_v11, 8  ;;  %v4163_v46 = vpop.f32.mrf.mxu0 }
 0x546   :  { %v4322_v56 = vsel %vm4316_vm11, %v4309_v54, 920167782  ;;  %v4325_v12 = vsel %vm4313_vm12, %v9233_v53, %v4306_v50  ;;  %v4321_v13 = vsel %vm4313_vm12, %v4300_v34, %v9233_v53  ;;  %v4412_v6 = vshrl.u32 %v10451_v7, %v9251_v59 }
 0x547   :  { %v4326_v26 = vsel %vm4316_vm11, %v4312_v55, 1326507024  ;;  %v4323_v48 = vsel %vm4315_vm15, %v4306_v50, %v4322_v56  ;;  %v3936_v0 = vadd.f32 %v9174_v41, %v3825_v49  ;;  %v10234_v39 = vand.u32 2147483647, %v9206_v43 }
 0x548   :  { %v4327_v42 = vsel %vm4315_vm15, %v4309_v54, %v4326_v26  ;;  %v4324_v21 = vsel %vm4314_vm13, %v4321_v13, %v4323_v48  ;;  %v5781_v63 = vadd.s32 4294967169, %v4493_v20  ;;  %v4411_v18 = vshll.u32 %v10406_v14, %v4399_v31 }
 0x549   :  { %v4328_v2 = vsel %vm4314_vm13, %v4325_v12, %v4327_v42  ;;  %v4415_v17 = vshrl.u32 %v10372_v38, %v9251_v59  ;;  %v9278_v58 = vshrl.u32 %v4397_v3, 5  ;;  %v4403_v41 = vshrl.u32 %v10404_v8, %v9251_v59 }
 0x54a   :  { %v9272_v51 = vmul.u32.u64.low %v9263_v57, %v4328_v2  ;;  %v9273_v10 = vmul.u32.u64.high %v9263_v57, %v4328_v2, %v9272_v51  ;;  %v4406_v36 = vshrl.u32 %v10405_v33, %v9251_v59  ;;  %v4409_v54 = vshrl.u32 %v10406_v14, %v9251_v59 }
 0x54b   :  { %v9287_v55 = vmul.u32.u64.low %v9263_v57, %v4324_v21  ;;  %v9288_v9 = vmul.u32.u64.high %v9263_v57, %v4324_v21, %v9287_v55  ;;  %v4413_v22 = vor.u32 %v4412_v6, %v4411_v18  ;;  %v4414_v56 = vshll.u32 %v10451_v7, %v4399_v31 }
 0x54c   :  { %v4392_v3 = vand.u32 8388607, %v10234_v39  ;;  %v4402_v26 = vshll.u32 %v10370_v60, %v4399_v31  ;;  %v4405_v11 = vshll.u32 %v10404_v8, %v4399_v31  ;;  %v4408_v12 = vshll.u32 %v10405_v33, %v4399_v31 }
 0x54d   :  { %v4043_v42 = vadd.f32 %v9190_v1, %v3936_v0  ;;  %v4416_v20 = vor.u32 %v4415_v17, %v4414_v56  ;;  %v4499_v13 = vadd.s32 1, %v5781_v63  ;;  %vm4420_vm0 = vcmp.lt.s32.totalorder %v9278_v58, 4  ;;  %v4264_v1 = vpop.f32.mrf.mxu1 }
 0x54e   :  { %v4404_v48 = vor.u32 %v4403_v41, %v4402_v26  ;;  %v4407_v49 = vor.u32 %v4406_v36, %v4405_v11  ;;  %v4410_v2 = vor.u32 %v4409_v54, %v4408_v12  ;;  %v4318_v6 = vsel %vm4316_vm11, %v4306_v50, 2102212464 }
 0x54f   :  { %v4426_v21 = vsel %vm4420_vm0, %v4413_v22, 920167782  ;;  %v4164_v51 = vadd.f32 %v4163_v46, %v4043_v42  ;;  %v4297_v31 = vshrl.u32 %v10370_v60, %v9212_v15  ;;  %v4393_v18 = vor.u32 8388608, %v4392_v3 }
 0x550   :  { %vm4500_vm1 = vcmp.gt.s32.totalorder %v4499_v13, 0  ;;  %vm4417_vm2 = vcmp.lt.s32.totalorder %v9278_v58, 1  ;;  %vm4419_vm5 = vcmp.lt.s32.totalorder %v9278_v58, 3  ;;  %v4430_v0 = vsel %vm4420_vm0, %v4416_v20, 1326507024 }
 0x551   :  { %v4501_v63 = vsel %vm4500_vm1, %v4499_v13, 0  ;;  %v4317_v50 = vsel %vm4313_vm12, %v4297_v31, %v4300_v34  ;;  %v4319_v17 = vsel %vm4315_vm15, %v9233_v53, %v4318_v6  ;;  %v4425_v15 = vsel %vm4417_vm2, %v4404_v48, %v4407_v49  ;;  %v3575_v6 = vld [vmem:[%s10093_s6 + $0x20] sm:$0xff] }
 0x552   :  { %v4427_v41 = vsel %vm4419_vm5, %v4410_v2, %v4426_v21  ;;  %vm4338_vm3 = vc.u32 %v9273_v10, %v9287_v55  ;;  %v4339_v36 = vadd.s32 1, %v9288_v9  ;;  %v9321_v54 = vadd.f32 %v4264_v1, %v4164_v51 }
 0x553   :  { %vm4418_vm4 = vcmp.lt.s32.totalorder %v9278_v58, 2  ;;  %v4429_v34 = vsel %vm4417_vm2, %v4407_v49, %v4410_v2  ;;  %v4431_v53 = vsel %vm4419_vm5, %v4413_v22, %v4430_v0  ;;  %v4503_v56 = vand.u32 31, %v4501_v63 }
 0x554   :  { %v4320_v3 = vsel %vm4314_vm13, %v4317_v50, %v4319_v17  ;;  %v4428_v26 = vsel %vm4418_vm4, %v4425_v15, %v4427_v41  ;;  %v9332_v11 = vshll.u32 %v4393_v18, 8  ;;  %v4340_v12 = vsel %vm4338_vm3, %v4339_v36, %v9288_v9  ;;  %v3576_v9 = vld [vmem:[%s10093_s6 + $0x28] sm:$0xff] }
 0x555   :  { %v4432_v42 = vsel %vm4418_vm4, %v4429_v34, %v4431_v53  ;;  %v4596_v46 = vand.u32 2139095040, %v9321_v54  ;;  %v4336_v20 = vmul.u32 %v9263_v57, %v4320_v3  ;;  %v9344_v5 = vsub.s32 32, %v4503_v56 }
 0x556   :  { %v9340_v22 = vmul.u32.u64.low %v9332_v11, %v4428_v26  ;;  %v9341_v13 = vmul.u32.u64.high %v9332_v11, %v4428_v26, %v9340_v22  ;;  %v9355_v51 = vmul.u32.u64.low %v9332_v11, %v4432_v42  ;;  %v9356_v57 = vmul.u32.u64.high %v9332_v11, %v4432_v42, %v9355_v51 }
 0x557   :  { %v9352_v21 = vadd.s32 %v4340_v12, %v4336_v20  ;;  %v4401_v31 = vshrl.u32 %v10370_v60, %v9251_v59  ;;  %v4422_v18 = vsel %vm4420_vm0, %v4410_v2, 2102212464  ;;  %v3693_v1 = vadd.f32 %v9156_v44, %v3575_v6 }
 0x558   :  { %v4516_v0 = vshrl.u32 %v10451_v7, %v9344_v5  ;;  %v4597_v50 = vshrl.u32 %v4596_v46, 23  ;;  %v3695_v17 = vadd.f32 %v9158_v27, %v3576_v9  ;;  %v10230_v41 = vand.u32 2147483647, %v9217_v16 }
 0x559   :  { %v4421_v15 = vsel %vm4417_vm2, %v4401_v31, %v4404_v48  ;;  %v4519_v36 = vshrl.u32 %v10372_v38, %v9344_v5  ;;  %v4342_v59 = vadd.s32 536870912, %v9352_v21  ;;  %v4423_v2 = vsel %vm4419_vm5, %v4407_v49, %v4422_v18 }
 0x55a   :  { %v9374_v44 = vshrl.u32 %v4501_v63, 5  ;;  %v4515_v34 = vshll.u32 %v10406_v14, %v4503_v56  ;;  %v4507_v27 = vshrl.u32 %v10404_v8, %v9344_v5  ;;  %v4510_v48 = vshrl.u32 %v10405_v33, %v9344_v5 }
 0x55b   :  { %v4513_v53 = vshrl.u32 %v10406_v14, %v9344_v5  ;;  %v4518_v3 = vshll.u32 %v10451_v7, %v4503_v56  ;;  %v3830_v26 = vadd.f32 %v9166_v25, %v3693_v1  ;;  %v4443_v12 = vadd.s32 1, %v9341_v13 }
 0x55c   :  { %v4517_v49 = vor.u32 %v4516_v0, %v4515_v34  ;;  %v5785_v63 = vadd.s32 4294967169, %v4597_v50  ;;  %v4506_v42 = vshll.u32 %v10370_v60, %v4503_v56  ;;  %v4509_v46 = vshll.u32 %v10404_v8, %v4503_v56 }
 0x55d   :  { %v4512_v20 = vshll.u32 %v10405_v33, %v4503_v56  ;;  %v4520_v6 = vor.u32 %v4519_v36, %v4518_v3  ;;  %v9389_v9 = vshrl.u32 %v4342_v59, 30  ;;  %v4424_v51 = vsel %vm4418_vm4, %v4421_v15, %v4423_v2 }
 0x55e   :  { %vm4442_vm6 = vc.u32 %v9356_v57, %v9340_v22  ;;  %v4496_v25 = vand.u32 8388607, %v10230_v41  ;;  %v4508_v31 = vor.u32 %v4507_v27, %v4506_v42  ;;  %v4511_v18 = vor.u32 %v4510_v48, %v4509_v46 }
 0x55f   :  { %v4514_v1 = vor.u32 %v4513_v53, %v4512_v20  ;;  %vm4524_vm7 = vcmp.lt.s32.totalorder %v9374_v44, 4  ;;  %v3832_v0 = vadd.f32 %v9168_v24, %v3695_v17  ;;  %v3942_v56 = vadd.f32 %v9176_v4, %v3830_v26  ;;  %v4168_v24 = vpop.f32.mrf.mxu0 }
 0x560   :  { %v4530_v50 = vsel %vm4524_vm7, %v4517_v49, 920167782  ;;  %v4444_v58 = vsel %vm4442_vm6, %v4443_v12, %v9341_v13  ;;  %v4534_v15 = vsel %vm4524_vm7, %v4520_v6, 1326507024  ;;  %v10232_v36 = vand.u32 2147483647, %v9321_v54 }
 0x561   :  { %v4603_v59 = vadd.s32 1, %v5785_v63  ;;  %v4440_v2 = vmul.u32 %v9332_v11, %v4424_v51  ;;  %v4497_v34 = vor.u32 8388608, %v4496_v25  ;;  %vm4521_vm8 = vcmp.lt.s32.totalorder %v9374_v44, 1  ;;  %v4170_v63 = vpop.f32.mrf.mxu0 }
 0x562   :  { %vm4523_vm9 = vcmp.lt.s32.totalorder %v9374_v44, 3  ;;  %v4344_v4 = vshll.u32 %v9389_v9, 30  ;;  %v4529_v17 = vsel %vm4521_vm8, %v4508_v31, %v4511_v18  ;;  %v4533_v11 = vsel %vm4521_vm8, %v4511_v18, %v4514_v1 }
 0x563   :  { %v4531_v13 = vsel %vm4523_vm9, %v4514_v1, %v4530_v50  ;;  %vm4604_vm14 = vcmp.gt.s32.totalorder %v4603_v59, 0  ;;  %v9414_v27 = vadd.s32 %v4444_v58, %v4440_v2  ;;  %v4535_v48 = vsel %vm4523_vm9, %v4517_v49, %v4534_v15 }
 0x564   :  { %v4605_v53 = vsel %vm4604_vm14, %v4603_v59, 0  ;;  %vm4522_vm11 = vcmp.lt.s32.totalorder %v9374_v44, 2  ;;  %v3944_v3 = vadd.f32 %v9178_v19, %v3832_v0  ;;  %v4050_v26 = vadd.f32 %v9192_v37, %v3942_v56 }
 0x565   :  { %v4532_v12 = vsel %vm4522_vm11, %v4529_v17, %v4531_v13  ;;  %v4536_v42 = vsel %vm4522_vm11, %v4533_v11, %v4535_v48  ;;  %v9427_v46 = vshll.u32 %v4497_v34, 8  ;;  %v4600_v20 = vand.u32 8388607, %v10232_v36 }
 0x566   :  { %v4607_v49 = vand.u32 31, %v4605_v53  ;;  %v4052_v6 = vadd.f32 %v9194_v28, %v3944_v3  ;;  %v9433_v51 = vsub.s32 %v9352_v21, %v4344_v4  ;;  %v4446_v19 = vadd.s32 536870912, %v9414_v27  ;;  %v4269_v21 = vpop.f32.mrf.mxu1 }
 0x567   :  { %v4169_v37 = vadd.f32 %v4168_v24, %v4050_v26  ;;  %v9437_v25 = vmul.u32.u64.low %v9427_v46, %v4532_v12  ;;  %v9438_v0 = vmul.u32.u64.high %v9427_v46, %v4532_v12, %v9437_v25  ;;  %v4526_v58 = vsel %vm4524_vm7, %v4514_v1, 2102212464 }
 0x568   :  { %v4608_v56 = vsub.s32 32, %v4607_v49  ;;  %v9441_v50 = vadd.f32 %v4170_v63, %v4052_v6  ;;  %v9446_v15 = vmul.u32.u64.low %v9427_v46, %v4536_v42  ;;  %v9447_v28 = vmul.u32.u64.high %v9427_v46, %v4536_v42, %v9446_v15 }
 0x569   :  { %v4505_v59 = vshrl.u32 %v10370_v60, %v9344_v5  ;;  %v4601_v2 = vor.u32 8388608, %v4600_v20  ;;  %v4347_v4 = vsub.s32 0, %v9433_v51  ;;  %v9454_v17 = vshrl.u32 %v4446_v19, 30 }
 0x56a   :  { %v4611_v34 = vshrl.u32 %v10404_v8, %v4608_v56  ;;  %v4614_v24 = vshrl.u32 %v10405_v33, %v4608_v56  ;;  %v4610_v13 = vshll.u32 %v10370_v60, %v4607_v49  ;;  %v4613_v1 = vshll.u32 %v10404_v8, %v4607_v49 }
 0x56b   :  { %v4525_v11 = vsel %vm4521_vm8, %v4505_v59, %v4508_v31  ;;  %v4527_v48 = vsel %vm4523_vm9, %v4511_v18, %v4526_v58  ;;  %v4617_v5 = vshrl.u32 %v10406_v14, %v4608_v56  ;;  %v9463_v3 = vadd.f32 %v4269_v21, %v4169_v37 }
 0x56c   :  { %v4606_v26 = vshrl.u32 %v4605_v53, 5  ;;  %v4612_v12 = vor.u32 %v4611_v34, %v4610_v13  ;;  %v4615_v63 = vor.u32 %v4614_v24, %v4613_v1  ;;  %v4616_v42 = vshll.u32 %v10405_v33, %v4607_v49 }
 0x56d   :  { %v4619_v20 = vshll.u32 %v10406_v14, %v4607_v49  ;;  %v4620_v6 = vshrl.u32 %v10451_v7, %v4608_v56  ;;  %v4622_v19 = vshll.u32 %v10451_v7, %v4607_v49  ;;  %v4623_v31 = vshrl.u32 %v10372_v38, %v4608_v56 }
 0x56e   :  { %v5774_v15 = vmin.u32 %v4347_v4, %v9433_v51  ;;  %v4448_v18 = vshll.u32 %v9454_v17, 30  ;;  %v4618_v58 = vor.u32 %v4617_v5, %v4616_v42  ;;  %v4641_v37 = vshll.u32 %v4601_v2, 8 }
 0x56f   :  { %v4528_v53 = vsel %vm4522_vm11, %v4525_v11, %v4527_v48  ;;  %v4547_v21 = vadd.s32 1, %v9438_v0  ;;  %v4621_v59 = vor.u32 %v4620_v6, %v4619_v20  ;;  %v4624_v34 = vor.u32 %v4623_v31, %v4622_v19  ;;  %v4271_v31 = vpop.f32.mrf.mxu1 }
 0x570   :  { %vm4546_vm12 = vc.u32 %v9447_v28, %v9437_v25  ;;  %vm4625_vm15 = vcmp.lt.s32.totalorder %v4606_v26, 1  ;;  %vm4628_vm13 = vcmp.lt.s32.totalorder %v4606_v26, 4  ;;  %v4700_v49 = vand.u32 2139095040, %v9463_v3 }
 0x571   :  { %vm4626_vm0 = vcmp.lt.s32.totalorder %v4606_v26, 2  ;;  %vm4627_vm1 = vcmp.lt.s32.totalorder %v4606_v26, 3  ;;  %v4633_v24 = vsel %vm4625_vm15, %v4612_v12, %v4615_v63  ;;  %v4634_v4 = vsel %vm4628_vm13, %v4621_v59, 920167782 }
 0x572   :  { %v4609_v2 = vshrl.u32 %v10370_v60, %v4608_v56  ;;  %v4630_v44 = vsel %vm4628_vm13, %v4618_v58, 2102212464  ;;  %v4635_v13 = vsel %vm4627_vm1, %v4618_v58, %v4634_v4  ;;  %v4637_v1 = vsel %vm4625_vm15, %v4615_v63, %v4618_v58 }
 0x573   :  { %v4349_v11 = vclz %v5774_v15  ;;  %v4548_v48 = vsel %vm4546_vm12, %v4547_v21, %v9438_v0  ;;  %v4636_v5 = vsel %vm4626_vm0, %v4633_v24, %v4635_v13  ;;  %v4638_v42 = vsel %vm4628_vm13, %v4624_v34, 1326507024 }
 0x574   :  { %v9485_v20 = vsub.s32 %v9414_v27, %v4448_v18  ;;  %v4544_v6 = vmul.u32 %v9427_v46, %v4528_v53  ;;  %v4629_v19 = vsel %vm4625_vm15, %v4609_v2, %v4612_v12  ;;  %v4639_v56 = vsel %vm4627_vm1, %v4621_v59, %v4638_v42  ;;  %v3577_v27 = vld [vmem:[%s10093_s6 + $0x30] sm:$0xff] }
 0x575   :  { %v4631_v4 = vsel %vm4627_vm1, %v4615_v63, %v4630_v44  ;;  %v4640_v58 = vsel %vm4626_vm0, %v4637_v1, %v4639_v56  ;;  %v9492_v15 = vmul.u32.u64.low %v4641_v37, %v4636_v5  ;;  %v9493_v41 = vmul.u32.u64.high %v4641_v37, %v4636_v5, %v9492_v15  ;;  %v3578_v63 = vld [vmem:[%s10093_s6 + $0x38] sm:$0xff] }
 0x576   :  { %v9499_v0 = vadd.s32 %v4548_v48, %v4544_v6  ;;  %v9501_v46 = vmul.u32.u64.low %v4641_v37, %v4640_v58  ;;  %v9502_v18 = vmul.u32.u64.high %v4641_v37, %v4640_v58, %v9501_v46  ;;  %v4701_v12 = vshrl.u32 %v4700_v49, 23 }
 0x577   :  { %v9508_v53 = vadd.f32 %v4271_v31, %v9441_v50  ;;  %v5775_v21 = vadd.s32 4294967294, %v4349_v11  ;;  %v4632_v59 = vsel %vm4626_vm0, %v4629_v19, %v4631_v4  ;;  %v3704_v24 = vadd.f32 %v9160_v47, %v3577_v27 }
 0x578   :  { %v5789_v34 = vadd.s32 4294967169, %v4701_v12  ;;  %v4651_v2 = vadd.s32 1, %v9493_v41  ;;  %v3706_v44 = vadd.f32 %v9162_v40, %v3578_v63  ;;  %v4451_v13 = vsub.s32 0, %v9485_v20 }
 0x579   :  { %v4550_v49 = vadd.s32 536870912, %v9499_v0  ;;  %v4648_v1 = vmul.u32 %v4641_v37, %v4632_v59  ;;  %vm4650_vm2 = vc.u32 %v9502_v18, %v9492_v15  ;;  %v4804_v11 = vand.u32 2139095040, %v9508_v53 }
 0x57a   :  { %v4707_v50 = vadd.s32 1, %v5789_v34  ;;  %vm5776_vm5 = vcmp.lt.s32.totalorder %v5775_v21, 0  ;;  %v4652_v26 = vsel %vm4650_vm2, %v4651_v2, %v9493_v41  ;;  %v3837_v47 = vadd.f32 %v9170_v61, %v3704_v24 }
 0x57b   :  { %v3839_v48 = vadd.f32 %v9172_v29, %v3706_v44  ;;  %v9522_v5 = vadd.s32 %v4652_v26, %v4648_v1  ;;  %v5778_v40 = vmin.u32 %v4451_v13, %v9485_v20  ;;  %v9525_v42 = vshrl.u32 %v4550_v49, 30 }
 0x57c   :  { %vm4708_vm3 = vcmp.gt.s32.totalorder %v4707_v50, 0  ;;  %v10231_v37 = vand.u32 2147483647, %v9463_v3  ;;  %v3950_v19 = vadd.f32 %v9183_v45, %v3837_v47  ;;  %v9529_v56 = vsel %vm5776_vm5, 0, %v5775_v21 }
 0x57d   :  { %10452 = vst [vmem:[#allocation11_spill] sm:$0xff] %v9525_v42  ;;  %v4709_v6 = vsel %vm4708_vm3, %v4707_v50, 0  ;;  %v4805_v41 = vshrl.u32 %v4804_v11, 23  ;;  %v3952_v61 = vadd.f32 %v9188_v32, %v3839_v48  ;;  %v9537_v4 = vadd.s32 %v9287_v55, %v9273_v10 }
 0x57e   :  { %v4711_v31 = vand.u32 31, %v4709_v6  ;;  %v9533_v29 = vadd.f32 %v9196_v62, %v3950_v19  ;;  %v4654_v58 = vadd.s32 536870912, %v9522_v5  ;;  %v4357_v46 = vsub.s32 4294967266, %v9529_v56 }
 0x57f   :  { %v4453_v12 = vclz %v5778_v40  ;;  %v4552_v45 = vshll.u32 %v9525_v42, 30  ;;  %v4704_v63 = vand.u32 8388607, %v10231_v37  ;;  %v5793_v59 = vadd.s32 4294967169, %v4805_v41 }
 0x580   :  { %v4712_v27 = vsub.s32 32, %v4711_v31  ;;  %v4714_v32 = vshll.u32 %v10370_v60, %v4711_v31  ;;  %v4717_v21 = vshll.u32 %v10404_v8, %v4711_v31  ;;  %v4720_v55 = vshll.u32 %v10405_v33, %v4711_v31 }
 0x581   :  { %v9551_v2 = vshrl.u32 %v4654_v58, 30  ;;  %v4710_v44 = vshrl.u32 %v4709_v6, 5  ;;  %v4723_v13 = vshll.u32 %v10406_v14, %v4711_v31  ;;  %v4726_v26 = vshll.u32 %v10451_v7, %v4711_v31 }
 0x582   :  { %v4715_v62 = vshrl.u32 %v10404_v8, %v4712_v27  ;;  %v4718_v10 = vshrl.u32 %v10405_v33, %v4712_v27  ;;  %v4721_v34 = vshrl.u32 %v10406_v14, %v4712_v27  ;;  %v4724_v24 = vshrl.u32 %v10451_v7, %v4712_v27 }
 0x583   :  { %10453 = vst [vmem:[#allocation12_spill] sm:$0xff] %v9551_v2  ;;  %v4727_v49 = vshrl.u32 %v10372_v38, %v4712_v27  ;;  %v4353_v47 = vsub.s32 32, %v9529_v56  ;;  %v9557_v48 = vadd.s32 127, %v4357_v46  ;;  %v4705_v40 = vor.u32 8388608, %v4704_v63 }
 0x584   :  { %v4716_v1 = vor.u32 %v4715_v62, %v4714_v32  ;;  %v4719_v50 = vor.u32 %v4718_v10, %v4717_v21  ;;  %v4722_v11 = vor.u32 %v4721_v34, %v4720_v55  ;;  %v4725_v19 = vor.u32 %v4724_v24, %v4723_v13  ;;  %v4175_v13 = vpop.f32.mrf.mxu0 }
 0x585   :  { %v5779_v41 = vadd.s32 4294967294, %v4453_v12  ;;  %v9560_v58 = vsub.s32 %v9499_v0, %v4552_v45  ;;  %v4728_v6 = vor.u32 %v4727_v49, %v4726_v26  ;;  %v4811_v37 = vadd.s32 1, %v5793_v59 }
 0x586   :  { %v4656_v36 = vshll.u32 %v9551_v2, 30  ;;  %v4713_v32 = vshrl.u32 %v10370_v60, %v4712_v27  ;;  %vm4729_vm4 = vcmp.lt.s32.totalorder %v4710_v44, 1  ;;  %vm4732_vm6 = vcmp.lt.s32.totalorder %v4710_v44, 4 }
 0x587   :  { %vm4731_vm7 = vcmp.lt.s32.totalorder %v4710_v44, 3  ;;  %v4734_v31 = vsel %vm4732_vm6, %v4722_v11, 2102212464  ;;  %v4737_v62 = vsel %vm4729_vm4, %v4716_v1, %v4719_v50  ;;  %v4738_v21 = vsel %vm4732_vm6, %v4725_v19, 920167782 }
 0x588   :  { %vm4730_vm8 = vcmp.lt.s32.totalorder %v4710_v44, 2  ;;  %v4739_v46 = vsel %vm4731_vm7, %v4722_v11, %v4738_v21  ;;  %v4745_v63 = vshll.u32 %v4705_v40, 8  ;;  %v10233_v12 = vand.u32 2147483647, %v9508_v53 }
 0x589   :  { %v4733_v10 = vsel %vm4729_vm4, %v4713_v32, %v4716_v1  ;;  %v4740_v0 = vsel %vm4730_vm8, %v4737_v62, %v4739_v46  ;;  %v4741_v45 = vsel %vm4729_vm4, %v4719_v50, %v4722_v11  ;;  %v4742_v59 = vsel %vm4732_vm6, %v4728_v6, 1326507024 }
 0x58a   :  { %v4735_v55 = vsel %vm4731_vm7, %v4719_v50, %v4734_v31  ;;  %v4743_v34 = vsel %vm4731_vm7, %v4725_v19, %v4742_v59  ;;  %v9566_v24 = vmul.u32.u64.low %v4745_v63, %v4740_v0  ;;  %v9567_v27 = vmul.u32.u64.high %v4745_v63, %v4740_v0, %v9566_v24 }
 0x58b   :  { %vm5780_vm9 = vcmp.lt.s32.totalorder %v5779_v41, 0  ;;  %v9571_v49 = vsub.s32 %v9522_v5, %v4656_v36  ;;  %v4744_v26 = vsel %vm4730_vm8, %v4741_v45, %v4743_v34  ;;  %vm4812_vm14 = vcmp.gt.s32.totalorder %v4811_v37, 0  ;;  %v4276_v36 = vpop.f32.mrf.mxu1 }
 0x58c   :  { %v4555_v1 = vsub.s32 0, %v9560_v58  ;;  %v9575_v40 = vmul.u32.u64.low %v4745_v63, %v4744_v26  ;;  %v9576_v32 = vmul.u32.u64.high %v4745_v63, %v4744_v26, %v9575_v40  ;;  %v4813_v11 = vsel %vm4812_vm14, %v4811_v37, 0 }
 0x58d   :  { %v9579_v50 = vadd.f32 %v9198_v30, %v3952_v61  ;;  %v4736_v19 = vsel %vm4730_vm8, %v4733_v10, %v4735_v55  ;;  %v4808_v6 = vand.u32 8388607, %v10233_v12  ;;  %v4815_v31 = vand.u32 31, %v4813_v11 }
 0x58e   :  { %v4354_v5 = vshll.u32 %v9433_v51, %v9529_v56  ;;  %v4355_v62 = vshrl.u32 %v9537_v4, %v4353_v47  ;;  %v4176_v21 = vadd.f32 %v4175_v13, %v9533_v29  ;;  %v4755_v46 = vadd.s32 1, %v9567_v27 }
 0x58f   :  { %v4359_v37 = vshll.u32 %v9557_v48, 23  ;;  %v9591_v30 = vsel %vm5780_vm9, 0, %v5779_v41  ;;  %v4659_v61 = vsub.s32 0, %v9571_v49  ;;  %v4816_v44 = vsub.s32 32, %v4815_v31 }
 0x590   :  { %v5782_v10 = vmin.u32 %v4555_v1, %v9560_v58  ;;  %v4752_v0 = vmul.u32 %v4745_v63, %v4736_v19  ;;  %vm4754_vm11 = vc.u32 %v9576_v32, %v9566_v24  ;;  %v9597_v51 = vadd.f32 %v4276_v36, %v4176_v21 }
 0x591   :  { %v4756_v56 = vsel %vm4754_vm11, %v4755_v46, %v9567_v27  ;;  %v4809_v29 = vor.u32 8388608, %v4808_v6  ;;  %v4819_v4 = vshrl.u32 %v10404_v8, %v4816_v44  ;;  %v4822_v47 = vshrl.u32 %v10405_v33, %v4816_v44 }
 0x592   :  { %10454 = vst [vmem:[#allocation14_spill] sm:$0xff] %v9597_v51  ;;  %v4757_v48 = vadd.s32 %v4756_v56, %v4752_v0  ;;  %v4818_v41 = vshll.u32 %v10370_v60, %v4815_v31  ;;  %v4821_v45 = vshll.u32 %v10404_v8, %v4815_v31  ;;  %v4825_v59 = vshrl.u32 %v10406_v14, %v4816_v44 }
 0x593   :  { %v5786_v63 = vmin.u32 %v4659_v61, %v9571_v49  ;;  %v4824_v55 = vshll.u32 %v10405_v33, %v4815_v31  ;;  %v4827_v34 = vshll.u32 %v10406_v14, %v4815_v31  ;;  %v4828_v27 = vshrl.u32 %v10451_v7, %v4816_v44 }
 0x594   :  { %v4758_v13 = vadd.s32 536870912, %v4757_v48  ;;  %v4814_v26 = vshrl.u32 %v4813_v11, 5  ;;  %v4820_v1 = vor.u32 %v4819_v4, %v4818_v41  ;;  %v4823_v40 = vor.u32 %v4822_v47, %v4821_v45 }
 0x595   :  { %v4826_v19 = vor.u32 %v4825_v59, %v4824_v55  ;;  %v4829_v6 = vor.u32 %v4828_v27, %v4827_v34  ;;  %v4830_v36 = vshll.u32 %v10451_v7, %v4815_v31  ;;  %v4831_v21 = vshrl.u32 %v10372_v38, %v4816_v44 }
 0x596   :  { %v9611_v46 = vor.u32 %v4355_v62, %v4354_v5  ;;  %v9613_v0 = vor.u32 4788187, %v4359_v37  ;;  %v4461_v61 = vsub.s32 4294967266, %v9591_v30  ;;  %v9616_v56 = vshrl.u32 %v4758_v13, 30 }
 0x597   :  { %v4557_v12 = vclz %v5782_v10  ;;  %v4832_v39 = vor.u32 %v4831_v21, %v4830_v36  ;;  %v4849_v52 = vshll.u32 %v4809_v29, 8  ;;  %v4908_v11 = vand.u32 2139095040, %v9597_v51  ;;  %v4177_v21 = vpop.f32.mrf.mxu0 }
 0x598   :  { %10455 = vst [vmem:[#allocation21_spill] sm:$0xff] %v9616_v56  ;;  %v4661_v4 = vclz %v5786_v63  ;;  %v4760_v47 = vshll.u32 %v9616_v56, 30  ;;  %vm4833_vm12 = vcmp.lt.s32.totalorder %v4814_v26, 1  ;;  %vm4836_vm15 = vcmp.lt.s32.totalorder %v4814_v26, 4 }
 0x599   :  { %v4838_v31 = vsel %vm4836_vm15, %v4826_v19, 2102212464  ;;  %v4841_v41 = vsel %vm4833_vm12, %v4820_v1, %v4823_v40  ;;  %v4842_v5 = vsel %vm4836_vm15, %v4829_v6, 920167782  ;;  %v4846_v62 = vsel %vm4836_vm15, %v4832_v39, 1326507024 }
 0x59a   :  { %v9620_v37 = vsub.s32 %v4757_v48, %v4760_v47  ;;  %v4817_v45 = vshrl.u32 %v10370_v60, %v4816_v44  ;;  %vm4835_vm13 = vcmp.lt.s32.totalorder %v4814_v26, 3  ;;  %v4845_v59 = vsel %vm4833_vm12, %v4823_v40, %v4826_v19 }
 0x59b   :  { %vm4834_vm0 = vcmp.lt.s32.totalorder %v4814_v26, 2  ;;  %v4843_v10 = vsel %vm4835_vm13, %v4826_v19, %v4842_v5  ;;  %v4847_v29 = vsel %vm4835_vm13, %v4829_v6, %v4846_v62  ;;  %v4909_v55 = vshrl.u32 %v4908_v11, 23 }
 0x59c   :  { %v4763_v63 = vsub.s32 0, %v9620_v37  ;;  %v4837_v34 = vsel %vm4833_vm12, %v4817_v45, %v4820_v1  ;;  %v4839_v27 = vsel %vm4835_vm13, %v4823_v40, %v4838_v31  ;;  %v4844_v13 = vsel %vm4834_vm0, %v4841_v41, %v4843_v10 }
 0x59d   :  { %v5783_v36 = vadd.s32 4294967294, %v4557_v12  ;;  %v4848_v39 = vsel %vm4834_vm0, %v4845_v59, %v4847_v29  ;;  %v9626_v48 = vmul.u32.u64.low %v4849_v52, %v4844_v13  ;;  %v9627_v47 = vmul.u32.u64.high %v4849_v52, %v4844_v13, %v9626_v48  ;;  %v4278_v12 = vpop.f32.mrf.mxu1 }
 0x59e   :  { %v5787_v44 = vadd.s32 4294967294, %v4661_v4  ;;  %v5790_v35 = vmin.u32 %v4763_v63, %v9620_v37  ;;  %v9631_v19 = vmul.u32.u64.low %v4849_v52, %v4848_v39  ;;  %v9632_v6 = vmul.u32.u64.high %v4849_v52, %v4848_v39, %v9631_v19 }
 0x59f   :  { %v4457_v11 = vsub.s32 32, %v9591_v30  ;;  %v4462_v1 = vadd.s32 127, %v4461_v61  ;;  %v4840_v40 = vsel %vm4834_vm0, %v4837_v34, %v4839_v27  ;;  %v5797_v31 = vadd.s32 4294967169, %v4909_v55 }
 0x5a0   :  { %v4363_v41 = vcvt.s32.f32 %v9611_v46  ;;  %v4441_v5 = vadd.s32 %v9340_v22, %v9356_v57  ;;  %v4178_v62 = vadd.f32 %v4177_v21, %v9579_v50  ;;  %v4765_v4 = vclz %v5790_v35 }
 0x5a1   :  { %v4361_v45 = vand.u32 2147483647, %v9613_v0  ;;  %vm5784_vm1 = vcmp.lt.s32.totalorder %v5783_v36, 0  ;;  %v4859_v59 = vadd.s32 1, %v9627_v47  ;;  %v4915_v10 = vadd.s32 1, %v5797_v31 }
 0x5a2   :  { %vm5788_vm2 = vcmp.lt.s32.totalorder %v5787_v44, 0  ;;  %v4856_v61 = vmul.u32 %v4849_v52, %v4840_v40  ;;  %vm4858_vm5 = vc.u32 %v9632_v6, %v9626_v48  ;;  %v9644_v26 = vadd.f32 %v4278_v12, %v4178_v62 }
 0x5a3   :  { %v4459_v46 = vshrl.u32 %v4441_v5, %v4457_v11  ;;  %v4463_v29 = vshll.u32 %v4462_v1, 23  ;;  %v4860_v22 = vsel %vm4858_vm5, %v4859_v59, %v9627_v47  ;;  %vm4916_vm3 = vcmp.gt.s32.totalorder %v4915_v10, 0 }
 0x5a4   :  { %v4458_v35 = vshll.u32 %v9485_v20, %v9591_v30  ;;  %v5791_v57 = vadd.s32 4294967294, %v4765_v4  ;;  %v4861_v50 = vadd.s32 %v4860_v22, %v4856_v61  ;;  %v4917_v0 = vsel %vm4916_vm3, %v4915_v10, 0 }
 0x5a5   :  { %v9649_v55 = vsel %vm5784_vm1, 0, %v5783_v36  ;;  %v9651_v63 = vsel %vm5788_vm2, 0, %v5787_v44  ;;  %v10237_v52 = vand.u32 2147483647, %v9597_v51  ;;  %v4919_v34 = vand.u32 31, %v4917_v0 }
 0x5a6   :  { %v9656_v27 = vadd.s32 %v9437_v25, %v9447_v28  ;;  %v4862_v13 = vadd.s32 536870912, %v4861_v50  ;;  %v5012_v21 = vand.u32 2139095040, %v9644_v26  ;;  %v9659_v39 = vmul.f32 %v4363_v41, %v4361_v45 }
 0x5a7   :  { %v9661_v20 = vor.u32 %v4459_v46, %v4458_v35  ;;  %v9663_v30 = vor.u32 4788187, %v4463_v29  ;;  %v4920_v36 = vsub.s32 32, %v4919_v34  ;;  %v4565_v47 = vsub.s32 4294967266, %v9649_v55 }
 0x5a8   :  { %v4669_v44 = vsub.s32 4294967266, %v9651_v63  ;;  %vm5792_vm4 = vcmp.lt.s32.totalorder %v5791_v57, 0  ;;  %v9667_v19 = vshrl.u32 %v4862_v13, 30  ;;  %v4912_v25 = vand.u32 8388607, %v10237_v52 }
 0x5a9   :  { %v4923_v28 = vshrl.u32 %v10404_v8, %v4920_v36  ;;  %v4926_v11 = vshrl.u32 %v10405_v33, %v4920_v36  ;;  %v4929_v1 = vshrl.u32 %v10406_v14, %v4920_v36  ;;  %v4922_v31 = vshll.u32 %v10370_v60, %v4919_v34 }
 0x5aa   :  { %10456 = vst [vmem:[#allocation23_spill] sm:$0xff] %v9667_v19  ;;  %v4864_v40 = vshll.u32 %v9667_v19, 30  ;;  %v4925_v12 = vshll.u32 %v10404_v8, %v4919_v34  ;;  %v5013_v41 = vshrl.u32 %v5012_v21, 23  ;;  %v9677_v5 = vsel %vm5792_vm4, 0, %v5791_v57 }
 0x5ab   :  { %v4928_v62 = vshll.u32 %v10405_v33, %v4919_v34  ;;  %v4931_v4 = vshll.u32 %v10406_v14, %v4919_v34  ;;  %v4932_v45 = vshrl.u32 %v10451_v7, %v4920_v36  ;;  %v4918_v10 = vshrl.u32 %v4917_v0, 5 }
 0x5ac   :  { %v9682_v59 = vsub.s32 %v4861_v50, %v4864_v40  ;;  %v4924_v61 = vor.u32 %v4923_v28, %v4922_v31  ;;  %v4927_v46 = vor.u32 %v4926_v11, %v4925_v12  ;;  %v4934_v35 = vshll.u32 %v10451_v7, %v4919_v34 }
 0x5ad   :  { %v4930_v29 = vor.u32 %v4929_v1, %v4928_v62  ;;  %v4933_v22 = vor.u32 %v4932_v45, %v4931_v4  ;;  %v4935_v13 = vshrl.u32 %v10372_v38, %v4920_v36  ;;  %v4665_v57 = vsub.s32 32, %v9651_v63 }
 0x5ae   :  { %v4670_v21 = vadd.s32 127, %v4669_v44  ;;  %v4867_v52 = vsub.s32 0, %v9682_v59  ;;  %v4773_v2 = vsub.s32 4294967266, %v9677_v5  ;;  %v4913_v50 = vor.u32 8388608, %v4912_v25 }
 0x5af   :  { %v4936_v40 = vor.u32 %v4935_v13, %v4934_v35  ;;  %v5801_v0 = vadd.s32 4294967169, %v5013_v41  ;;  %v4921_v11 = vshrl.u32 %v10370_v60, %v4920_v36  ;;  %vm4937_vm6 = vcmp.lt.s32.totalorder %v4918_v10, 1 }
 0x5b0   :  { %v5794_v28 = vmin.u32 %v4867_v52, %v9682_v59  ;;  %vm4940_vm7 = vcmp.lt.s32.totalorder %v4918_v10, 4  ;;  %vm4939_vm8 = vcmp.lt.s32.totalorder %v4918_v10, 3  ;;  %v4945_v1 = vsel %vm4937_vm6, %v4924_v61, %v4927_v46 }
 0x5b1   :  { %v4942_v34 = vsel %vm4940_vm7, %v4930_v29, 2102212464  ;;  %v4946_v31 = vsel %vm4940_vm7, %v4933_v22, 920167782  ;;  %vm4938_vm9 = vcmp.lt.s32.totalorder %v4918_v10, 2  ;;  %v4949_v62 = vsel %vm4937_vm6, %v4927_v46, %v4930_v29 }
 0x5b2   :  { %v4869_v44 = vclz %v5794_v28  ;;  %v4947_v12 = vsel %vm4939_vm8, %v4930_v29, %v4946_v31  ;;  %v4950_v45 = vsel %vm4940_vm7, %v4936_v40, 1326507024  ;;  %v4953_v25 = vshll.u32 %v4913_v50, 8 }
 0x5b3   :  { %v4948_v4 = vsel %vm4938_vm9, %v4945_v1, %v4947_v12  ;;  %v5019_v35 = vadd.s32 1, %v5801_v0  ;;  %v4941_v13 = vsel %vm4937_vm6, %v4921_v11, %v4924_v61  ;;  %v4943_v52 = vsel %vm4939_vm8, %v4927_v46, %v4942_v34 }
 0x5b4   :  { %v5795_v41 = vadd.s32 4294967294, %v4869_v44  ;;  %v4951_v19 = vsel %vm4939_vm8, %v4933_v22, %v4950_v45  ;;  %v4649_v36 = vadd.s32 %v9492_v15, %v9502_v18  ;;  %v4561_v29 = vsub.s32 32, %v9649_v55 }
 0x5b5   :  { %v4952_v42 = vsel %vm4938_vm9, %v4949_v62, %v4951_v19  ;;  %v9696_v51 = vmul.u32.u64.low %v4953_v25, %v4948_v4  ;;  %v9697_v56 = vmul.u32.u64.high %v4953_v25, %v4948_v4, %v9696_v51  ;;  %v4774_v28 = vadd.s32 127, %v4773_v2 }
 0x5b6   :  { %v9701_v1 = vmul.u32.u64.low %v4953_v25, %v4952_v42  ;;  %v9702_v40 = vmul.u32.u64.high %v4953_v25, %v4952_v42, %v9701_v1  ;;  %v9704_v50 = vadd.s32 127, %v4565_v47  ;;  %v4667_v61 = vshrl.u32 %v4649_v36, %v4665_v57 }
 0x5b7   :  { %v4944_v46 = vsel %vm4938_vm9, %v4941_v13, %v4943_v52  ;;  %vm5020_vm14 = vcmp.gt.s32.totalorder %v5019_v35, 0  ;;  %v4671_v22 = vshll.u32 %v4670_v21, 23  ;;  %vm5796_vm11 = vcmp.lt.s32.totalorder %v5795_v41, 0 }
 0x5b8   :  { %v10457_v15 = vand.u32 2147483647, %v9644_v26  ;;  %v5021_v19 = vsel %vm5020_vm14, %v5019_v35, 0  ;;  %v4666_v0 = vshll.u32 %v9571_v49, %v9651_v63  ;;  %v4769_v2 = vsub.s32 32, %v9677_v5 }
 0x5b9   :  { %v4963_v42 = vadd.s32 1, %v9697_v56  ;;  %v5023_v11 = vand.u32 31, %v5021_v19  ;;  %v4753_v47 = vadd.s32 %v9566_v24, %v9576_v32  ;;  %v4775_v10 = vshll.u32 %v4774_v28, 23 }
 0x5ba   :  { %v5016_v18 = vand.u32 8388607, %v10457_v15  ;;  %v4960_v57 = vmul.u32 %v4953_v25, %v4944_v46  ;;  %vm4962_vm12 = vc.u32 %v9702_v40, %v9696_v51  ;;  %v9717_v21 = vor.u32 %v4667_v61, %v4666_v0 }
 0x5bb   :  { %v9719_v34 = vsel %vm5796_vm11, 0, %v5795_v41  ;;  %v4964_v31 = vsel %vm4962_vm12, %v4963_v42, %v9697_v56  ;;  %v5024_v49 = vsub.s32 32, %v5023_v11  ;;  %v9722_v63 = vor.u32 4788187, %v4671_v22 }
 0x5bc   :  { %v4770_v44 = vshll.u32 %v9620_v37, %v9677_v5  ;;  %v4965_v12 = vadd.s32 %v4964_v31, %v4960_v57  ;;  %v5017_v62 = vor.u32 8388608, %v5016_v18  ;;  %v4771_v24 = vshrl.u32 %v4753_v47, %v4769_v2 }
 0x5bd   :  { %v5027_v32 = vshrl.u32 %v10404_v8, %v5024_v49  ;;  %v5030_v4 = vshrl.u32 %v10405_v33, %v5024_v49  ;;  %v5033_v45 = vshrl.u32 %v10406_v14, %v5024_v49  ;;  %v9729_v25 = vor.u32 4788187, %v4775_v10 }
 0x5be   :  { %v4877_v35 = vsub.s32 4294967266, %v9719_v34  ;;  %v4966_v56 = vadd.s32 536870912, %v4965_v12  ;;  %v5026_v41 = vshll.u32 %v10370_v60, %v5023_v11  ;;  %v5029_v13 = vshll.u32 %v10404_v8, %v5023_v11 }
 0x5bf   :  { %v5032_v37 = vshll.u32 %v10405_v33, %v5023_v11  ;;  %v5035_v5 = vshll.u32 %v10406_v14, %v5023_v11  ;;  %v5036_v52 = vshrl.u32 %v10451_v7, %v5024_v49  ;;  %v5022_v28 = vshrl.u32 %v5021_v19, 5 }
 0x5c0   :  { %v9737_v36 = vshrl.u32 %v4966_v56, 30  ;;  %v5038_v1 = vshll.u32 %v10451_v7, %v5023_v11  ;;  %v5039_v61 = vshrl.u32 %v10372_v38, %v5024_v49  ;;  %v5028_v46 = vor.u32 %v5027_v32, %v5026_v41 }
 0x5c1   :  { %v5031_v22 = vor.u32 %v5030_v4, %v5029_v13  ;;  %v5034_v15 = vor.u32 %v5033_v45, %v5032_v37  ;;  %v5037_v18 = vor.u32 %v5036_v52, %v5035_v5  ;;  %v4857_v8 = vadd.s32 %v9626_v48, %v9632_v6 }
 0x5c2   :  { %v4878_v0 = vadd.s32 127, %v4877_v35  ;;  %v4968_v33 = vshll.u32 %v9737_v36, 30  ;;  %v5040_v14 = vor.u32 %v5039_v61, %v5038_v1  ;;  %v4772_v2 = vor.u32 %v4771_v24, %v4770_v44 }
 0x5c3   :  { %v4777_v42 = vand.u32 2147483647, %v9729_v25  ;;  %v4873_v19 = vsub.s32 32, %v9719_v34  ;;  %v5057_v47 = vshll.u32 %v5017_v62, 8  ;;  %v4874_v38 = vshll.u32 %v9682_v59, %v9719_v34 }
 0x5c4   :  { %v9748_v7 = vsub.s32 %v4965_v12, %v4968_v33  ;;  %vm5041_vm15 = vcmp.lt.s32.totalorder %v5022_v28, 1  ;;  %vm5044_vm13 = vcmp.lt.s32.totalorder %v5022_v28, 4  ;;  %v4879_v57 = vshll.u32 %v4878_v0, 23 }
 0x5c5   :  { %v5049_v11 = vsel %vm5041_vm15, %v5028_v46, %v5031_v22  ;;  %v5050_v48 = vsel %vm5044_vm13, %v5037_v18, 920167782  ;;  %v5053_v6 = vsel %vm5041_vm15, %v5031_v22, %v5034_v15  ;;  %v5054_v10 = vsel %vm5044_vm13, %v5040_v14, 1326507024 }
 0x5c6   :  { %v4971_v31 = vsub.s32 0, %v9748_v7  ;;  %vm5043_vm0 = vcmp.lt.s32.totalorder %v5022_v28, 3  ;;  %v5046_v44 = vsel %vm5044_vm13, %v5034_v15, 2102212464  ;;  %v5025_v62 = vshrl.u32 %v10370_v60, %v5024_v49 }
 0x5c7   :  { %vm5042_vm1 = vcmp.lt.s32.totalorder %v5022_v28, 2  ;;  %v5051_v24 = vsel %vm5043_vm0, %v5034_v15, %v5050_v48  ;;  %v5055_v59 = vsel %vm5043_vm0, %v5037_v18, %v5054_v10  ;;  %v4875_v34 = vshrl.u32 %v4857_v8, %v4873_v19 }
 0x5c8   :  { %v5798_v12 = vmin.u32 %v4971_v31, %v9748_v7  ;;  %v5052_v32 = vsel %vm5042_vm1, %v5049_v11, %v5051_v24  ;;  %v5056_v4 = vsel %vm5042_vm1, %v5053_v6, %v5055_v59  ;;  %v5045_v45 = vsel %vm5041_vm15, %v5025_v62, %v5028_v46 }
 0x5c9   :  { %v5047_v25 = vsel %vm5043_vm0, %v5031_v22, %v5046_v44  ;;  %v9758_v35 = vmul.u32.u64.low %v5057_v47, %v5056_v4  ;;  %v9759_v56 = vmul.u32.u64.high %v5057_v47, %v5056_v4, %v9758_v35  ;;  %v4880_v41 = vor.u32 4788187, %v4879_v57 }
 0x5ca   :  { %v4973_v13 = vclz %v5798_v12  ;;  %v9761_v37 = vmul.u32.u64.low %v5057_v47, %v5052_v32  ;;  %v9762_v60 = vmul.u32.u64.high %v5057_v47, %v5052_v32, %v9761_v37  ;;  %vm4283_vm2 = vcmp.lt.s32.totalorder %v9203_v23, 0 }
 0x5cb   :  { %v4365_v49 = vxor.u32 2147483648, %v9659_v39  ;;  %v4467_v5 = vcvt.s32.f32 %v9661_v20  ;;  %v4673_v52 = vand.u32 2147483647, %v9722_v63  ;;  %v4779_v1 = vcvt.s32.f32 %v4772_v2 }
 0x5cc   :  { %v4465_v61 = vand.u32 2147483647, %v9663_v30  ;;  %v4876_v46 = vor.u32 %v4875_v34, %v4874_v38  ;;  %v5799_v22 = vadd.s32 4294967294, %v4973_v13  ;;  %v5048_v15 = vsel %vm5042_vm1, %v5045_v45, %v5047_v25 }
 0x5cd   :  { %v4567_v18 = vshll.u32 %v9704_v50, 23  ;;  %v4675_v8 = vcvt.s32.f32 %v9717_v21  ;;  %v4780_v0 = vmul.f32 %v4779_v1, %v4777_v42  ;;  %vm5066_vm5 = vc.u32 %v9759_v56, %v9761_v37 }
 0x5ce   :  { %v10458_v33 = vand.u32 2147483647, %v9203_v23  ;;  %v4563_v30 = vshrl.u32 %v9656_v27, %v4561_v29  ;;  %v4881_v63 = vand.u32 2147483647, %v4880_v41  ;;  %vm5800_vm4 = vcmp.lt.s32.totalorder %v5799_v22, 0 }
 0x5cf   :  { %v5067_v50 = vadd.s32 1, %v9762_v60  ;;  %v4676_v28 = vmul.f32 %v4675_v8, %v4673_v52  ;;  %v4961_v21 = vadd.s32 %v9696_v51, %v9702_v40  ;;  %v4976_v14 = vsel %vm5800_vm4, 0, %v5799_v22 }
 0x5d0   :  { %vm9777_vm3 = vcmp.le.f32.partialorder %v10458_v33, 0.7853982  ;;  %v5064_v2 = vmul.u32 %v5057_v47, %v5048_v15  ;;  %v4883_v42 = vcvt.s32.f32 %v4876_v46  ;;  %v4977_v19 = vsub.s32 32, %v4976_v14 }
 0x5d1   :  { %v4981_v38 = vsub.s32 4294967266, %v4976_v14  ;;  %v5068_v11 = vsel %vm5066_vm5, %v5067_v50, %v9762_v60  ;;  %v4562_v48 = vshll.u32 %v9560_v58, %v9649_v55  ;;  %v4568_v6 = vor.u32 4788187, %v4567_v18 }
 0x5d2   :  { %v4781_v27 = vxor.u32 2147483648, %v4780_v0  ;;  %v5069_v29 = vadd.s32 %v5068_v11, %v5064_v2  ;;  %vm4387_vm6 = vcmp.lt.s32.totalorder %v9206_v43, 0  ;;  %v4884_v10 = vmul.f32 %v4883_v42, %v4881_v63 }
 0x5d3   :  { %v4978_v57 = vshll.u32 %v9748_v7, %v4976_v14  ;;  %v4979_v31 = vshrl.u32 %v4961_v21, %v4977_v19  ;;  %v4982_v51 = vadd.s32 127, %v4981_v38  ;;  %v4468_v40 = vmul.f32 %v4467_v5, %v4465_v61  ;;  %v10473_v14 = vld [vmem:[#allocation21_spill] sm:$0xff] }
 0x5d4   :  { %v4564_v47 = vor.u32 %v4563_v30, %v4562_v48  ;;  %vm4699_vm7 = vcmp.lt.s32.totalorder %v9463_v3, 0  ;;  %v5070_v44 = vadd.s32 536870912, %v5069_v29  ;;  %v4366_v62 = vsel %vm4283_vm2, %v4365_v49, %v9659_v39 }
 0x5d5   :  { %v4677_v58 = vxor.u32 2147483648, %v4676_v28  ;;  %v4980_v55 = vor.u32 %v4979_v31, %v4978_v57  ;;  %v4983_v24 = vshll.u32 %v4982_v51, 23  ;;  %v10461_v59 = vand.u32 2147483647, %v9206_v43  ;;  %v10479_v51 = vld [vmem:[#allocation12_spill] sm:$0xff] }
 0x5d6   :  { %v4569_v7 = vand.u32 2147483647, %v4568_v6  ;;  %v10464_v12 = vand.u32 2147483647, %v9321_v54  ;;  %v4782_v4 = vsel %vm4699_vm7, %v4781_v27, %v4780_v0  ;;  %v9810_v39 = vshrl.u32 %v5070_v44, 30  ;;  %v10477_v6 = vld [vmem:[#allocation14_spill] sm:$0xff] }
 0x5d7   :  { %vm9798_vm8 = vcmp.le.f32.partialorder %v10461_v59, 0.7853982  ;;  %vm4595_vm14 = vcmp.lt.s32.totalorder %v9321_v54, 0  ;;  %v10467_v45 = vand.u32 2147483647, %v9463_v3  ;;  %v4885_v35 = vxor.u32 2147483648, %v4884_v10 }
 0x5d8   :  { %vm9804_vm9 = vcmp.le.f32.partialorder %v10464_v12, 0.7853982  ;;  %v4984_v41 = vor.u32 4788187, %v4983_v24  ;;  %v9822_v13 = vsel %vm9777_vm3, %v9203_v23, %v4366_v62  ;;  %v4469_v60 = vxor.u32 2147483648, %v4468_v40 }
 0x5d9   :  { %vm9815_vm11 = vcmp.le.f32.partialorder %v10467_v45, 0.7853982  ;;  %v4571_v49 = vcvt.s32.f32 %v4564_v47  ;;  %v5072_v5 = vshll.u32 %v9810_v39, 30  ;;  %vm4491_vm12 = vcmp.lt.s32.totalorder %v9217_v16, 0  ;;  %v10480_v47 = vld [vmem:[#allocation23_spill] sm:$0xff] }
 0x5da   :  { %v4678_v52 = vsel %vm4595_vm14, %v4677_v58, %v4676_v28  ;;  %v4785_v1 = vsel %vm9815_vm11, %v9463_v3, %v4782_v4  ;;  %v4985_v61 = vand.u32 2147483647, %v4984_v41  ;;  %v4987_v46 = vcvt.s32.f32 %v4980_v55 }
 0x5db   :  { %v4367_v22 = vsub.s32 4, %v9389_v9  ;;  %v4572_v15 = vmul.f32 %v4571_v49, %v4569_v7  ;;  %vm4803_vm15 = vcmp.lt.s32.totalorder %v9508_v53, 0  ;;  %v9833_v18 = vsub.s32 %v5069_v29, %v5072_v5 }
 0x5dc   :  { %6214 = vcosq.f32 %v9822_v13  ;;  %v4471_v8 = vsub.s32 4, %v9454_v17  ;;  %v4886_v0 = vsel %vm4803_vm15, %v4885_v35, %v4884_v10  ;;  %v4988_v33 = vmul.f32 %v4987_v46, %v4985_v61  ;;  %v10478_v10 = vld [vmem:[#allocation11_spill] sm:$0xff] }
 0x5dd   :  { %v4470_v30 = vsel %vm4387_vm6, %v4469_v60, %v4468_v40  ;;  %v10470_v63 = vand.u32 2147483647, %v9217_v16  ;;  %v4681_v28 = vsel %vm9804_vm9, %v9321_v54, %v4678_v52  ;;  %6216 = vsinq.f32 %v4785_v1 }
 0x5de   :  { %v5075_v21 = vsub.s32 0, %v9833_v18  ;;  %v4783_v2 = vsub.s32 4, %v10473_v14  ;;  %6218 = vcosq.f32 %v4785_v1  ;;  %v10474_v42 = vand.u32 2147483647, %v9508_v53 }
 0x5df   :  { %vm9843_vm13 = vcmp.le.f32.partialorder %v10470_v63, 0.7853982  ;;  %v4989_v38 = vxor.u32 2147483648, %v4988_v33  ;;  %v4573_v11 = vxor.u32 2147483648, %v4572_v15  ;;  %vm4907_vm1 = vcmp.lt.s32.totalorder %v10477_v6, 0 }
 0x5e0   :  { %vm9854_vm0 = vcmp.le.f32.partialorder %v10474_v42, 0.7853982  ;;  %v5802_v27 = vmin.u32 %v5075_v21, %v9833_v18  ;;  %v4473_v29 = vsel %vm9798_vm8, %v9206_v43, %v4470_v30  ;;  %v4575_v57 = vsub.s32 4, %v10478_v10 }
 0x5e1   :  { %v4889_v48 = vsel %vm9854_vm0, %v9508_v53, %v4886_v0  ;;  %6220 = vcosq.f32 %v4681_v28  ;;  %v4990_v31 = vsel %vm4907_vm1, %v4989_v38, %v4988_v33  ;;  %v4679_v40 = vsub.s32 4, %v10479_v51 }
 0x5e2   :  { %6222 = vsinq.f32 %v4681_v28  ;;  %v4887_v44 = vsub.s32 4, %v10480_v47  ;;  %v5077_v62 = vclz %v5802_v27  ;;  %v4784_v58 = vsel %vm4699_vm7, %v4783_v2, %v10473_v14 }
 0x5e3   :  { %6224 = vcosq.f32 %v4889_v48  ;;  %v10481_v55 = vand.u32 2147483647, %v10477_v6  ;;  %v4991_v59 = vsub.s32 4, %v9737_v36  ;;  %v4574_v7 = vsel %vm4491_vm12, %v4573_v11, %v4572_v15 }
 0x5e4   :  { %6226 = vsinq.f32 %v4889_v48  ;;  %v5803_v4 = vadd.s32 4294967294, %v5077_v62  ;;  %v4368_v45 = vsel %vm4283_vm2, %v4367_v22, %v9389_v9  ;;  %v4472_v35 = vsel %vm4387_vm6, %v4471_v8, %v9454_v17 }
 0x5e5   :  { %vm9876_vm5 = vcmp.le.f32.partialorder %v10481_v55, 0.7853982  ;;  %6228 = vcosq.f32 %v4473_v29  ;;  %v4576_v41 = vsel %vm4491_vm12, %v4575_v57, %v10478_v10  ;;  %v4680_v60 = vsel %vm4595_vm14, %v4679_v40, %v10479_v51 }
 0x5e6   :  { %v4993_v12 = vsel %vm9876_vm5, %v10477_v6, %v4990_v31  ;;  %v4786_v49 = vsel %vm9815_vm11, 0, %v4784_v58  ;;  %v4888_v9 = vsel %vm4803_vm15, %v4887_v44, %v10480_v47  ;;  %vm5804_vm2 = vcmp.lt.s32.totalorder %v5803_v4, 0 }
 0x5e7   :  { %v4577_v17 = vsel %vm9843_vm13, %v9217_v16, %v4574_v7  ;;  %v4992_v5 = vsel %vm4907_vm1, %v4991_v59, %v9737_v36  ;;  %6230 = vcosq.f32 %v4993_v12  ;;  %v5080_v52 = vsel %vm5804_vm2, 0, %v5803_v4 }
 0x5e8   :  { %6232 = vsinq.f32 %v4993_v12  ;;  %v5065_v25 = vadd.s32 %v9761_v37, %v9759_v56  ;;  %v5081_v1 = vsub.s32 32, %v5080_v52  ;;  %v5085_v61 = vsub.s32 4294967266, %v5080_v52 }
 0x5e9   :  { %6234 = vsinq.f32 %v4473_v29  ;;  %v4682_v46 = vsel %vm9804_vm9, 0, %v4680_v60  ;;  %v4790_v22 = vadd.s32 3, %v4786_v49  ;;  %v4890_v15 = vsel %vm9854_vm0, 0, %v4888_v9  ;;  %v9915_v8 = vpop.eup %6214 }
 0x5ea   :  { %v4994_v36 = vsel %vm9876_vm5, 0, %v4992_v5  ;;  %v5082_v0 = vshll.u32 %v9833_v18, %v5080_v52  ;;  %v5083_v33 = vshrl.u32 %v5065_v25, %v5081_v1  ;;  %v5086_v30 = vadd.s32 127, %v5085_v61  ;;  %v6217_v56 = vpop.eup %6216 }
 0x5eb   :  { %v4370_v37 = vsel %vm9777_vm3, 0, %v4368_v45  ;;  %v4474_v32 = vsel %vm9798_vm8, 0, %v4472_v35  ;;  %6236 = vsinq.f32 %v4577_v17  ;;  %v6219_v63 = vpop.eup %6218  ;;  %v4578_v28 = vsel %vm9843_vm13, 0, %v4576_v41 }
 0x5ec   :  { %6238 = vcosq.f32 %v4577_v17  ;;  %v5084_v21 = vor.u32 %v5083_v33, %v5082_v0  ;;  %v5087_v14 = vshll.u32 %v5086_v30, 23  ;;  %v4686_v2 = vadd.s32 3, %v4682_v46 }
 0x5ed   :  { %v4894_v42 = vadd.s32 3, %v4890_v15  ;;  %v4998_v18 = vadd.s32 3, %v4994_v36  ;;  %v4791_v19 = vand.u32 3, %v4790_v22  ;;  %6240 = vsinq.f32 %v9822_v13 }
 0x5ee   :  { %v6221_v38 = vpop.eup %6220  ;;  %v5088_v20 = vor.u32 4788187, %v5087_v14  ;;  %v4794_v11 = vxor.u32 2147483648, %v6217_v56  ;;  %v9927_v34 = vadd.s32 3, %v4370_v37  ;;  %v4797_v27 = vxor.u32 2147483648, %v6219_v63 }
 0x5ef   :  { %v6223_v48 = vpop.eup %6222  ;;  %v4478_v10 = vadd.s32 3, %v4474_v32  ;;  %v4582_v50 = vadd.s32 3, %v4578_v28  ;;  %v5091_v31 = vcvt.s32.f32 %v5084_v21  ;;  %v9929_v40 = vand.u32 3, %v4998_v18 }
 0x5f0   :  { %v6225_v29 = vpop.eup %6224  ;;  %v5089_v57 = vand.u32 2147483647, %v5088_v20  ;;  %v4895_v47 = vand.u32 3, %v4894_v42  ;;  %vm4793_vm3 = vcmp.eq.s32.totalorder %v4791_v19, 0  ;;  %v4687_v44 = vand.u32 3, %v4686_v2 }
 0x5f1   :  { %v6227_v51 = vpop.eup %6226  ;;  %v4795_v58 = vsel %vm4793_vm3, %v6219_v63, %v4794_v11  ;;  %vm4796_vm4 = vcmp.eq.s32.totalorder %v4791_v19, 2  ;;  %v4690_v55 = vxor.u32 2147483648, %v6223_v48  ;;  %v5095_v24 = vsub.s32 4, %v9810_v39  ;;  %v5113_v20 = vld [vmem:[%s10094_s7] sm:$0x1] }
 0x5f2   :  { %v9931_v62 = vpop.eup %6228  ;;  %v5092_v13 = vmul.f32 %v5091_v31, %v5089_v57  ;;  %v4901_v59 = vxor.u32 2147483648, %v6225_v29  ;;  %v4798_v7 = vsel %vm4796_vm4, %v4797_v27, %v6217_v56  ;;  %v4693_v12 = vxor.u32 2147483648, %v6221_v38 }
 0x5f3   :  { %v10484_v45 = vand.u32 2147483647, %v9644_v26  ;;  %vm5011_vm7 = vcmp.lt.s32.totalorder %v9644_v26, 0  ;;  %v4898_v60 = vxor.u32 2147483648, %v6227_v51  ;;  %vm4893_vm8 = vweird.f32 %v9508_v53 }
 0x5f4   :  { %v6231_v4 = vpop.eup %6230  ;;  %v5093_v41 = vxor.u32 2147483648, %v5092_v13  ;;  %vm4897_vm9 = vcmp.eq.s32.totalorder %v4895_v47, 0  ;;  %vm4900_vm14 = vcmp.eq.s32.totalorder %v4895_v47, 2  ;;  %vm4792_vm11 = vcmp.lt.s32.totalorder %v4791_v19, 2 }
 0x5f5   :  { %vm9936_vm6 = vcmp.le.f32.partialorder %v10484_v45, 0.7853982  ;;  %v6233_v49 = vpop.eup %6232  ;;  %vm4689_vm12 = vcmp.eq.s32.totalorder %v4687_v44, 0  ;;  %vm5000_vm15 = vcmp.lt.s32.totalorder %v9929_v40, 2  ;;  %v4799_v5 = vsel %vm4792_vm11, %v4795_v58, %v4798_v7 }
 0x5f6   :  { %v6235_v9 = vpop.eup %6234  ;;  %v5094_v17 = vsel %vm5011_vm7, %v5093_v41, %v5092_v13  ;;  %v4691_v52 = vsel %vm4689_vm12, %v6221_v38, %v4690_v55  ;;  %vm4692_vm13 = vcmp.eq.s32.totalorder %v4687_v44, 2  ;;  %v5096_v25 = vsel %vm5011_vm7, %v5095_v24, %v9810_v39 }
 0x5f7   :  { %v5097_v1 = vsel %vm9936_vm6, %v9644_v26, %v5094_v17  ;;  %v4902_v61 = vsel %vm4900_vm14, %v4901_v59, %v6227_v51  ;;  %v4694_v46 = vsel %vm4692_vm13, %v4693_v12, %v6223_v48  ;;  %v5002_v15 = vxor.u32 2147483648, %v6233_v49 }
 0x5f8   :  { %v6237_v22 = vpop.eup %6236  ;;  %6242 = vcosq.f32 %v5097_v1  ;;  %v5005_v36 = vxor.u32 2147483648, %v6231_v4  ;;  %v4899_v0 = vsel %vm4897_vm9, %v6225_v29, %v4898_v60  ;;  %vm4997_vm0 = vweird.f32 %v10477_v6 }
 0x5f9   :  { %v6239_v33 = vpop.eup %6238  ;;  %6244 = vsinq.f32 %v5097_v1  ;;  %vm5001_vm1 = vcmp.eq.s32.totalorder %v9929_v40, 0  ;;  %vm5004_vm5 = vcmp.eq.s32.totalorder %v9929_v40, 2  ;;  %vm4789_vm2 = vweird.f32 %v9463_v3 }
 0x5fa   :  { %v5098_v39 = vsel %vm9936_vm6, 0, %v5096_v25  ;;  %vm4896_vm3 = vcmp.lt.s32.totalorder %v4895_v47, 2  ;;  %vm4688_vm4 = vcmp.lt.s32.totalorder %v4687_v44, 2  ;;  %v4583_v30 = vand.u32 3, %v4582_v50  ;;  %v6241_v56 = vpop.eup %6240 }
 0x5fb   :  { %v4903_v37 = vsel %vm4896_vm3, %v4899_v0, %v4902_v61  ;;  %v9954_v32 = vsel %vm4789_vm2, nan, %v4799_v5  ;;  %v4695_v63 = vsel %vm4688_vm4, %v4691_v52, %v4694_v46  ;;  %v4586_v28 = vxor.u32 2147483648, %v6237_v22 }
 0x5fc   :  { %v5003_v21 = vsel %vm5001_vm1, %v6231_v4, %v5002_v15  ;;  %v5006_v14 = vsel %vm5004_vm5, %v5005_v36, %v6233_v49  ;;  %v4589_v2 = vxor.u32 2147483648, %v6239_v33  ;;  %v4479_v42 = vand.u32 3, %v4478_v10 }
 0x5fd   :  { %v5102_v18 = vadd.s32 3, %v5098_v39  ;;  %v4482_v19 = vxor.u32 2147483648, %v6235_v9  ;;  %v4485_v3 = vxor.u32 2147483648, %v9931_v62  ;;  %v4375_v38 = vand.u32 3, %v9927_v34 }
 0x5fe   :  { %v4904_v11 = vsel %vm4893_vm8, nan, %v4903_v37  ;;  %vm4585_vm6 = vcmp.eq.s32.totalorder %v4583_v30, 0  ;;  %v4378_v48 = vxor.u32 2147483648, %v6241_v56  ;;  %v4381_v27 = vxor.u32 2147483648, %v9915_v8 }
 0x5ff   :  { %v5007_v29 = vsel %vm5000_vm15, %v5003_v21, %v5006_v14  ;;  %vm4584_vm7 = vcmp.lt.s32.totalorder %v4583_v30, 2  ;;  %v4587_v10 = vsel %vm4585_vm6, %v6239_v33, %v4586_v28  ;;  %vm4588_vm9 = vcmp.eq.s32.totalorder %v4583_v30, 2 }
 0x600   :  { %v4590_v50 = vsel %vm4588_vm9, %v4589_v2, %v6237_v22  ;;  %vm4481_vm14 = vcmp.eq.s32.totalorder %v4479_v42, 0  ;;  %vm4484_vm11 = vcmp.eq.s32.totalorder %v4479_v42, 2  ;;  %v5127_v34 = vsel %vm2032_vm10, %v5113_v20, 0 }
 0x601   :  { %v4483_v57 = vsel %vm4481_vm14, %v9931_v62, %v4482_v19  ;;  %v4486_v31 = vsel %vm4484_vm11, %v4485_v3, %v6235_v9  ;;  %vm4377_vm12 = vcmp.eq.s32.totalorder %v4375_v38, 0  ;;  %vm4380_vm8 = vcmp.eq.s32.totalorder %v4375_v38, 2 }
 0x602   :  { %v5103_v53 = vand.u32 3, %v5102_v18  ;;  %v5008_v51 = vsel %vm4997_vm0, nan, %v5007_v29  ;;  %v4379_v40 = vsel %vm4377_vm12, %v9915_v8, %v4378_v48  ;;  %v4382_v47 = vsel %vm4380_vm8, %v4381_v27, %v6241_v56 }
 0x603   :  { %vm4685_vm15 = vweird.f32 %v9321_v54  ;;  %v4591_v44 = vsel %vm4584_vm7, %v4587_v10, %v4590_v50  ;;  %vm4480_vm13 = vcmp.lt.s32.totalorder %v4479_v42, 2  ;;  %v9973_v13 = vand.u32 4294901760, %v5127_v34 }
 0x604   :  { %v9976_v58 = vand.u32 4294901760, %v9954_v32  ;;  %vm4581_vm10 = vweird.f32 %v9217_v16  ;;  %v4487_v62 = vsel %vm4480_vm13, %v4483_v57, %v4486_v31  ;;  %vm4376_vm1 = vcmp.lt.s32.totalorder %v4375_v38, 2 }
 0x605   :  { %v6243_v55 = vpop.eup %6242  ;;  %v9979_v6 = vand.u32 4294901760, %v5008_v51  ;;  %v9981_v24 = vand.u32 4294901760, %v4904_v11  ;;  %v4696_v8 = vsel %vm4685_vm15, nan, %v4695_v63  ;;  %v4383_v59 = vsel %vm4376_vm1, %v4379_v40, %v4382_v47 }
 0x606   :  { %v6245_v54 = vpop.eup %6244  ;;  %vm5108_vm0 = vcmp.eq.s32.totalorder %v5103_v53, 2  ;;  %v5109_v7 = vxor.u32 2147483648, %v6243_v55  ;;  %v4592_v12 = vsel %vm4581_vm10, nan, %v4591_v44  ;;  %vm4477_vm5 = vweird.f32 %v9206_v43 }
 0x607   :  { %v5106_v4 = vxor.u32 2147483648, %v6245_v54  ;;  %v4488_v45 = vsel %vm4477_vm5, nan, %v4487_v62  ;;  %vm4373_vm2 = vweird.f32 %v9203_v23  ;;  %v9986_v16 = vsub.f32 %v5127_v34, %v9973_v13  ;;  %v5114_v62 = vld [vmem:[%s10095_s8] sm:$0x3]  ;;  %s6276_s8 = smov [#allocation2]  }
 0x608   :  { %vm5105_vm3 = vcmp.eq.s32.totalorder %v5103_v53, 0  ;;  %v5110_v35 = vsel %vm5108_vm0, %v5109_v7, %v6245_v54  ;;  %v9988_v41 = vand.u32 4294901760, %v4696_v8  ;;  %v4384_v60 = vsel %vm4373_vm2, nan, %v4383_v59  ;;  %s5701_s30 = sshll.u32 %s6276_s8, 4  ;;  %s5702_s30 = int_to_ptr.vmem [resolvable:$true] %s5701_s30 }
 0x609   :  { %vm5104_vm4 = vcmp.lt.s32.totalorder %v5103_v53, 2  ;;  %v5107_v49 = vsel %vm5105_vm3, %v6243_v55, %v5106_v4  ;;  %v9991_v9 = vsub.f32 %v5008_v51, %v9979_v6  ;;  %v9993_v17 = vand.u32 4294901760, %v4592_v12  ;;  %s6246_s4 = scalar_lea.vmem %s5702_s30, 32  ;;  %p6251_p1 = scmp.lt.s32.totalorder %s5702_s30, %s5702_s30 }
 0x60a   :  { %vm5101_vm6 = vweird.f32 %v9644_v26  ;;  %v5111_v43 = vsel %vm5104_vm4, %v5107_v49, %v5110_v35  ;;  %v9996_v5 = vand.u32 4294901760, %v4488_v45  ;;  %v9999_v23 = vsub.f32 %v4904_v11, %v9981_v24  ;;  %p6247_p0 = scmp.ne.s32.totalorder %s5702_s30, %s6246_s4  ;;  %p6252_p2 = scmp.lt.s32.totalorder %s6246_s4, %s6246_s4 }
 0x60b   :  { %v5112_v52 = vsel %vm5101_vm6, nan, %v5111_v43  ;;  %v10003_v25 = vsub.f32 %v9954_v32, %v9976_v58  ;;  %v10005_v1 = vand.u32 4294901760, %v4384_v60  ;;  %v5204_v61 = vand.u32 4294901760, %v9986_v16 }
 0x60c   :  { %v10008_v46 = vand.u32 4294901760, %v5112_v52  ;;  %v10011_v22 = vsub.f32 %v4696_v8, %v9988_v41  ;;  %v10014_v26 = vsub.f32 %v4592_v12, %v9993_v17  ;;  %v5245_v15 = vand.u32 4294901760, %v9991_v9  ;;  %p6253_p3 = por %p6252_p2, %p6251_p1 }
 0x60d   :  { %v5251_v0 = vand.u32 4294901760, %v9999_v23  ;;  %v10021_v33 = vsub.f32 %v4488_v45, %v9996_v5  ;;  %v10025_v39 = vsub.f32 %v4384_v60, %v10005_v1  ;;  %v5205_v30 = vsub.f32 %v9986_v16, %v5204_v61 }
 0x60e   :  { %5154 = vmatprep.subr.mxu0 %v10008_v46  ;;  %v5238_v36 = vsub.f32 %v5112_v52, %v10008_v46  ;;  %v5257_v56 = vand.u32 4294901760, %v10003_v25  ;;  %v5263_v32 = vand.u32 4294901760, %v10011_v22  ;;  %v5246_v63 = vsub.f32 %v9991_v9, %v5245_v15  ;;  %p6254_p4 = pnand %p6253_p3, %p6247_p0 }
 0x60f   :  { %5156 = vmatpush1.msra.mxu0 %v9979_v6  ;;  %v5269_v28 = vand.u32 4294901760, %v10014_v26  ;;  %v5252_v14 = vsub.f32 %v9999_v23, %v5251_v0  ;;  %v5275_v2 = vand.u32 4294901760, %v10021_v33  ;;  %v5206_v42 = vand.u32 4294901760, %v5205_v30 }
 0x610   :  { %5158 = vmatprep.subr.mxu0 %v9981_v24  ;;  %v5239_v37 = vand.u32 4294901760, %v5238_v36  ;;  %v5258_v18 = vsub.f32 %v10003_v25, %v5257_v56  ;;  %v5281_v19 = vand.u32 4294901760, %v10025_v39  ;;  %v5264_v38 = vsub.f32 %v10011_v22, %v5263_v32 }
 0x611   :  { %5160 = vmatpush1.msra.mxu0 %v9976_v58  ;;  %v5247_v20 = vand.u32 4294901760, %v5246_v63  ;;  %v5270_v11 = vsub.f32 %v10014_v26, %v5269_v28  ;;  %v5253_v48 = vand.u32 4294901760, %v5252_v14  ;;  %v5276_v27 = vsub.f32 %v10021_v33, %v5275_v2 }
 0x612   :  { %5162 = vmatprep.subr.mxu0 %v9988_v41  ;;  %v5240_v21 = vsub.f32 %v5238_v36, %v5239_v37  ;;  %v5259_v29 = vand.u32 4294901760, %v5258_v18  ;;  %v5282_v10 = vsub.f32 %v10025_v39, %v5281_v19  ;;  %v5265_v50 = vand.u32 4294901760, %v5264_v38 }
 0x613   :  { %5164 = vmatpush1.msra.mxu0 %v9993_v17  ;;  %v5271_v34 = vand.u32 4294901760, %v5270_v11  ;;  %v5277_v57 = vand.u32 4294901760, %v5276_v27  ;;  %v10487_v53 = vmov 0.0   ;;  %v5116_v51 = vlaneseq }
 0x614   :  { %5166 = vmatprep.subr.mxu0 %v9996_v5  ;;  %v5241_v3 = vand.u32 4294901760, %v5240_v21  ;;  %v5283_v31 = vand.u32 4294901760, %v5282_v10 }
 0x615   :  { %5168 = vmatpush1.msra.mxu0 %v10005_v1  ;;  %v5117_v40 = vshrl.u32 %v5116_v51, 7  ;;  %vm5692_vm7 = vcmp.lt.s32.totalorder %v5116_v51, 256 }
 0x616   :  { %5242 = vmatprep.subr.mxu1 %v5241_v3  ;;  %5351 = vmatprep.subr.mxu0 %v5238_v36 }
 0x617   :  { %5207 = vmatmul.mubr.f32.vlgmr.msra.gmra.mxu0 %v5206_v42  ;;  %5248 = vmatpush1.msra.mxu1 %v5247_v20  ;;  %v5118_v47 = vsub.s32 0, %v5117_v40  ;;  %v5122_v44 = vsub.s32 1, %v5117_v40 }
 0x618   :  { %5354 = vmatpush1.msra.mxu0 %v9991_v9  ;;  %5254 = vmatprep.subr.mxu1 %v5253_v48  ;;  %v6275_v9 = vmov 1966171168  }
 0x619   :  { %5357 = vmatprep.subr.mxu0 %v9999_v23  ;;  %5260 = vmatpush1.msra.mxu1 %v5259_v29 }
 0x61a   :  { %5360 = vmatpush1.msra.mxu0 %v10003_v25  ;;  %5266 = vmatprep.subr.mxu1 %v5265_v50 }
 0x61b   :  { %5363 = vmatprep.subr.mxu0 %v10011_v22  ;;  %5272 = vmatpush1.msra.mxu1 %v5271_v34 }
 0x61c   :  { %5366 = vmatpush1.msra.mxu0 %v10014_v26  ;;  %5278 = vmatprep.subr.mxu1 %v5277_v57 }
 0x61d   :  { %5369 = vmatprep.subr.mxu0 %v10021_v33  ;;  %5284 = vmatpush1.msra.mxu1 %v5283_v31 }
 0x61e   :  { %5372 = vmatpush1.msra.mxu0 %v10025_v39  ;;  %5405 = vmatprep.mubr.f32.mxu0 %v10487_v53 }
 0x61f   :  { %5439 = vmatprep.subr.mxu1 %v10008_v46  ;;  %5523 = vmatprep.subr.mxu0 %v5239_v37 }
 0x620   :  { %5319 = vmatmul.mubr.f32.vlgmr.msra.gmra.mxu1 %v9973_v13  ;;  %5408 = vmatmul.mubr.f32.vlgmr.msra.gmra.mxu0 %v9986_v16 }
 0x621   :  { %5441 = vmatpush1.msra.mxu1 %v9979_v6  ;;  %5527 = vmatpush1.msra.mxu0 %v5245_v15 }
 0x622   :  { %5443 = vmatprep.subr.mxu1 %v9981_v24  ;;  %5531 = vmatprep.subr.mxu0 %v5251_v0 }
 0x623   :  { %5445 = vmatpush1.msra.mxu1 %v9976_v58  ;;  %5535 = vmatpush1.msra.mxu0 %v5257_v56 }
 0x624   :  { %5447 = vmatprep.subr.mxu1 %v9988_v41  ;;  %5539 = vmatprep.subr.mxu0 %v5263_v32 }
 0x625   :  { %5449 = vmatpush1.msra.mxu1 %v9993_v17  ;;  %5543 = vmatpush1.msra.mxu0 %v5269_v28 }
 0x626   :  { %5451 = vmatprep.subr.mxu1 %v9996_v5  ;;  %5547 = vmatprep.subr.mxu0 %v5275_v2 }
 0x627   :  { %5453 = vmatpush1.msra.mxu1 %v10005_v1  ;;  %5551 = vmatpush1.msra.mxu0 %v5281_v19 }
 0x628   :  { %5486 = vmatprep.mubr.f32.mxu1 %v10487_v53  ;;  %5617 = vmatprep.subr.mxu1 %v10008_v46 }
 0x629   :  { %5490 = vmatmul.mubr.f32.vlgmr.msra.gmra.mxu1 %v5204_v61  ;;  %5584 = vmatprep.mubr.f32.mxu0 %v10487_v53 }
 0x62a   :  { %5619 = vmatpush1.msra.mxu1 %v9979_v6  ;;  %5586 = vmatmul.mubr.f32.vlgmr.msra.gmra.mxu0 %v9973_v13  ;;  %v5123_v6 = vrot.slane %v5114_v62, %v5122_v44 }
 0x62b   :  { %5621 = vmatprep.subr.mxu1 %v9981_v24  ;;  %5664 = vmatprep.mubr.f32.mxu1 %v10487_v53 }
 0x62c   :  { %5623 = vmatpush1.msra.mxu1 %v9976_v58  ;;  %v5119_v58 = vrot.slane %v5114_v62, %v5118_v47 }
 0x62d   :  { %5625 = vmatprep.subr.mxu1 %v9988_v41 }
 0x62e   :  { %5627 = vmatpush1.msra.mxu1 %v9993_v17  ;;  %v5676_v17 = vunpack.c.l.s4 %v6275_v9 }
 0x62f   :  { %5629 = vmatprep.subr.mxu1 %v9996_v5 }
 0x630   :  { %5631 = vmatpush1.msra.mxu1 %v10005_v1  ;;  %v5677_v52 = vunpack.c.0.s8 %v5676_v17 }
 0x631   :  { %5666 = vmatmul.mubr.f32.vlgmr.msra.gmra.mxu1 %v9973_v13 }
 0x632   :  { %v5680_v15 = vsub.s32 %v5677_v52, %v5117_v40 }
 0x6d7   :  { %v5208_v55 = vpop.f32.mrf.mxu0 }
 0x6d8   :  { %v5209_v59 = vadd.f32 %v5208_v55, %v5119_v58 }
 0x6d9   :  { %v5210_v24 = vpop.f32.mrf.mxu0 }
 0x6da   :  { %v5211_v54 = vadd.f32 %v5210_v24, %v5123_v6 }
 0x6e0   :  { %v5320_v8 = vpop.f32.mrf.mxu1  ;;  %v5409_v12 = vpop.f32.mrf.mxu0 }
 0x6e1   :  { %v5321_v4 = vadd.f32 %v5320_v8, %v5209_v59 }
 0x6e2   :  { %v5322_v7 = vpop.f32.mrf.mxu1  ;;  %v5411_v13 = vpop.f32.mrf.mxu0 }
 0x6e3   :  { %v5323_v45 = vadd.f32 %v5322_v7, %v5211_v54  ;;  %v5410_v60 = vadd.f32 %v5409_v12, %v5321_v4 }
 0x6e5   :  { %v5412_v49 = vadd.f32 %v5411_v13, %v5323_v45 }
 0x6e9   :  { %v5491_v16 = vpop.f32.mrf.mxu1 }
 0x6ea   :  { %v5587_v41 = vpop.f32.mrf.mxu0  ;;  %v5492_v43 = vadd.f32 %v5491_v16, %v5410_v60 }
 0x6eb   :  { %v5493_v35 = vpop.f32.mrf.mxu1 }
 0x6ec   :  { %v5494_v5 = vadd.f32 %v5493_v35, %v5412_v49  ;;  %v5589_v23 = vpop.f32.mrf.mxu0  ;;  %v5588_v1 = vadd.f32 %v5587_v41, %v5492_v43 }
 0x6ee   :  { %v5590_v61 = vadd.f32 %v5589_v23, %v5494_v5 }
 0x6f1   :  { %v5667_v25 = vpop.f32.mrf.mxu1 }
 0x6f2   :  { %v5668_v22 = vadd.f32 %v5667_v25, %v5588_v1 }
 0x6f3   :  { %v5669_v46 = vpop.f32.mrf.mxu1 }
 0x6f4   :  { %v5670_v26 = vadd.f32 %v5669_v46, %v5590_v61 }
 0x6f6   :  { %v5674_v36 = vcombine.low %v5668_v22, %v5670_v26 }
 0x6f8   :  { %v5681_v0 = vrot.slane %v5674_v36, %v5680_v15 }
 0x6fa   :  { %v5688_v33 = vrot.slane %v5681_v0, %v5680_v15 }
 0x6fc   :  { %5694 = vst.msk [vmem:[#allocation2] sm:$0x3] %vm5692_vm7, %v5688_v33 }
 0x6fd   :  { %6257 = shalt.err (!%p6254_p4)
}
 0x6fe   :  { %5704 = dma.vmem_to_hbm [thread:$0]  %s5702_s30, 32, %s10096_s9, [#allocation3]  }
 0x6ff   :  { %6266 = dma.done.wait [#allocation3], 32  }
 0x700   :  { %6267 = vsyncadd [#allocation3], 4294967264 }
 0x701   :  { %5708 = vsyncpa [#allocation3], 1 }

</bundles_post_ra>
